<compile_context>
chip_gen: v7x
topology: tpu7x:2x2x1
jax: 0.10.0
libtpu: 0.0.40
codegen_flags: <defaults>
</compile_context>

<pallas_src>
import functools

import numpy as np
import jax
import jax.numpy as jnp
from jax.experimental import pallas as pl
from jax.experimental.pallas import tpu as pltpu

LN10 = float(np.log(10.0))
LEAKY_SLOPE = 0.2

# ---- scaled-down generator config -------------------------------------------
# Real linda_johnson checkpoint: n_mel=80, ngf=32, ratios=(8,8,2,2), n_res=3.
# Scaled down (same layer structure / op semantics) for a small demo run.
N_MEL = 16
NGF = 8
RATIOS = (8, 2)
N_RES = 2
T_MEL = 8
HOP = int(np.prod(RATIOS))


def _leaky(x):
    return jnp.where(x >= 0, x, LEAKY_SLOPE * x)


# ---- in-kernel helpers (only static slicing / concat / matmul: robust to lower)
def _concat_lanes(pieces):
    """Concatenate along the lane (time) axis, keeping operand counts small."""
    while len(pieces) > 1:
        pieces = [jnp.concatenate(pieces[i:i + 8], axis=1)
                  for i in range(0, len(pieces), 8)]
    return pieces[0]


def _reflect_pad(x, p):
    """ReflectionPad1d(p) on a (C, L) f32 activation via static column slices."""
    if p == 0:
        return x
    L = x.shape[1]
    left = [x[:, i:i + 1] for i in range(p, 0, -1)]
    right = [x[:, L - 1 - i:L - i] for i in range(1, p + 1)]
    return _concat_lanes(left + [x] + right)


def _zero_pad1(x):
    """Zero-pad one column on each side (polyphase ConvTranspose input)."""
    z = jnp.zeros((x.shape[0], 1), x.dtype)
    return _concat_lanes([z, x, z])


def _tap_conv(x_pad, w, b, *, K, dil, l_out):
    """Dilated 1-D conv of a pre-padded (C_in, l_out + dil*(K-1)) activation as
    one (C_out, K*C_in) @ (K*C_in, l_out) bf16 MXU matmul, f32 accumulate.

    w: (C_out, K*C_in) bf16 (taps folded into contraction dim), b: (C_out, 1) f32.
    Slab built in f32 (8-row, sublane-aligned pieces) then cast once for the MXU.
    """
    if K == 1:
        slab = x_pad[:, :l_out]
    else:
        slab = jnp.concatenate(
            [x_pad[:, k * dil:k * dil + l_out] for k in range(K)], axis=0)
    return jnp.dot(w, slab.astype(jnp.bfloat16),
                   preferred_element_type=jnp.float32) + b


def _phase_interleave(z, stride):
    """Polyphase ConvTranspose output (stride*C_out, L) -> (C_out, stride*L),
    out[:, stride*l + r] = z[r*C_out:(r+1)*C_out, l].

    Exact (pure data movement, no rounding) via static column slices on
    VMEM-resident data — replaces the old wrapper-side reshape/transpose HBM
    scatter.  TODO(synk): at checkpoint scale use a lane shuffle
    (pltpu.roll + select) instead of per-column slices.
    """
    c_out = z.shape[0] // stride
    L = z.shape[1]
    cols = [z[(m % stride) * c_out:(m % stride + 1) * c_out,
              m // stride:m // stride + 1]
            for m in range(stride * L)]
    return _concat_lanes(cols)


# ---- fused generator kernel ---------------------------------------------------
def _build_fused_kernel(plan, n_weights):
    """plan: static list of layer descriptors; weights arrive as flat VMEM refs."""

    def kernel(*refs):
        mel_ref, wrefs, o_ref = refs[0], refs[1:-1], refs[-1]
        assert len(wrefs) == n_weights
        it = iter(wrefs)

        def nxt():
            return next(it)[...]

        # wrapper's `mel / np.log(10)`
        x = mel_ref[...] * jnp.float32(1.0 / LN10)

        for lyr in plan:
            L = x.shape[1]
            kind = lyr["kind"]
            if kind == "conv":
                w, b = nxt(), nxt()
                if lyr["pre_leaky"]:
                    x = _leaky(x)
                xp = _reflect_pad(x, lyr["pad"])
                x = _tap_conv(xp, w, b, K=lyr["K"], dil=1, l_out=L)
                if lyr["post_tanh"]:
                    x = jnp.tanh(x)
            elif kind == "convT":
                # LeakyReLU + ConvTranspose1d as a polyphase 3-tap conv over the
                # zero-padded-by-1 input (leaky(0)==0 keeps the padding exact),
                # then in-kernel phase interleave to waveform rate.
                w, b = nxt(), nxt()
                xp = _zero_pad1(_leaky(x))
                z = _tap_conv(xp, w, b, K=3, dil=1, l_out=L)
                x = _phase_interleave(z, lyr["stride"])
            else:  # fused MelGAN ResnetBlock
                w1, b1, w2, b2, ws, bs = (nxt(), nxt(), nxt(),
                                          nxt(), nxt(), nxt())
                d = lyr["dil"]
                hp = _reflect_pad(_leaky(x), d)
                h = _tap_conv(hp, w1, b1, K=3, dil=d, l_out=L)
                h = _tap_conv(_leaky(h), w2, b2, K=1, dil=1, l_out=L)
                sc = _tap_conv(x, ws, bs, K=1, dil=1, l_out=L)
                x = sc + h
        o_ref[...] = x

    return kernel


def pallas_forward(plan, flat_ws, mel):
    l_out = mel.shape[1] * HOP
    kernel = _build_fused_kernel(plan, len(flat_ws))
    wav = pl.pallas_call(
        kernel,
        out_shape=jax.ShapeDtypeStruct((1, l_out), jnp.float32),
        in_specs=[pl.BlockSpec(memory_space=pltpu.MemorySpace.VMEM)
                  for _ in range(1 + len(flat_ws))],
        out_specs=pl.BlockSpec(memory_space=pltpu.MemorySpace.VMEM),
    )(mel.astype(jnp.float32), *flat_ws)
    return wav[0]  # (1, L_audio) -> waves[0] -> (L_audio,)


# ---- pure-JAX reference (independent lowering, matched bf16 numerics) ---------
def _ref_conv(x, w_oik, b, *, dilation=1, reflect_pad=0, pre_leaky=False,
              post_tanh=False):
    if pre_leaky:
        x = _leaky(x)
    if reflect_pad:
        x = jnp.pad(x, ((0, 0), (reflect_pad, reflect_pad)), mode="reflect")
    y = jax.lax.conv_general_dilated(
        x.astype(jnp.bfloat16)[None], w_oik.astype(jnp.bfloat16),
        window_strides=(1,), padding="VALID", rhs_dilation=(dilation,),
        dimension_numbers=("NCH", "OIH", "NCH"),
        preferred_element_type=jnp.float32)[0]
    y = y + b.reshape(-1, 1)
    if post_tanh:
        y = jnp.tanh(y)
    return y


def _ref_convT(x, w_iok, b, *, stride, padding, out_pad):
    # Zero-upsample + flipped-kernel lowering (independent of the polyphase path).
    x = _leaky(x)
    c_in, L = x.shape
    K = w_iok.shape[2]
    x_up = jnp.zeros((c_in, (L - 1) * stride + 1), x.dtype).at[:, ::stride].set(x)
    x_p = jnp.pad(x_up, ((0, 0), (K - 1 - padding, K - 1 - padding + out_pad)))
    w_flip = jnp.transpose(jnp.flip(w_iok, axis=2), (1, 0, 2))  # (C_out, C_in, K)
    y = jax.lax.conv_general_dilated(
        x_p.astype(jnp.bfloat16)[None], w_flip.astype(jnp.bfloat16),
        window_strides=(1,), padding="VALID",
        dimension_numbers=("NCH", "OIH", "NCH"),
        preferred_element_type=jnp.float32)[0]
    return y + b.reshape(-1, 1)


def ref_forward(params, mel):
    x = mel.astype(jnp.float32) / LN10
    for p in params:
        if p["kind"] == "conv":
            x = _ref_conv(x, p["w"], p["b"], reflect_pad=p["pad"],
                          pre_leaky=p["pre_leaky"], post_tanh=p["post_tanh"])
        elif p["kind"] == "convT":
            x = _ref_convT(x, p["w"], p["b"], stride=p["stride"],
                           padding=p["padding"], out_pad=p["out_pad"])
        else:
            d = p["dil"]
            h = _ref_conv(x, p["w1"], p["b1"], dilation=d, reflect_pad=d,
                          pre_leaky=True)
            h = _ref_conv(h, p["w2"], p["b2"], pre_leaky=True)
            s = _ref_conv(x, p["ws"], p["bs"])
            x = s + h
    return x[0]


# ---- hoisted weight relayout + deterministic synthetic parameters -------------
def _prep_conv(w_oik, b):
    """(C_out, C_in, K) torch Conv1d weight -> (C_out, K*C_in) bf16, bias (C_out,1)."""
    c_out, c_in, k = w_oik.shape
    w2d = np.transpose(w_oik, (0, 2, 1)).reshape(c_out, k * c_in)
    return jnp.asarray(w2d, jnp.bfloat16), jnp.asarray(b.reshape(c_out, 1),
                                                       jnp.float32)


def _prep_convT(w_iok, b, stride, padding, out_pad):
    """(C_in, C_out, K) torch ConvTranspose1d weight -> polyphase 3-tap conv
    weights (stride*C_out, 3*C_in) bf16 and bias (stride*C_out, 1)."""
    c_in, c_out, k = w_iok.shape
    assert k + out_pad == stride + 2 * padding  # guarantees L_out == stride * L
    w_flip = w_iok[:, :, ::-1]
    pad_l = k - 1 - padding
    wp3 = np.zeros((3, stride * c_out, c_in), np.float32)
    for kk in range(k):
        r = (pad_l - kk) % stride               # output phase this tap feeds
        m = 1 + (r + kk - pad_l) // stride      # tap offset in {-1,0,1} -> {0,1,2}
        assert 0 <= m <= 2
        wp3[m, r * c_out:(r + 1) * c_out, :] += w_flip[:, :, kk].T
    w2d = np.transpose(wp3, (1, 0, 2)).reshape(stride * c_out, 3 * c_in)
    bz = np.tile(b, stride).reshape(stride * c_out, 1)
    return jnp.asarray(w2d, jnp.bfloat16), jnp.asarray(bz, jnp.float32)


def make_params(key):
    keys = iter(jax.random.split(key, 256))

    def w_init(shape, fan):
        return np.asarray(jax.random.normal(next(keys), shape, jnp.float32)
                          ) / np.sqrt(float(fan))

    def b_init(n):
        return 0.01 * np.asarray(jax.random.normal(next(keys), (n,), jnp.float32))

    params = []
    mult = 2 ** len(RATIOS)
    c_out = mult * NGF

    w, b = w_init((c_out, N_MEL, 7), N_MEL * 7), b_init(c_out)
    pw, pb = _prep_conv(w, b)
    params.append(dict(kind="conv", K=7, pad=3, pre_leaky=False, post_tanh=False,
                       w=jnp.asarray(w), b=jnp.asarray(b), pw=pw, pb=pb))

    c_in = c_out
    for r in RATIOS:
        c_out = c_in // 2
        padding, out_pad = r // 2 + r % 2, r % 2
        w, b = w_init((c_in, c_out, 2 * r), c_in * 2 * r), b_init(c_out)
        pw, pb = _prep_convT(w, b, r, padding, out_pad)
        params.append(dict(kind="convT", stride=r, padding=padding,
                           out_pad=out_pad, w=jnp.asarray(w), b=jnp.asarray(b),
                           pw=pw, pb=pb))
        for j in range(N_RES):
            d = 3 ** j
            w1, b1 = w_init((c_out, c_out, 3), c_out * 3), b_init(c_out)
            w2, b2 = w_init((c_out, c_out, 1), c_out), b_init(c_out)
            ws, bs = w_init((c_out, c_out, 1), c_out), b_init(c_out)
            pw1, pb1 = _prep_conv(w1, b1)
            pw2, pb2 = _prep_conv(w2, b2)
            pws, pbs = _prep_conv(ws, bs)
            params.append(dict(kind="resblock", dil=d,
                               w1=jnp.asarray(w1), b1=jnp.asarray(b1),
                               w2=jnp.asarray(w2), b2=jnp.asarray(b2),
                               ws=jnp.asarray(ws), bs=jnp.asarray(bs),
                               pw1=pw1, pb1=pb1, pw2=pw2, pb2=pb2,
                               pws=pws, pbs=pbs))
        c_in = c_out

    w, b = w_init((1, c_in, 7), c_in * 7), b_init(1)
    pw, pb = _prep_conv(w, b)
    params.append(dict(kind="conv", K=7, pad=3, pre_leaky=True, post_tanh=True,
                       w=jnp.asarray(w), b=jnp.asarray(b), pw=pw, pb=pb))
    return params


def build_plan(params):
    """Split params into a static layer plan and the flat kernel-operand list."""
    plan, flat = [], []
    for p in params:
        if p["kind"] == "conv":
            plan.append(dict(kind="conv", K=p["K"], pad=p["pad"],
                             pre_leaky=p["pre_leaky"], post_tanh=p["post_tanh"]))
            flat += [p["pw"], p["pb"]]
        elif p["kind"] == "convT":
            plan.append(dict(kind="convT", stride=p["stride"]))
            flat += [p["pw"], p["pb"]]
        else:
            plan.append(dict(kind="resblock", dil=p["dil"]))
            flat += [p["pw1"], p["pb1"], p["pw2"], p["pb2"], p["pws"], p["pbs"]]
    return plan, tuple(flat)


if __name__ == "__main__":
    key = jax.random.PRNGKey(0)
    kp, kx = jax.random.split(key)
    params = make_params(kp)
    plan, flat_ws = build_plan(params)
    mel = jax.random.normal(kx, (N_MEL, T_MEL), jnp.float32)  # log-mel-like input

    fwd = jax.jit(functools.partial(pallas_forward, plan, flat_ws))
    wav = jax.block_until_ready(fwd(mel))
    assert wav.shape == (T_MEL * HOP,) and wav.dtype == jnp.float32

    ref_fwd = jax.jit(functools.partial(ref_forward, params))
    ref = jax.block_until_ready(ref_fwd(mel))
    # bf16 MXU operands at identical rounding points in both paths; residual
    # diff is f32 accumulation order only.
    np.testing.assert_allclose(np.asarray(wav), np.asarray(ref),
                               rtol=2e-3, atol=2e-3)
    print("KERNEL_OK")
</pallas_src>

<mosaic_0001>
module attributes {stable_mosaic.version = 11 : i64} {
  func.func @kernel(%arg0: memref<16x8xf32, #tpu.memory_space<vmem>>, %arg1: memref<32x112xbf16, #tpu.memory_space<vmem>>, %arg2: memref<32x1xf32, #tpu.memory_space<vmem>>, %arg3: memref<128x96xbf16, #tpu.memory_space<vmem>>, %arg4: memref<128x1xf32, #tpu.memory_space<vmem>>, %arg5: memref<16x48xbf16, #tpu.memory_space<vmem>>, %arg6: memref<16x1xf32, #tpu.memory_space<vmem>>, %arg7: memref<16x16xbf16, #tpu.memory_space<vmem>>, %arg8: memref<16x1xf32, #tpu.memory_space<vmem>>, %arg9: memref<16x16xbf16, #tpu.memory_space<vmem>>, %arg10: memref<16x1xf32, #tpu.memory_space<vmem>>, %arg11: memref<16x48xbf16, #tpu.memory_space<vmem>>, %arg12: memref<16x1xf32, #tpu.memory_space<vmem>>, %arg13: memref<16x16xbf16, #tpu.memory_space<vmem>>, %arg14: memref<16x1xf32, #tpu.memory_space<vmem>>, %arg15: memref<16x16xbf16, #tpu.memory_space<vmem>>, %arg16: memref<16x1xf32, #tpu.memory_space<vmem>>, %arg17: memref<16x48xbf16, #tpu.memory_space<vmem>>, %arg18: memref<16x1xf32, #tpu.memory_space<vmem>>, %arg19: memref<8x24xbf16, #tpu.memory_space<vmem>>, %arg20: memref<8x1xf32, #tpu.memory_space<vmem>>, %arg21: memref<8x8xbf16, #tpu.memory_space<vmem>>, %arg22: memref<8x1xf32, #tpu.memory_space<vmem>>, %arg23: memref<8x8xbf16, #tpu.memory_space<vmem>>, %arg24: memref<8x1xf32, #tpu.memory_space<vmem>>, %arg25: memref<8x24xbf16, #tpu.memory_space<vmem>>, %arg26: memref<8x1xf32, #tpu.memory_space<vmem>>, %arg27: memref<8x8xbf16, #tpu.memory_space<vmem>>, %arg28: memref<8x1xf32, #tpu.memory_space<vmem>>, %arg29: memref<8x8xbf16, #tpu.memory_space<vmem>>, %arg30: memref<8x1xf32, #tpu.memory_space<vmem>>, %arg31: memref<1x56xbf16, #tpu.memory_space<vmem>>, %arg32: memref<1x1xf32, #tpu.memory_space<vmem>>, %arg33: memref<1x128xf32, #tpu.memory_space<vmem>>) attributes {dimension_semantics = [], scalar_prefetch = 0 : i64, scratch_operands = 0 : i64, tpu.core_type = #tpu.core_type<tc>} {
    %c0 = arith.constant 0 : index
    %c0_0 = arith.constant 0 : index
    %0 = vector.load %arg0[%c0, %c0_0] : memref<16x8xf32, #tpu.memory_space<vmem>>, vector<16x8xf32>
    %cst = arith.constant 0.434294492 : f32
    %1 = vector.broadcast %cst : f32 to vector<16x8xf32>
    %2 = arith.mulf %0, %1 : vector<16x8xf32>
    %c0_1 = arith.constant 0 : index
    %c0_2 = arith.constant 0 : index
    %3 = vector.load %arg1[%c0_1, %c0_2] : memref<32x112xbf16, #tpu.memory_space<vmem>>, vector<32x112xbf16>
    %c0_3 = arith.constant 0 : index
    %c0_4 = arith.constant 0 : index
    %4 = vector.load %arg2[%c0_3, %c0_4] : memref<32x1xf32, #tpu.memory_space<vmem>>, vector<32x1xf32>
    %5 = vector.extract_strided_slice %2 {offsets = [0, 3], sizes = [16, 1], strides = [1, 1]} : vector<16x8xf32> to vector<16x1xf32>
    %6 = vector.extract_strided_slice %2 {offsets = [0, 2], sizes = [16, 1], strides = [1, 1]} : vector<16x8xf32> to vector<16x1xf32>
    %7 = vector.extract_strided_slice %2 {offsets = [0, 1], sizes = [16, 1], strides = [1, 1]} : vector<16x8xf32> to vector<16x1xf32>
    %8 = vector.extract_strided_slice %2 {offsets = [0, 6], sizes = [16, 1], strides = [1, 1]} : vector<16x8xf32> to vector<16x1xf32>
    %9 = vector.extract_strided_slice %2 {offsets = [0, 5], sizes = [16, 1], strides = [1, 1]} : vector<16x8xf32> to vector<16x1xf32>
    %10 = vector.extract_strided_slice %2 {offsets = [0, 4], sizes = [16, 1], strides = [1, 1]} : vector<16x8xf32> to vector<16x1xf32>
    %11 = tpu.concatenate %5, %6, %7, %2, %8, %9, %10 in 1 : vector<16x1xf32>, vector<16x1xf32>, vector<16x1xf32>, vector<16x8xf32>, vector<16x1xf32>, vector<16x1xf32>, vector<16x1xf32> -> vector<16x14xf32>
    %12 = vector.extract_strided_slice %11 {offsets = [0, 0], sizes = [16, 8], strides = [1, 1]} : vector<16x14xf32> to vector<16x8xf32>
    %13 = vector.extract_strided_slice %11 {offsets = [0, 1], sizes = [16, 8], strides = [1, 1]} : vector<16x14xf32> to vector<16x8xf32>
    %14 = vector.extract_strided_slice %11 {offsets = [0, 2], sizes = [16, 8], strides = [1, 1]} : vector<16x14xf32> to vector<16x8xf32>
    %15 = vector.extract_strided_slice %11 {offsets = [0, 3], sizes = [16, 8], strides = [1, 1]} : vector<16x14xf32> to vector<16x8xf32>
    %16 = vector.extract_strided_slice %11 {offsets = [0, 4], sizes = [16, 8], strides = [1, 1]} : vector<16x14xf32> to vector<16x8xf32>
    %17 = vector.extract_strided_slice %11 {offsets = [0, 5], sizes = [16, 8], strides = [1, 1]} : vector<16x14xf32> to vector<16x8xf32>
    %18 = vector.extract_strided_slice %11 {offsets = [0, 6], sizes = [16, 8], strides = [1, 1]} : vector<16x14xf32> to vector<16x8xf32>
    %19 = tpu.concatenate %12, %13, %14, %15, %16, %17, %18 in 0 : vector<16x8xf32>, vector<16x8xf32>, vector<16x8xf32>, vector<16x8xf32>, vector<16x8xf32>, vector<16x8xf32>, vector<16x8xf32> -> vector<112x8xf32>
    %20 = arith.truncf %19 : vector<112x8xf32> to vector<112x8xbf16>
    %cst_5 = arith.constant dense<0.000000e+00> : vector<32x8xf32>
    %21 = tpu.matmul %3, %20, %cst_5 {dimension_numbers = #tpu.dot_dimension_numbers<[1], [0], [0], [1], [0, 0, 1, 1], [], []>} : vector<32x112xbf16>, vector<112x8xbf16>, vector<32x8xf32> -> vector<32x8xf32>
    %22 = vector.broadcast %4 : vector<32x1xf32> to vector<32x8xf32>
    %23 = arith.addf %21, %22 : vector<32x8xf32>
    %c0_6 = arith.constant 0 : index
    %c0_7 = arith.constant 0 : index
    %24 = vector.load %arg3[%c0_6, %c0_7] : memref<128x96xbf16, #tpu.memory_space<vmem>>, vector<128x96xbf16>
    %c0_8 = arith.constant 0 : index
    %c0_9 = arith.constant 0 : index
    %25 = vector.load %arg4[%c0_8, %c0_9] : memref<128x1xf32, #tpu.memory_space<vmem>>, vector<128x1xf32>
    %cst_10 = arith.constant 0.000000e+00 : f32
    %26 = vector.broadcast %cst_10 : f32 to vector<32x8xf32>
    %27 = arith.cmpf oge, %23, %26 : vector<32x8xf32>
    %cst_11 = arith.constant 2.000000e-01 : f32
    %28 = vector.broadcast %cst_11 : f32 to vector<32x8xf32>
    %29 = arith.mulf %28, %23 : vector<32x8xf32>
    %30 = arith.select %27, %23, %29 : vector<32x8xi1>, vector<32x8xf32>
    %cst_12 = arith.constant 0.000000e+00 : f32
    %31 = vector.broadcast %cst_12 : f32 to vector<32x1xf32>
    %32 = tpu.concatenate %31, %30, %31 in 1 : vector<32x1xf32>, vector<32x8xf32>, vector<32x1xf32> -> vector<32x10xf32>
    %33 = vector.extract_strided_slice %32 {offsets = [0, 0], sizes = [32, 8], strides = [1, 1]} : vector<32x10xf32> to vector<32x8xf32>
    %34 = vector.extract_strided_slice %32 {offsets = [0, 1], sizes = [32, 8], strides = [1, 1]} : vector<32x10xf32> to vector<32x8xf32>
    %35 = vector.extract_strided_slice %32 {offsets = [0, 2], sizes = [32, 8], strides = [1, 1]} : vector<32x10xf32> to vector<32x8xf32>
    %36 = tpu.concatenate %33, %34, %35 in 0 : vector<32x8xf32>, vector<32x8xf32>, vector<32x8xf32> -> vector<96x8xf32>
    %37 = arith.truncf %36 : vector<96x8xf32> to vector<96x8xbf16>
    %cst_13 = arith.constant dense<0.000000e+00> : vector<128x8xf32>
    %38 = tpu.matmul %24, %37, %cst_13 {dimension_numbers = #tpu.dot_dimension_numbers<[1], [0], [0], [1], [0, 0, 1, 1], [], []>} : vector<128x96xbf16>, vector<96x8xbf16>, vector<128x8xf32> -> vector<128x8xf32>
    %39 = vector.broadcast %25 : vector<128x1xf32> to vector<128x8xf32>
    %40 = arith.addf %38, %39 : vector<128x8xf32>
    %41 = vector.extract_strided_slice %40 {offsets = [0, 0], sizes = [16, 1], strides = [1, 1]} : vector<128x8xf32> to vector<16x1xf32>
    %42 = vector.extract_strided_slice %40 {offsets = [16, 0], sizes = [16, 1], strides = [1, 1]} : vector<128x8xf32> to vector<16x1xf32>
    %43 = vector.extract_strided_slice %40 {offsets = [32, 0], sizes = [16, 1], strides = [1, 1]} : vector<128x8xf32> to vector<16x1xf32>
    %44 = vector.extract_strided_slice %40 {offsets = [48, 0], sizes = [16, 1], strides = [1, 1]} : vector<128x8xf32> to vector<16x1xf32>
    %45 = vector.extract_strided_slice %40 {offsets = [64, 0], sizes = [16, 1], strides = [1, 1]} : vector<128x8xf32> to vector<16x1xf32>
    %46 = vector.extract_strided_slice %40 {offsets = [80, 0], sizes = [16, 1], strides = [1, 1]} : vector<128x8xf32> to vector<16x1xf32>
    %47 = vector.extract_strided_slice %40 {offsets = [96, 0], sizes = [16, 1], strides = [1, 1]} : vector<128x8xf32> to vector<16x1xf32>
    %48 = vector.extract_strided_slice %40 {offsets = [112, 0], sizes = [16, 1], strides = [1, 1]} : vector<128x8xf32> to vector<16x1xf32>
    %49 = vector.extract_strided_slice %40 {offsets = [0, 1], sizes = [16, 1], strides = [1, 1]} : vector<128x8xf32> to vector<16x1xf32>
    %50 = vector.extract_strided_slice %40 {offsets = [16, 1], sizes = [16, 1], strides = [1, 1]} : vector<128x8xf32> to vector<16x1xf32>
    %51 = vector.extract_strided_slice %40 {offsets = [32, 1], sizes = [16, 1], strides = [1, 1]} : vector<128x8xf32> to vector<16x1xf32>
    %52 = vector.extract_strided_slice %40 {offsets = [48, 1], sizes = [16, 1], strides = [1, 1]} : vector<128x8xf32> to vector<16x1xf32>
    %53 = vector.extract_strided_slice %40 {offsets = [64, 1], sizes = [16, 1], strides = [1, 1]} : vector<128x8xf32> to vector<16x1xf32>
    %54 = vector.extract_strided_slice %40 {offsets = [80, 1], sizes = [16, 1], strides = [1, 1]} : vector<128x8xf32> to vector<16x1xf32>
    %55 = vector.extract_strided_slice %40 {offsets = [96, 1], sizes = [16, 1], strides = [1, 1]} : vector<128x8xf32> to vector<16x1xf32>
    %56 = vector.extract_strided_slice %40 {offsets = [112, 1], sizes = [16, 1], strides = [1, 1]} : vector<128x8xf32> to vector<16x1xf32>
    %57 = vector.extract_strided_slice %40 {offsets = [0, 2], sizes = [16, 1], strides = [1, 1]} : vector<128x8xf32> to vector<16x1xf32>
    %58 = vector.extract_strided_slice %40 {offsets = [16, 2], sizes = [16, 1], strides = [1, 1]} : vector<128x8xf32> to vector<16x1xf32>
    %59 = vector.extract_strided_slice %40 {offsets = [32, 2], sizes = [16, 1], strides = [1, 1]} : vector<128x8xf32> to vector<16x1xf32>
    %60 = vector.extract_strided_slice %40 {offsets = [48, 2], sizes = [16, 1], strides = [1, 1]} : vector<128x8xf32> to vector<16x1xf32>
    %61 = vector.extract_strided_slice %40 {offsets = [64, 2], sizes = [16, 1], strides = [1, 1]} : vector<128x8xf32> to vector<16x1xf32>
    %62 = vector.extract_strided_slice %40 {offsets = [80, 2], sizes = [16, 1], strides = [1, 1]} : vector<128x8xf32> to vector<16x1xf32>
    %63 = vector.extract_strided_slice %40 {offsets = [96, 2], sizes = [16, 1], strides = [1, 1]} : vector<128x8xf32> to vector<16x1xf32>
    %64 = vector.extract_strided_slice %40 {offsets = [112, 2], sizes = [16, 1], strides = [1, 1]} : vector<128x8xf32> to vector<16x1xf32>
    %65 = vector.extract_strided_slice %40 {offsets = [0, 3], sizes = [16, 1], strides = [1, 1]} : vector<128x8xf32> to vector<16x1xf32>
    %66 = vector.extract_strided_slice %40 {offsets = [16, 3], sizes = [16, 1], strides = [1, 1]} : vector<128x8xf32> to vector<16x1xf32>
    %67 = vector.extract_strided_slice %40 {offsets = [32, 3], sizes = [16, 1], strides = [1, 1]} : vector<128x8xf32> to vector<16x1xf32>
    %68 = vector.extract_strided_slice %40 {offsets = [48, 3], sizes = [16, 1], strides = [1, 1]} : vector<128x8xf32> to vector<16x1xf32>
    %69 = vector.extract_strided_slice %40 {offsets = [64, 3], sizes = [16, 1], strides = [1, 1]} : vector<128x8xf32> to vector<16x1xf32>
    %70 = vector.extract_strided_slice %40 {offsets = [80, 3], sizes = [16, 1], strides = [1, 1]} : vector<128x8xf32> to vector<16x1xf32>
    %71 = vector.extract_strided_slice %40 {offsets = [96, 3], sizes = [16, 1], strides = [1, 1]} : vector<128x8xf32> to vector<16x1xf32>
    %72 = vector.extract_strided_slice %40 {offsets = [112, 3], sizes = [16, 1], strides = [1, 1]} : vector<128x8xf32> to vector<16x1xf32>
    %73 = vector.extract_strided_slice %40 {offsets = [0, 4], sizes = [16, 1], strides = [1, 1]} : vector<128x8xf32> to vector<16x1xf32>
    %74 = vector.extract_strided_slice %40 {offsets = [16, 4], sizes = [16, 1], strides = [1, 1]} : vector<128x8xf32> to vector<16x1xf32>
    %75 = vector.extract_strided_slice %40 {offsets = [32, 4], sizes = [16, 1], strides = [1, 1]} : vector<128x8xf32> to vector<16x1xf32>
    %76 = vector.extract_strided_slice %40 {offsets = [48, 4], sizes = [16, 1], strides = [1, 1]} : vector<128x8xf32> to vector<16x1xf32>
    %77 = vector.extract_strided_slice %40 {offsets = [64, 4], sizes = [16, 1], strides = [1, 1]} : vector<128x8xf32> to vector<16x1xf32>
    %78 = vector.extract_strided_slice %40 {offsets = [80, 4], sizes = [16, 1], strides = [1, 1]} : vector<128x8xf32> to vector<16x1xf32>
    %79 = vector.extract_strided_slice %40 {offsets = [96, 4], sizes = [16, 1], strides = [1, 1]} : vector<128x8xf32> to vector<16x1xf32>
    %80 = vector.extract_strided_slice %40 {offsets = [112, 4], sizes = [16, 1], strides = [1, 1]} : vector<128x8xf32> to vector<16x1xf32>
    %81 = vector.extract_strided_slice %40 {offsets = [0, 5], sizes = [16, 1], strides = [1, 1]} : vector<128x8xf32> to vector<16x1xf32>
    %82 = vector.extract_strided_slice %40 {offsets = [16, 5], sizes = [16, 1], strides = [1, 1]} : vector<128x8xf32> to vector<16x1xf32>
    %83 = vector.extract_strided_slice %40 {offsets = [32, 5], sizes = [16, 1], strides = [1, 1]} : vector<128x8xf32> to vector<16x1xf32>
    %84 = vector.extract_strided_slice %40 {offsets = [48, 5], sizes = [16, 1], strides = [1, 1]} : vector<128x8xf32> to vector<16x1xf32>
    %85 = vector.extract_strided_slice %40 {offsets = [64, 5], sizes = [16, 1], strides = [1, 1]} : vector<128x8xf32> to vector<16x1xf32>
    %86 = vector.extract_strided_slice %40 {offsets = [80, 5], sizes = [16, 1], strides = [1, 1]} : vector<128x8xf32> to vector<16x1xf32>
    %87 = vector.extract_strided_slice %40 {offsets = [96, 5], sizes = [16, 1], strides = [1, 1]} : vector<128x8xf32> to vector<16x1xf32>
    %88 = vector.extract_strided_slice %40 {offsets = [112, 5], sizes = [16, 1], strides = [1, 1]} : vector<128x8xf32> to vector<16x1xf32>
    %89 = vector.extract_strided_slice %40 {offsets = [0, 6], sizes = [16, 1], strides = [1, 1]} : vector<128x8xf32> to vector<16x1xf32>
    %90 = vector.extract_strided_slice %40 {offsets = [16, 6], sizes = [16, 1], strides = [1, 1]} : vector<128x8xf32> to vector<16x1xf32>
    %91 = vector.extract_strided_slice %40 {offsets = [32, 6], sizes = [16, 1], strides = [1, 1]} : vector<128x8xf32> to vector<16x1xf32>
    %92 = vector.extract_strided_slice %40 {offsets = [48, 6], sizes = [16, 1], strides = [1, 1]} : vector<128x8xf32> to vector<16x1xf32>
    %93 = vector.extract_strided_slice %40 {offsets = [64, 6], sizes = [16, 1], strides = [1, 1]} : vector<128x8xf32> to vector<16x1xf32>
    %94 = vector.extract_strided_slice %40 {offsets = [80, 6], sizes = [16, 1], strides = [1, 1]} : vector<128x8xf32> to vector<16x1xf32>
    %95 = vector.extract_strided_slice %40 {offsets = [96, 6], sizes = [16, 1], strides = [1, 1]} : vector<128x8xf32> to vector<16x1xf32>
    %96 = vector.extract_strided_slice %40 {offsets = [112, 6], sizes = [16, 1], strides = [1, 1]} : vector<128x8xf32> to vector<16x1xf32>
    %97 = vector.extract_strided_slice %40 {offsets = [0, 7], sizes = [16, 1], strides = [1, 1]} : vector<128x8xf32> to vector<16x1xf32>
    %98 = vector.extract_strided_slice %40 {offsets = [16, 7], sizes = [16, 1], strides = [1, 1]} : vector<128x8xf32> to vector<16x1xf32>
    %99 = vector.extract_strided_slice %40 {offsets = [32, 7], sizes = [16, 1], strides = [1, 1]} : vector<128x8xf32> to vector<16x1xf32>
    %100 = vector.extract_strided_slice %40 {offsets = [48, 7], sizes = [16, 1], strides = [1, 1]} : vector<128x8xf32> to vector<16x1xf32>
    %101 = vector.extract_strided_slice %40 {offsets = [64, 7], sizes = [16, 1], strides = [1, 1]} : vector<128x8xf32> to vector<16x1xf32>
    %102 = vector.extract_strided_slice %40 {offsets = [80, 7], sizes = [16, 1], strides = [1, 1]} : vector<128x8xf32> to vector<16x1xf32>
    %103 = vector.extract_strided_slice %40 {offsets = [96, 7], sizes = [16, 1], strides = [1, 1]} : vector<128x8xf32> to vector<16x1xf32>
    %104 = vector.extract_strided_slice %40 {offsets = [112, 7], sizes = [16, 1], strides = [1, 1]} : vector<128x8xf32> to vector<16x1xf32>
    %105 = tpu.concatenate %41, %42, %43, %44, %45, %46, %47, %48 in 1 : vector<16x1xf32>, vector<16x1xf32>, vector<16x1xf32>, vector<16x1xf32>, vector<16x1xf32>, vector<16x1xf32>, vector<16x1xf32>, vector<16x1xf32> -> vector<16x8xf32>
    %106 = tpu.concatenate %49, %50, %51, %52, %53, %54, %55, %56 in 1 : vector<16x1xf32>, vector<16x1xf32>, vector<16x1xf32>, vector<16x1xf32>, vector<16x1xf32>, vector<16x1xf32>, vector<16x1xf32>, vector<16x1xf32> -> vector<16x8xf32>
    %107 = tpu.concatenate %57, %58, %59, %60, %61, %62, %63, %64 in 1 : vector<16x1xf32>, vector<16x1xf32>, vector<16x1xf32>, vector<16x1xf32>, vector<16x1xf32>, vector<16x1xf32>, vector<16x1xf32>, vector<16x1xf32> -> vector<16x8xf32>
    %108 = tpu.concatenate %65, %66, %67, %68, %69, %70, %71, %72 in 1 : vector<16x1xf32>, vector<16x1xf32>, vector<16x1xf32>, vector<16x1xf32>, vector<16x1xf32>, vector<16x1xf32>, vector<16x1xf32>, vector<16x1xf32> -> vector<16x8xf32>
    %109 = tpu.concatenate %73, %74, %75, %76, %77, %78, %79, %80 in 1 : vector<16x1xf32>, vector<16x1xf32>, vector<16x1xf32>, vector<16x1xf32>, vector<16x1xf32>, vector<16x1xf32>, vector<16x1xf32>, vector<16x1xf32> -> vector<16x8xf32>
    %110 = tpu.concatenate %81, %82, %83, %84, %85, %86, %87, %88 in 1 : vector<16x1xf32>, vector<16x1xf32>, vector<16x1xf32>, vector<16x1xf32>, vector<16x1xf32>, vector<16x1xf32>, vector<16x1xf32>, vector<16x1xf32> -> vector<16x8xf32>
    %111 = tpu.concatenate %89, %90, %91, %92, %93, %94, %95, %96 in 1 : vector<16x1xf32>, vector<16x1xf32>, vector<16x1xf32>, vector<16x1xf32>, vector<16x1xf32>, vector<16x1xf32>, vector<16x1xf32>, vector<16x1xf32> -> vector<16x8xf32>
    %112 = tpu.concatenate %97, %98, %99, %100, %101, %102, %103, %104 in 1 : vector<16x1xf32>, vector<16x1xf32>, vector<16x1xf32>, vector<16x1xf32>, vector<16x1xf32>, vector<16x1xf32>, vector<16x1xf32>, vector<16x1xf32> -> vector<16x8xf32>
    %113 = tpu.concatenate %105, %106, %107, %108, %109, %110, %111, %112 in 1 : vector<16x8xf32>, vector<16x8xf32>, vector<16x8xf32>, vector<16x8xf32>, vector<16x8xf32>, vector<16x8xf32>, vector<16x8xf32>, vector<16x8xf32> -> vector<16x64xf32>
    %c0_14 = arith.constant 0 : index
    %c0_15 = arith.constant 0 : index
    %114 = vector.load %arg5[%c0_14, %c0_15] : memref<16x48xbf16, #tpu.memory_space<vmem>>, vector<16x48xbf16>
    %c0_16 = arith.constant 0 : index
    %c0_17 = arith.constant 0 : index
    %115 = vector.load %arg6[%c0_16, %c0_17] : memref<16x1xf32, #tpu.memory_space<vmem>>, vector<16x1xf32>
    %c0_18 = arith.constant 0 : index
    %c0_19 = arith.constant 0 : index
    %116 = vector.load %arg7[%c0_18, %c0_19] : memref<16x16xbf16, #tpu.memory_space<vmem>>, vector<16x16xbf16>
    %c0_20 = arith.constant 0 : index
    %c0_21 = arith.constant 0 : index
    %117 = vector.load %arg8[%c0_20, %c0_21] : memref<16x1xf32, #tpu.memory_space<vmem>>, vector<16x1xf32>
    %c0_22 = arith.constant 0 : index
    %c0_23 = arith.constant 0 : index
    %118 = vector.load %arg9[%c0_22, %c0_23] : memref<16x16xbf16, #tpu.memory_space<vmem>>, vector<16x16xbf16>
    %c0_24 = arith.constant 0 : index
    %c0_25 = arith.constant 0 : index
    %119 = vector.load %arg10[%c0_24, %c0_25] : memref<16x1xf32, #tpu.memory_space<vmem>>, vector<16x1xf32>
    %cst_26 = arith.constant 0.000000e+00 : f32
    %120 = vector.broadcast %cst_26 : f32 to vector<16x64xf32>
    %121 = arith.cmpf oge, %113, %120 : vector<16x64xf32>
    %cst_27 = arith.constant 2.000000e-01 : f32
    %122 = vector.broadcast %cst_27 : f32 to vector<16x64xf32>
    %123 = arith.mulf %122, %113 : vector<16x64xf32>
    %124 = arith.select %121, %113, %123 : vector<16x64xi1>, vector<16x64xf32>
    %125 = vector.extract_strided_slice %124 {offsets = [0, 1], sizes = [16, 1], strides = [1, 1]} : vector<16x64xf32> to vector<16x1xf32>
    %126 = vector.extract_strided_slice %124 {offsets = [0, 62], sizes = [16, 1], strides = [1, 1]} : vector<16x64xf32> to vector<16x1xf32>
    %127 = tpu.concatenate %125, %124, %126 in 1 : vector<16x1xf32>, vector<16x64xf32>, vector<16x1xf32> -> vector<16x66xf32>
    %128 = vector.extract_strided_slice %127 {offsets = [0, 0], sizes = [16, 64], strides = [1, 1]} : vector<16x66xf32> to vector<16x64xf32>
    %129 = vector.extract_strided_slice %127 {offsets = [0, 1], sizes = [16, 64], strides = [1, 1]} : vector<16x66xf32> to vector<16x64xf32>
    %130 = vector.extract_strided_slice %127 {offsets = [0, 2], sizes = [16, 64], strides = [1, 1]} : vector<16x66xf32> to vector<16x64xf32>
    %131 = tpu.concatenate %128, %129, %130 in 0 : vector<16x64xf32>, vector<16x64xf32>, vector<16x64xf32> -> vector<48x64xf32>
    %132 = arith.truncf %131 : vector<48x64xf32> to vector<48x64xbf16>
    %cst_28 = arith.constant dense<0.000000e+00> : vector<16x64xf32>
    %133 = tpu.matmul %114, %132, %cst_28 {dimension_numbers = #tpu.dot_dimension_numbers<[1], [0], [0], [1], [0, 0, 1, 1], [], []>} : vector<16x48xbf16>, vector<48x64xbf16>, vector<16x64xf32> -> vector<16x64xf32>
    %134 = vector.broadcast %115 : vector<16x1xf32> to vector<16x64xf32>
    %135 = arith.addf %133, %134 : vector<16x64xf32>
    %cst_29 = arith.constant 0.000000e+00 : f32
    %136 = vector.broadcast %cst_29 : f32 to vector<16x64xf32>
    %137 = arith.cmpf oge, %135, %136 : vector<16x64xf32>
    %cst_30 = arith.constant 2.000000e-01 : f32
    %138 = vector.broadcast %cst_30 : f32 to vector<16x64xf32>
    %139 = arith.mulf %138, %135 : vector<16x64xf32>
    %140 = arith.select %137, %135, %139 : vector<16x64xi1>, vector<16x64xf32>
    %141 = arith.truncf %140 : vector<16x64xf32> to vector<16x64xbf16>
    %cst_31 = arith.constant dense<0.000000e+00> : vector<16x64xf32>
    %142 = tpu.matmul %116, %141, %cst_31 {dimension_numbers = #tpu.dot_dimension_numbers<[1], [0], [0], [1], [0, 0, 1, 1], [], []>} : vector<16x16xbf16>, vector<16x64xbf16>, vector<16x64xf32> -> vector<16x64xf32>
    %143 = vector.broadcast %117 : vector<16x1xf32> to vector<16x64xf32>
    %144 = arith.addf %142, %143 : vector<16x64xf32>
    %145 = arith.truncf %113 : vector<16x64xf32> to vector<16x64xbf16>
    %cst_32 = arith.constant dense<0.000000e+00> : vector<16x64xf32>
    %146 = tpu.matmul %118, %145, %cst_32 {dimension_numbers = #tpu.dot_dimension_numbers<[1], [0], [0], [1], [0, 0, 1, 1], [], []>} : vector<16x16xbf16>, vector<16x64xbf16>, vector<16x64xf32> -> vector<16x64xf32>
    %147 = vector.broadcast %119 : vector<16x1xf32> to vector<16x64xf32>
    %148 = arith.addf %146, %147 : vector<16x64xf32>
    %149 = arith.addf %148, %144 : vector<16x64xf32>
    %c0_33 = arith.constant 0 : index
    %c0_34 = arith.constant 0 : index
    %150 = vector.load %arg11[%c0_33, %c0_34] : memref<16x48xbf16, #tpu.memory_space<vmem>>, vector<16x48xbf16>
    %c0_35 = arith.constant 0 : index
    %c0_36 = arith.constant 0 : index
    %151 = vector.load %arg12[%c0_35, %c0_36] : memref<16x1xf32, #tpu.memory_space<vmem>>, vector<16x1xf32>
    %c0_37 = arith.constant 0 : index
    %c0_38 = arith.constant 0 : index
    %152 = vector.load %arg13[%c0_37, %c0_38] : memref<16x16xbf16, #tpu.memory_space<vmem>>, vector<16x16xbf16>
    %c0_39 = arith.constant 0 : index
    %c0_40 = arith.constant 0 : index
    %153 = vector.load %arg14[%c0_39, %c0_40] : memref<16x1xf32, #tpu.memory_space<vmem>>, vector<16x1xf32>
    %c0_41 = arith.constant 0 : index
    %c0_42 = arith.constant 0 : index
    %154 = vector.load %arg15[%c0_41, %c0_42] : memref<16x16xbf16, #tpu.memory_space<vmem>>, vector<16x16xbf16>
    %c0_43 = arith.constant 0 : index
    %c0_44 = arith.constant 0 : index
    %155 = vector.load %arg16[%c0_43, %c0_44] : memref<16x1xf32, #tpu.memory_space<vmem>>, vector<16x1xf32>
    %cst_45 = arith.constant 0.000000e+00 : f32
    %156 = vector.broadcast %cst_45 : f32 to vector<16x64xf32>
    %157 = arith.cmpf oge, %149, %156 : vector<16x64xf32>
    %cst_46 = arith.constant 2.000000e-01 : f32
    %158 = vector.broadcast %cst_46 : f32 to vector<16x64xf32>
    %159 = arith.mulf %158, %149 : vector<16x64xf32>
    %160 = arith.select %157, %149, %159 : vector<16x64xi1>, vector<16x64xf32>
    %161 = vector.extract_strided_slice %160 {offsets = [0, 3], sizes = [16, 1], strides = [1, 1]} : vector<16x64xf32> to vector<16x1xf32>
    %162 = vector.extract_strided_slice %160 {offsets = [0, 2], sizes = [16, 1], strides = [1, 1]} : vector<16x64xf32> to vector<16x1xf32>
    %163 = vector.extract_strided_slice %160 {offsets = [0, 1], sizes = [16, 1], strides = [1, 1]} : vector<16x64xf32> to vector<16x1xf32>
    %164 = vector.extract_strided_slice %160 {offsets = [0, 62], sizes = [16, 1], strides = [1, 1]} : vector<16x64xf32> to vector<16x1xf32>
    %165 = vector.extract_strided_slice %160 {offsets = [0, 61], sizes = [16, 1], strides = [1, 1]} : vector<16x64xf32> to vector<16x1xf32>
    %166 = vector.extract_strided_slice %160 {offsets = [0, 60], sizes = [16, 1], strides = [1, 1]} : vector<16x64xf32> to vector<16x1xf32>
    %167 = tpu.concatenate %161, %162, %163, %160, %164, %165, %166 in 1 : vector<16x1xf32>, vector<16x1xf32>, vector<16x1xf32>, vector<16x64xf32>, vector<16x1xf32>, vector<16x1xf32>, vector<16x1xf32> -> vector<16x70xf32>
    %168 = vector.extract_strided_slice %167 {offsets = [0, 0], sizes = [16, 64], strides = [1, 1]} : vector<16x70xf32> to vector<16x64xf32>
    %169 = vector.extract_strided_slice %167 {offsets = [0, 3], sizes = [16, 64], strides = [1, 1]} : vector<16x70xf32> to vector<16x64xf32>
    %170 = vector.extract_strided_slice %167 {offsets = [0, 6], sizes = [16, 64], strides = [1, 1]} : vector<16x70xf32> to vector<16x64xf32>
    %171 = tpu.concatenate %168, %169, %170 in 0 : vector<16x64xf32>, vector<16x64xf32>, vector<16x64xf32> -> vector<48x64xf32>
    %172 = arith.truncf %171 : vector<48x64xf32> to vector<48x64xbf16>
    %cst_47 = arith.constant dense<0.000000e+00> : vector<16x64xf32>
    %173 = tpu.matmul %150, %172, %cst_47 {dimension_numbers = #tpu.dot_dimension_numbers<[1], [0], [0], [1], [0, 0, 1, 1], [], []>} : vector<16x48xbf16>, vector<48x64xbf16>, vector<16x64xf32> -> vector<16x64xf32>
    %174 = vector.broadcast %151 : vector<16x1xf32> to vector<16x64xf32>
    %175 = arith.addf %173, %174 : vector<16x64xf32>
    %cst_48 = arith.constant 0.000000e+00 : f32
    %176 = vector.broadcast %cst_48 : f32 to vector<16x64xf32>
    %177 = arith.cmpf oge, %175, %176 : vector<16x64xf32>
    %cst_49 = arith.constant 2.000000e-01 : f32
    %178 = vector.broadcast %cst_49 : f32 to vector<16x64xf32>
    %179 = arith.mulf %178, %175 : vector<16x64xf32>
    %180 = arith.select %177, %175, %179 : vector<16x64xi1>, vector<16x64xf32>
    %181 = arith.truncf %180 : vector<16x64xf32> to vector<16x64xbf16>
    %cst_50 = arith.constant dense<0.000000e+00> : vector<16x64xf32>
    %182 = tpu.matmul %152, %181, %cst_50 {dimension_numbers = #tpu.dot_dimension_numbers<[1], [0], [0], [1], [0, 0, 1, 1], [], []>} : vector<16x16xbf16>, vector<16x64xbf16>, vector<16x64xf32> -> vector<16x64xf32>
    %183 = vector.broadcast %153 : vector<16x1xf32> to vector<16x64xf32>
    %184 = arith.addf %182, %183 : vector<16x64xf32>
    %185 = arith.truncf %149 : vector<16x64xf32> to vector<16x64xbf16>
    %cst_51 = arith.constant dense<0.000000e+00> : vector<16x64xf32>
    %186 = tpu.matmul %154, %185, %cst_51 {dimension_numbers = #tpu.dot_dimension_numbers<[1], [0], [0], [1], [0, 0, 1, 1], [], []>} : vector<16x16xbf16>, vector<16x64xbf16>, vector<16x64xf32> -> vector<16x64xf32>
    %187 = vector.broadcast %155 : vector<16x1xf32> to vector<16x64xf32>
    %188 = arith.addf %186, %187 : vector<16x64xf32>
    %189 = arith.addf %188, %184 : vector<16x64xf32>
    %c0_52 = arith.constant 0 : index
    %c0_53 = arith.constant 0 : index
    %190 = vector.load %arg17[%c0_52, %c0_53] : memref<16x48xbf16, #tpu.memory_space<vmem>>, vector<16x48xbf16>
    %c0_54 = arith.constant 0 : index
    %c0_55 = arith.constant 0 : index
    %191 = vector.load %arg18[%c0_54, %c0_55] : memref<16x1xf32, #tpu.memory_space<vmem>>, vector<16x1xf32>
    %cst_56 = arith.constant 0.000000e+00 : f32
    %192 = vector.broadcast %cst_56 : f32 to vector<16x64xf32>
    %193 = arith.cmpf oge, %189, %192 : vector<16x64xf32>
    %cst_57 = arith.constant 2.000000e-01 : f32
    %194 = vector.broadcast %cst_57 : f32 to vector<16x64xf32>
    %195 = arith.mulf %194, %189 : vector<16x64xf32>
    %196 = arith.select %193, %189, %195 : vector<16x64xi1>, vector<16x64xf32>
    %cst_58 = arith.constant 0.000000e+00 : f32
    %197 = vector.broadcast %cst_58 : f32 to vector<16x1xf32>
    %198 = tpu.concatenate %197, %196, %197 in 1 : vector<16x1xf32>, vector<16x64xf32>, vector<16x1xf32> -> vector<16x66xf32>
    %199 = vector.extract_strided_slice %198 {offsets = [0, 0], sizes = [16, 64], strides = [1, 1]} : vector<16x66xf32> to vector<16x64xf32>
    %200 = vector.extract_strided_slice %198 {offsets = [0, 1], sizes = [16, 64], strides = [1, 1]} : vector<16x66xf32> to vector<16x64xf32>
    %201 = vector.extract_strided_slice %198 {offsets = [0, 2], sizes = [16, 64], strides = [1, 1]} : vector<16x66xf32> to vector<16x64xf32>
    %202 = tpu.concatenate %199, %200, %201 in 0 : vector<16x64xf32>, vector<16x64xf32>, vector<16x64xf32> -> vector<48x64xf32>
    %203 = arith.truncf %202 : vector<48x64xf32> to vector<48x64xbf16>
    %cst_59 = arith.constant dense<0.000000e+00> : vector<16x64xf32>
    %204 = tpu.matmul %190, %203, %cst_59 {dimension_numbers = #tpu.dot_dimension_numbers<[1], [0], [0], [1], [0, 0, 1, 1], [], []>} : vector<16x48xbf16>, vector<48x64xbf16>, vector<16x64xf32> -> vector<16x64xf32>
    %205 = vector.broadcast %191 : vector<16x1xf32> to vector<16x64xf32>
    %206 = arith.addf %204, %205 : vector<16x64xf32>
    %207 = vector.extract_strided_slice %206 {offsets = [0, 0], sizes = [8, 1], strides = [1, 1]} : vector<16x64xf32> to vector<8x1xf32>
    %208 = vector.extract_strided_slice %206 {offsets = [8, 0], sizes = [8, 1], strides = [1, 1]} : vector<16x64xf32> to vector<8x1xf32>
    %209 = vector.extract_strided_slice %206 {offsets = [0, 1], sizes = [8, 1], strides = [1, 1]} : vector<16x64xf32> to vector<8x1xf32>
    %210 = vector.extract_strided_slice %206 {offsets = [8, 1], sizes = [8, 1], strides = [1, 1]} : vector<16x64xf32> to vector<8x1xf32>
    %211 = vector.extract_strided_slice %206 {offsets = [0, 2], sizes = [8, 1], strides = [1, 1]} : vector<16x64xf32> to vector<8x1xf32>
    %212 = vector.extract_strided_slice %206 {offsets = [8, 2], sizes = [8, 1], strides = [1, 1]} : vector<16x64xf32> to vector<8x1xf32>
    %213 = vector.extract_strided_slice %206 {offsets = [0, 3], sizes = [8, 1], strides = [1, 1]} : vector<16x64xf32> to vector<8x1xf32>
    %214 = vector.extract_strided_slice %206 {offsets = [8, 3], sizes = [8, 1], strides = [1, 1]} : vector<16x64xf32> to vector<8x1xf32>
    %215 = vector.extract_strided_slice %206 {offsets = [0, 4], sizes = [8, 1], strides = [1, 1]} : vector<16x64xf32> to vector<8x1xf32>
    %216 = vector.extract_strided_slice %206 {offsets = [8, 4], sizes = [8, 1], strides = [1, 1]} : vector<16x64xf32> to vector<8x1xf32>
    %217 = vector.extract_strided_slice %206 {offsets = [0, 5], sizes = [8, 1], strides = [1, 1]} : vector<16x64xf32> to vector<8x1xf32>
    %218 = vector.extract_strided_slice %206 {offsets = [8, 5], sizes = [8, 1], strides = [1, 1]} : vector<16x64xf32> to vector<8x1xf32>
    %219 = vector.extract_strided_slice %206 {offsets = [0, 6], sizes = [8, 1], strides = [1, 1]} : vector<16x64xf32> to vector<8x1xf32>
    %220 = vector.extract_strided_slice %206 {offsets = [8, 6], sizes = [8, 1], strides = [1, 1]} : vector<16x64xf32> to vector<8x1xf32>
    %221 = vector.extract_strided_slice %206 {offsets = [0, 7], sizes = [8, 1], strides = [1, 1]} : vector<16x64xf32> to vector<8x1xf32>
    %222 = vector.extract_strided_slice %206 {offsets = [8, 7], sizes = [8, 1], strides = [1, 1]} : vector<16x64xf32> to vector<8x1xf32>
    %223 = vector.extract_strided_slice %206 {offsets = [0, 8], sizes = [8, 1], strides = [1, 1]} : vector<16x64xf32> to vector<8x1xf32>
    %224 = vector.extract_strided_slice %206 {offsets = [8, 8], sizes = [8, 1], strides = [1, 1]} : vector<16x64xf32> to vector<8x1xf32>
    %225 = vector.extract_strided_slice %206 {offsets = [0, 9], sizes = [8, 1], strides = [1, 1]} : vector<16x64xf32> to vector<8x1xf32>
    %226 = vector.extract_strided_slice %206 {offsets = [8, 9], sizes = [8, 1], strides = [1, 1]} : vector<16x64xf32> to vector<8x1xf32>
    %227 = vector.extract_strided_slice %206 {offsets = [0, 10], sizes = [8, 1], strides = [1, 1]} : vector<16x64xf32> to vector<8x1xf32>
    %228 = vector.extract_strided_slice %206 {offsets = [8, 10], sizes = [8, 1], strides = [1, 1]} : vector<16x64xf32> to vector<8x1xf32>
    %229 = vector.extract_strided_slice %206 {offsets = [0, 11], sizes = [8, 1], strides = [1, 1]} : vector<16x64xf32> to vector<8x1xf32>
    %230 = vector.extract_strided_slice %206 {offsets = [8, 11], sizes = [8, 1], strides = [1, 1]} : vector<16x64xf32> to vector<8x1xf32>
    %231 = vector.extract_strided_slice %206 {offsets = [0, 12], sizes = [8, 1], strides = [1, 1]} : vector<16x64xf32> to vector<8x1xf32>
    %232 = vector.extract_strided_slice %206 {offsets = [8, 12], sizes = [8, 1], strides = [1, 1]} : vector<16x64xf32> to vector<8x1xf32>
    %233 = vector.extract_strided_slice %206 {offsets = [0, 13], sizes = [8, 1], strides = [1, 1]} : vector<16x64xf32> to vector<8x1xf32>
    %234 = vector.extract_strided_slice %206 {offsets = [8, 13], sizes = [8, 1], strides = [1, 1]} : vector<16x64xf32> to vector<8x1xf32>
    %235 = vector.extract_strided_slice %206 {offsets = [0, 14], sizes = [8, 1], strides = [1, 1]} : vector<16x64xf32> to vector<8x1xf32>
    %236 = vector.extract_strided_slice %206 {offsets = [8, 14], sizes = [8, 1], strides = [1, 1]} : vector<16x64xf32> to vector<8x1xf32>
    %237 = vector.extract_strided_slice %206 {offsets = [0, 15], sizes = [8, 1], strides = [1, 1]} : vector<16x64xf32> to vector<8x1xf32>
    %238 = vector.extract_strided_slice %206 {offsets = [8, 15], sizes = [8, 1], strides = [1, 1]} : vector<16x64xf32> to vector<8x1xf32>
    %239 = vector.extract_strided_slice %206 {offsets = [0, 16], sizes = [8, 1], strides = [1, 1]} : vector<16x64xf32> to vector<8x1xf32>
    %240 = vector.extract_strided_slice %206 {offsets = [8, 16], sizes = [8, 1], strides = [1, 1]} : vector<16x64xf32> to vector<8x1xf32>
    %241 = vector.extract_strided_slice %206 {offsets = [0, 17], sizes = [8, 1], strides = [1, 1]} : vector<16x64xf32> to vector<8x1xf32>
    %242 = vector.extract_strided_slice %206 {offsets = [8, 17], sizes = [8, 1], strides = [1, 1]} : vector<16x64xf32> to vector<8x1xf32>
    %243 = vector.extract_strided_slice %206 {offsets = [0, 18], sizes = [8, 1], strides = [1, 1]} : vector<16x64xf32> to vector<8x1xf32>
    %244 = vector.extract_strided_slice %206 {offsets = [8, 18], sizes = [8, 1], strides = [1, 1]} : vector<16x64xf32> to vector<8x1xf32>
    %245 = vector.extract_strided_slice %206 {offsets = [0, 19], sizes = [8, 1], strides = [1, 1]} : vector<16x64xf32> to vector<8x1xf32>
    %246 = vector.extract_strided_slice %206 {offsets = [8, 19], sizes = [8, 1], strides = [1, 1]} : vector<16x64xf32> to vector<8x1xf32>
    %247 = vector.extract_strided_slice %206 {offsets = [0, 20], sizes = [8, 1], strides = [1, 1]} : vector<16x64xf32> to vector<8x1xf32>
    %248 = vector.extract_strided_slice %206 {offsets = [8, 20], sizes = [8, 1], strides = [1, 1]} : vector<16x64xf32> to vector<8x1xf32>
    %249 = vector.extract_strided_slice %206 {offsets = [0, 21], sizes = [8, 1], strides = [1, 1]} : vector<16x64xf32> to vector<8x1xf32>
    %250 = vector.extract_strided_slice %206 {offsets = [8, 21], sizes = [8, 1], strides = [1, 1]} : vector<16x64xf32> to vector<8x1xf32>
    %251 = vector.extract_strided_slice %206 {offsets = [0, 22], sizes = [8, 1], strides = [1, 1]} : vector<16x64xf32> to vector<8x1xf32>
    %252 = vector.extract_strided_slice %206 {offsets = [8, 22], sizes = [8, 1], strides = [1, 1]} : vector<16x64xf32> to vector<8x1xf32>
    %253 = vector.extract_strided_slice %206 {offsets = [0, 23], sizes = [8, 1], strides = [1, 1]} : vector<16x64xf32> to vector<8x1xf32>
    %254 = vector.extract_strided_slice %206 {offsets = [8, 23], sizes = [8, 1], strides = [1, 1]} : vector<16x64xf32> to vector<8x1xf32>
    %255 = vector.extract_strided_slice %206 {offsets = [0, 24], sizes = [8, 1], strides = [1, 1]} : vector<16x64xf32> to vector<8x1xf32>
    %256 = vector.extract_strided_slice %206 {offsets = [8, 24], sizes = [8, 1], strides = [1, 1]} : vector<16x64xf32> to vector<8x1xf32>
    %257 = vector.extract_strided_slice %206 {offsets = [0, 25], sizes = [8, 1], strides = [1, 1]} : vector<16x64xf32> to vector<8x1xf32>
    %258 = vector.extract_strided_slice %206 {offsets = [8, 25], sizes = [8, 1], strides = [1, 1]} : vector<16x64xf32> to vector<8x1xf32>
    %259 = vector.extract_strided_slice %206 {offsets = [0, 26], sizes = [8, 1], strides = [1, 1]} : vector<16x64xf32> to vector<8x1xf32>
    %260 = vector.extract_strided_slice %206 {offsets = [8, 26], sizes = [8, 1], strides = [1, 1]} : vector<16x64xf32> to vector<8x1xf32>
    %261 = vector.extract_strided_slice %206 {offsets = [0, 27], sizes = [8, 1], strides = [1, 1]} : vector<16x64xf32> to vector<8x1xf32>
    %262 = vector.extract_strided_slice %206 {offsets = [8, 27], sizes = [8, 1], strides = [1, 1]} : vector<16x64xf32> to vector<8x1xf32>
    %263 = vector.extract_strided_slice %206 {offsets = [0, 28], sizes = [8, 1], strides = [1, 1]} : vector<16x64xf32> to vector<8x1xf32>
    %264 = vector.extract_strided_slice %206 {offsets = [8, 28], sizes = [8, 1], strides = [1, 1]} : vector<16x64xf32> to vector<8x1xf32>
    %265 = vector.extract_strided_slice %206 {offsets = [0, 29], sizes = [8, 1], strides = [1, 1]} : vector<16x64xf32> to vector<8x1xf32>
    %266 = vector.extract_strided_slice %206 {offsets = [8, 29], sizes = [8, 1], strides = [1, 1]} : vector<16x64xf32> to vector<8x1xf32>
    %267 = vector.extract_strided_slice %206 {offsets = [0, 30], sizes = [8, 1], strides = [1, 1]} : vector<16x64xf32> to vector<8x1xf32>
    %268 = vector.extract_strided_slice %206 {offsets = [8, 30], sizes = [8, 1], strides = [1, 1]} : vector<16x64xf32> to vector<8x1xf32>
    %269 = vector.extract_strided_slice %206 {offsets = [0, 31], sizes = [8, 1], strides = [1, 1]} : vector<16x64xf32> to vector<8x1xf32>
    %270 = vector.extract_strided_slice %206 {offsets = [8, 31], sizes = [8, 1], strides = [1, 1]} : vector<16x64xf32> to vector<8x1xf32>
    %271 = vector.extract_strided_slice %206 {offsets = [0, 32], sizes = [8, 1], strides = [1, 1]} : vector<16x64xf32> to vector<8x1xf32>
    %272 = vector.extract_strided_slice %206 {offsets = [8, 32], sizes = [8, 1], strides = [1, 1]} : vector<16x64xf32> to vector<8x1xf32>
    %273 = vector.extract_strided_slice %206 {offsets = [0, 33], sizes = [8, 1], strides = [1, 1]} : vector<16x64xf32> to vector<8x1xf32>
    %274 = vector.extract_strided_slice %206 {offsets = [8, 33], sizes = [8, 1], strides = [1, 1]} : vector<16x64xf32> to vector<8x1xf32>
    %275 = vector.extract_strided_slice %206 {offsets = [0, 34], sizes = [8, 1], strides = [1, 1]} : vector<16x64xf32> to vector<8x1xf32>
    %276 = vector.extract_strided_slice %206 {offsets = [8, 34], sizes = [8, 1], strides = [1, 1]} : vector<16x64xf32> to vector<8x1xf32>
    %277 = vector.extract_strided_slice %206 {offsets = [0, 35], sizes = [8, 1], strides = [1, 1]} : vector<16x64xf32> to vector<8x1xf32>
    %278 = vector.extract_strided_slice %206 {offsets = [8, 35], sizes = [8, 1], strides = [1, 1]} : vector<16x64xf32> to vector<8x1xf32>
    %279 = vector.extract_strided_slice %206 {offsets = [0, 36], sizes = [8, 1], strides = [1, 1]} : vector<16x64xf32> to vector<8x1xf32>
    %280 = vector.extract_strided_slice %206 {offsets = [8, 36], sizes = [8, 1], strides = [1, 1]} : vector<16x64xf32> to vector<8x1xf32>
    %281 = vector.extract_strided_slice %206 {offsets = [0, 37], sizes = [8, 1], strides = [1, 1]} : vector<16x64xf32> to vector<8x1xf32>
    %282 = vector.extract_strided_slice %206 {offsets = [8, 37], sizes = [8, 1], strides = [1, 1]} : vector<16x64xf32> to vector<8x1xf32>
    %283 = vector.extract_strided_slice %206 {offsets = [0, 38], sizes = [8, 1], strides = [1, 1]} : vector<16x64xf32> to vector<8x1xf32>
    %284 = vector.extract_strided_slice %206 {offsets = [8, 38], sizes = [8, 1], strides = [1, 1]} : vector<16x64xf32> to vector<8x1xf32>
    %285 = vector.extract_strided_slice %206 {offsets = [0, 39], sizes = [8, 1], strides = [1, 1]} : vector<16x64xf32> to vector<8x1xf32>
    %286 = vector.extract_strided_slice %206 {offsets = [8, 39], sizes = [8, 1], strides = [1, 1]} : vector<16x64xf32> to vector<8x1xf32>
    %287 = vector.extract_strided_slice %206 {offsets = [0, 40], sizes = [8, 1], strides = [1, 1]} : vector<16x64xf32> to vector<8x1xf32>
    %288 = vector.extract_strided_slice %206 {offsets = [8, 40], sizes = [8, 1], strides = [1, 1]} : vector<16x64xf32> to vector<8x1xf32>
    %289 = vector.extract_strided_slice %206 {offsets = [0, 41], sizes = [8, 1], strides = [1, 1]} : vector<16x64xf32> to vector<8x1xf32>
    %290 = vector.extract_strided_slice %206 {offsets = [8, 41], sizes = [8, 1], strides = [1, 1]} : vector<16x64xf32> to vector<8x1xf32>
    %291 = vector.extract_strided_slice %206 {offsets = [0, 42], sizes = [8, 1], strides = [1, 1]} : vector<16x64xf32> to vector<8x1xf32>
    %292 = vector.extract_strided_slice %206 {offsets = [8, 42], sizes = [8, 1], strides = [1, 1]} : vector<16x64xf32> to vector<8x1xf32>
    %293 = vector.extract_strided_slice %206 {offsets = [0, 43], sizes = [8, 1], strides = [1, 1]} : vector<16x64xf32> to vector<8x1xf32>
    %294 = vector.extract_strided_slice %206 {offsets = [8, 43], sizes = [8, 1], strides = [1, 1]} : vector<16x64xf32> to vector<8x1xf32>
    %295 = vector.extract_strided_slice %206 {offsets = [0, 44], sizes = [8, 1], strides = [1, 1]} : vector<16x64xf32> to vector<8x1xf32>
    %296 = vector.extract_strided_slice %206 {offsets = [8, 44], sizes = [8, 1], strides = [1, 1]} : vector<16x64xf32> to vector<8x1xf32>
    %297 = vector.extract_strided_slice %206 {offsets = [0, 45], sizes = [8, 1], strides = [1, 1]} : vector<16x64xf32> to vector<8x1xf32>
    %298 = vector.extract_strided_slice %206 {offsets = [8, 45], sizes = [8, 1], strides = [1, 1]} : vector<16x64xf32> to vector<8x1xf32>
    %299 = vector.extract_strided_slice %206 {offsets = [0, 46], sizes = [8, 1], strides = [1, 1]} : vector<16x64xf32> to vector<8x1xf32>
    %300 = vector.extract_strided_slice %206 {offsets = [8, 46], sizes = [8, 1], strides = [1, 1]} : vector<16x64xf32> to vector<8x1xf32>
    %301 = vector.extract_strided_slice %206 {offsets = [0, 47], sizes = [8, 1], strides = [1, 1]} : vector<16x64xf32> to vector<8x1xf32>
    %302 = vector.extract_strided_slice %206 {offsets = [8, 47], sizes = [8, 1], strides = [1, 1]} : vector<16x64xf32> to vector<8x1xf32>
    %303 = vector.extract_strided_slice %206 {offsets = [0, 48], sizes = [8, 1], strides = [1, 1]} : vector<16x64xf32> to vector<8x1xf32>
    %304 = vector.extract_strided_slice %206 {offsets = [8, 48], sizes = [8, 1], strides = [1, 1]} : vector<16x64xf32> to vector<8x1xf32>
    %305 = vector.extract_strided_slice %206 {offsets = [0, 49], sizes = [8, 1], strides = [1, 1]} : vector<16x64xf32> to vector<8x1xf32>
    %306 = vector.extract_strided_slice %206 {offsets = [8, 49], sizes = [8, 1], strides = [1, 1]} : vector<16x64xf32> to vector<8x1xf32>
    %307 = vector.extract_strided_slice %206 {offsets = [0, 50], sizes = [8, 1], strides = [1, 1]} : vector<16x64xf32> to vector<8x1xf32>
    %308 = vector.extract_strided_slice %206 {offsets = [8, 50], sizes = [8, 1], strides = [1, 1]} : vector<16x64xf32> to vector<8x1xf32>
    %309 = vector.extract_strided_slice %206 {offsets = [0, 51], sizes = [8, 1], strides = [1, 1]} : vector<16x64xf32> to vector<8x1xf32>
    %310 = vector.extract_strided_slice %206 {offsets = [8, 51], sizes = [8, 1], strides = [1, 1]} : vector<16x64xf32> to vector<8x1xf32>
    %311 = vector.extract_strided_slice %206 {offsets = [0, 52], sizes = [8, 1], strides = [1, 1]} : vector<16x64xf32> to vector<8x1xf32>
    %312 = vector.extract_strided_slice %206 {offsets = [8, 52], sizes = [8, 1], strides = [1, 1]} : vector<16x64xf32> to vector<8x1xf32>
    %313 = vector.extract_strided_slice %206 {offsets = [0, 53], sizes = [8, 1], strides = [1, 1]} : vector<16x64xf32> to vector<8x1xf32>
    %314 = vector.extract_strided_slice %206 {offsets = [8, 53], sizes = [8, 1], strides = [1, 1]} : vector<16x64xf32> to vector<8x1xf32>
    %315 = vector.extract_strided_slice %206 {offsets = [0, 54], sizes = [8, 1], strides = [1, 1]} : vector<16x64xf32> to vector<8x1xf32>
    %316 = vector.extract_strided_slice %206 {offsets = [8, 54], sizes = [8, 1], strides = [1, 1]} : vector<16x64xf32> to vector<8x1xf32>
    %317 = vector.extract_strided_slice %206 {offsets = [0, 55], sizes = [8, 1], strides = [1, 1]} : vector<16x64xf32> to vector<8x1xf32>
    %318 = vector.extract_strided_slice %206 {offsets = [8, 55], sizes = [8, 1], strides = [1, 1]} : vector<16x64xf32> to vector<8x1xf32>
    %319 = vector.extract_strided_slice %206 {offsets = [0, 56], sizes = [8, 1], strides = [1, 1]} : vector<16x64xf32> to vector<8x1xf32>
    %320 = vector.extract_strided_slice %206 {offsets = [8, 56], sizes = [8, 1], strides = [1, 1]} : vector<16x64xf32> to vector<8x1xf32>
    %321 = vector.extract_strided_slice %206 {offsets = [0, 57], sizes = [8, 1], strides = [1, 1]} : vector<16x64xf32> to vector<8x1xf32>
    %322 = vector.extract_strided_slice %206 {offsets = [8, 57], sizes = [8, 1], strides = [1, 1]} : vector<16x64xf32> to vector<8x1xf32>
    %323 = vector.extract_strided_slice %206 {offsets = [0, 58], sizes = [8, 1], strides = [1, 1]} : vector<16x64xf32> to vector<8x1xf32>
    %324 = vector.extract_strided_slice %206 {offsets = [8, 58], sizes = [8, 1], strides = [1, 1]} : vector<16x64xf32> to vector<8x1xf32>
    %325 = vector.extract_strided_slice %206 {offsets = [0, 59], sizes = [8, 1], strides = [1, 1]} : vector<16x64xf32> to vector<8x1xf32>
    %326 = vector.extract_strided_slice %206 {offsets = [8, 59], sizes = [8, 1], strides = [1, 1]} : vector<16x64xf32> to vector<8x1xf32>
    %327 = vector.extract_strided_slice %206 {offsets = [0, 60], sizes = [8, 1], strides = [1, 1]} : vector<16x64xf32> to vector<8x1xf32>
    %328 = vector.extract_strided_slice %206 {offsets = [8, 60], sizes = [8, 1], strides = [1, 1]} : vector<16x64xf32> to vector<8x1xf32>
    %329 = vector.extract_strided_slice %206 {offsets = [0, 61], sizes = [8, 1], strides = [1, 1]} : vector<16x64xf32> to vector<8x1xf32>
    %330 = vector.extract_strided_slice %206 {offsets = [8, 61], sizes = [8, 1], strides = [1, 1]} : vector<16x64xf32> to vector<8x1xf32>
    %331 = vector.extract_strided_slice %206 {offsets = [0, 62], sizes = [8, 1], strides = [1, 1]} : vector<16x64xf32> to vector<8x1xf32>
    %332 = vector.extract_strided_slice %206 {offsets = [8, 62], sizes = [8, 1], strides = [1, 1]} : vector<16x64xf32> to vector<8x1xf32>
    %333 = vector.extract_strided_slice %206 {offsets = [0, 63], sizes = [8, 1], strides = [1, 1]} : vector<16x64xf32> to vector<8x1xf32>
    %334 = vector.extract_strided_slice %206 {offsets = [8, 63], sizes = [8, 1], strides = [1, 1]} : vector<16x64xf32> to vector<8x1xf32>
    %335 = tpu.concatenate %207, %208, %209, %210, %211, %212, %213, %214 in 1 : vector<8x1xf32>, vector<8x1xf32>, vector<8x1xf32>, vector<8x1xf32>, vector<8x1xf32>, vector<8x1xf32>, vector<8x1xf32>, vector<8x1xf32> -> vector<8x8xf32>
    %336 = tpu.concatenate %215, %216, %217, %218, %219, %220, %221, %222 in 1 : vector<8x1xf32>, vector<8x1xf32>, vector<8x1xf32>, vector<8x1xf32>, vector<8x1xf32>, vector<8x1xf32>, vector<8x1xf32>, vector<8x1xf32> -> vector<8x8xf32>
    %337 = tpu.concatenate %223, %224, %225, %226, %227, %228, %229, %230 in 1 : vector<8x1xf32>, vector<8x1xf32>, vector<8x1xf32>, vector<8x1xf32>, vector<8x1xf32>, vector<8x1xf32>, vector<8x1xf32>, vector<8x1xf32> -> vector<8x8xf32>
    %338 = tpu.concatenate %231, %232, %233, %234, %235, %236, %237, %238 in 1 : vector<8x1xf32>, vector<8x1xf32>, vector<8x1xf32>, vector<8x1xf32>, vector<8x1xf32>, vector<8x1xf32>, vector<8x1xf32>, vector<8x1xf32> -> vector<8x8xf32>
    %339 = tpu.concatenate %239, %240, %241, %242, %243, %244, %245, %246 in 1 : vector<8x1xf32>, vector<8x1xf32>, vector<8x1xf32>, vector<8x1xf32>, vector<8x1xf32>, vector<8x1xf32>, vector<8x1xf32>, vector<8x1xf32> -> vector<8x8xf32>
    %340 = tpu.concatenate %247, %248, %249, %250, %251, %252, %253, %254 in 1 : vector<8x1xf32>, vector<8x1xf32>, vector<8x1xf32>, vector<8x1xf32>, vector<8x1xf32>, vector<8x1xf32>, vector<8x1xf32>, vector<8x1xf32> -> vector<8x8xf32>
    %341 = tpu.concatenate %255, %256, %257, %258, %259, %260, %261, %262 in 1 : vector<8x1xf32>, vector<8x1xf32>, vector<8x1xf32>, vector<8x1xf32>, vector<8x1xf32>, vector<8x1xf32>, vector<8x1xf32>, vector<8x1xf32> -> vector<8x8xf32>
    %342 = tpu.concatenate %263, %264, %265, %266, %267, %268, %269, %270 in 1 : vector<8x1xf32>, vector<8x1xf32>, vector<8x1xf32>, vector<8x1xf32>, vector<8x1xf32>, vector<8x1xf32>, vector<8x1xf32>, vector<8x1xf32> -> vector<8x8xf32>
    %343 = tpu.concatenate %271, %272, %273, %274, %275, %276, %277, %278 in 1 : vector<8x1xf32>, vector<8x1xf32>, vector<8x1xf32>, vector<8x1xf32>, vector<8x1xf32>, vector<8x1xf32>, vector<8x1xf32>, vector<8x1xf32> -> vector<8x8xf32>
    %344 = tpu.concatenate %279, %280, %281, %282, %283, %284, %285, %286 in 1 : vector<8x1xf32>, vector<8x1xf32>, vector<8x1xf32>, vector<8x1xf32>, vector<8x1xf32>, vector<8x1xf32>, vector<8x1xf32>, vector<8x1xf32> -> vector<8x8xf32>
    %345 = tpu.concatenate %287, %288, %289, %290, %291, %292, %293, %294 in 1 : vector<8x1xf32>, vector<8x1xf32>, vector<8x1xf32>, vector<8x1xf32>, vector<8x1xf32>, vector<8x1xf32>, vector<8x1xf32>, vector<8x1xf32> -> vector<8x8xf32>
    %346 = tpu.concatenate %295, %296, %297, %298, %299, %300, %301, %302 in 1 : vector<8x1xf32>, vector<8x1xf32>, vector<8x1xf32>, vector<8x1xf32>, vector<8x1xf32>, vector<8x1xf32>, vector<8x1xf32>, vector<8x1xf32> -> vector<8x8xf32>
    %347 = tpu.concatenate %303, %304, %305, %306, %307, %308, %309, %310 in 1 : vector<8x1xf32>, vector<8x1xf32>, vector<8x1xf32>, vector<8x1xf32>, vector<8x1xf32>, vector<8x1xf32>, vector<8x1xf32>, vector<8x1xf32> -> vector<8x8xf32>
    %348 = tpu.concatenate %311, %312, %313, %314, %315, %316, %317, %318 in 1 : vector<8x1xf32>, vector<8x1xf32>, vector<8x1xf32>, vector<8x1xf32>, vector<8x1xf32>, vector<8x1xf32>, vector<8x1xf32>, vector<8x1xf32> -> vector<8x8xf32>
    %349 = tpu.concatenate %319, %320, %321, %322, %323, %324, %325, %326 in 1 : vector<8x1xf32>, vector<8x1xf32>, vector<8x1xf32>, vector<8x1xf32>, vector<8x1xf32>, vector<8x1xf32>, vector<8x1xf32>, vector<8x1xf32> -> vector<8x8xf32>
    %350 = tpu.concatenate %327, %328, %329, %330, %331, %332, %333, %334 in 1 : vector<8x1xf32>, vector<8x1xf32>, vector<8x1xf32>, vector<8x1xf32>, vector<8x1xf32>, vector<8x1xf32>, vector<8x1xf32>, vector<8x1xf32> -> vector<8x8xf32>
    %351 = tpu.concatenate %335, %336, %337, %338, %339, %340, %341, %342 in 1 : vector<8x8xf32>, vector<8x8xf32>, vector<8x8xf32>, vector<8x8xf32>, vector<8x8xf32>, vector<8x8xf32>, vector<8x8xf32>, vector<8x8xf32> -> vector<8x64xf32>
    %352 = tpu.concatenate %343, %344, %345, %346, %347, %348, %349, %350 in 1 : vector<8x8xf32>, vector<8x8xf32>, vector<8x8xf32>, vector<8x8xf32>, vector<8x8xf32>, vector<8x8xf32>, vector<8x8xf32>, vector<8x8xf32> -> vector<8x64xf32>
    %353 = tpu.concatenate %351, %352 in 1 : vector<8x64xf32>, vector<8x64xf32> -> vector<8x128xf32>
    %c0_60 = arith.constant 0 : index
    %c0_61 = arith.constant 0 : index
    %354 = vector.load %arg19[%c0_60, %c0_61] : memref<8x24xbf16, #tpu.memory_space<vmem>>, vector<8x24xbf16>
    %c0_62 = arith.constant 0 : index
    %c0_63 = arith.constant 0 : index
    %355 = vector.load %arg20[%c0_62, %c0_63] : memref<8x1xf32, #tpu.memory_space<vmem>>, vector<8x1xf32>
    %c0_64 = arith.constant 0 : index
    %c0_65 = arith.constant 0 : index
    %356 = vector.load %arg21[%c0_64, %c0_65] : memref<8x8xbf16, #tpu.memory_space<vmem>>, vector<8x8xbf16>
    %c0_66 = arith.constant 0 : index
    %c0_67 = arith.constant 0 : index
    %357 = vector.load %arg22[%c0_66, %c0_67] : memref<8x1xf32, #tpu.memory_space<vmem>>, vector<8x1xf32>
    %c0_68 = arith.constant 0 : index
    %c0_69 = arith.constant 0 : index
    %358 = vector.load %arg23[%c0_68, %c0_69] : memref<8x8xbf16, #tpu.memory_space<vmem>>, vector<8x8xbf16>
    %c0_70 = arith.constant 0 : index
    %c0_71 = arith.constant 0 : index
    %359 = vector.load %arg24[%c0_70, %c0_71] : memref<8x1xf32, #tpu.memory_space<vmem>>, vector<8x1xf32>
    %cst_72 = arith.constant 0.000000e+00 : f32
    %360 = vector.broadcast %cst_72 : f32 to vector<8x128xf32>
    %361 = arith.cmpf oge, %353, %360 : vector<8x128xf32>
    %cst_73 = arith.constant 2.000000e-01 : f32
    %362 = vector.broadcast %cst_73 : f32 to vector<8x128xf32>
    %363 = arith.mulf %362, %353 : vector<8x128xf32>
    %364 = arith.select %361, %353, %363 : vector<8x128xi1>, vector<8x128xf32>
    %365 = vector.extract_strided_slice %364 {offsets = [0, 1], sizes = [8, 1], strides = [1, 1]} : vector<8x128xf32> to vector<8x1xf32>
    %366 = vector.extract_strided_slice %364 {offsets = [0, 126], sizes = [8, 1], strides = [1, 1]} : vector<8x128xf32> to vector<8x1xf32>
    %367 = tpu.concatenate %365, %364, %366 in 1 : vector<8x1xf32>, vector<8x128xf32>, vector<8x1xf32> -> vector<8x130xf32>
    %368 = vector.extract_strided_slice %367 {offsets = [0, 0], sizes = [8, 128], strides = [1, 1]} : vector<8x130xf32> to vector<8x128xf32>
    %369 = vector.extract_strided_slice %367 {offsets = [0, 1], sizes = [8, 128], strides = [1, 1]} : vector<8x130xf32> to vector<8x128xf32>
    %370 = vector.extract_strided_slice %367 {offsets = [0, 2], sizes = [8, 128], strides = [1, 1]} : vector<8x130xf32> to vector<8x128xf32>
    %371 = tpu.concatenate %368, %369, %370 in 0 : vector<8x128xf32>, vector<8x128xf32>, vector<8x128xf32> -> vector<24x128xf32>
    %372 = arith.truncf %371 : vector<24x128xf32> to vector<24x128xbf16>
    %cst_74 = arith.constant dense<0.000000e+00> : vector<8x128xf32>
    %373 = tpu.matmul %354, %372, %cst_74 {dimension_numbers = #tpu.dot_dimension_numbers<[1], [0], [0], [1], [0, 0, 1, 1], [], []>} : vector<8x24xbf16>, vector<24x128xbf16>, vector<8x128xf32> -> vector<8x128xf32>
    %374 = vector.broadcast %355 : vector<8x1xf32> to vector<8x128xf32>
    %375 = arith.addf %373, %374 : vector<8x128xf32>
    %cst_75 = arith.constant 0.000000e+00 : f32
    %376 = vector.broadcast %cst_75 : f32 to vector<8x128xf32>
    %377 = arith.cmpf oge, %375, %376 : vector<8x128xf32>
    %cst_76 = arith.constant 2.000000e-01 : f32
    %378 = vector.broadcast %cst_76 : f32 to vector<8x128xf32>
    %379 = arith.mulf %378, %375 : vector<8x128xf32>
    %380 = arith.select %377, %375, %379 : vector<8x128xi1>, vector<8x128xf32>
    %381 = arith.truncf %380 : vector<8x128xf32> to vector<8x128xbf16>
    %cst_77 = arith.constant dense<0.000000e+00> : vector<8x128xf32>
    %382 = tpu.matmul %356, %381, %cst_77 {dimension_numbers = #tpu.dot_dimension_numbers<[1], [0], [0], [1], [0, 0, 1, 1], [], []>} : vector<8x8xbf16>, vector<8x128xbf16>, vector<8x128xf32> -> vector<8x128xf32>
    %383 = vector.broadcast %357 : vector<8x1xf32> to vector<8x128xf32>
    %384 = arith.addf %382, %383 : vector<8x128xf32>
    %385 = arith.truncf %353 : vector<8x128xf32> to vector<8x128xbf16>
    %cst_78 = arith.constant dense<0.000000e+00> : vector<8x128xf32>
    %386 = tpu.matmul %358, %385, %cst_78 {dimension_numbers = #tpu.dot_dimension_numbers<[1], [0], [0], [1], [0, 0, 1, 1], [], []>} : vector<8x8xbf16>, vector<8x128xbf16>, vector<8x128xf32> -> vector<8x128xf32>
    %387 = vector.broadcast %359 : vector<8x1xf32> to vector<8x128xf32>
    %388 = arith.addf %386, %387 : vector<8x128xf32>
    %389 = arith.addf %388, %384 : vector<8x128xf32>
    %c0_79 = arith.constant 0 : index
    %c0_80 = arith.constant 0 : index
    %390 = vector.load %arg25[%c0_79, %c0_80] : memref<8x24xbf16, #tpu.memory_space<vmem>>, vector<8x24xbf16>
    %c0_81 = arith.constant 0 : index
    %c0_82 = arith.constant 0 : index
    %391 = vector.load %arg26[%c0_81, %c0_82] : memref<8x1xf32, #tpu.memory_space<vmem>>, vector<8x1xf32>
    %c0_83 = arith.constant 0 : index
    %c0_84 = arith.constant 0 : index
    %392 = vector.load %arg27[%c0_83, %c0_84] : memref<8x8xbf16, #tpu.memory_space<vmem>>, vector<8x8xbf16>
    %c0_85 = arith.constant 0 : index
    %c0_86 = arith.constant 0 : index
    %393 = vector.load %arg28[%c0_85, %c0_86] : memref<8x1xf32, #tpu.memory_space<vmem>>, vector<8x1xf32>
    %c0_87 = arith.constant 0 : index
    %c0_88 = arith.constant 0 : index
    %394 = vector.load %arg29[%c0_87, %c0_88] : memref<8x8xbf16, #tpu.memory_space<vmem>>, vector<8x8xbf16>
    %c0_89 = arith.constant 0 : index
    %c0_90 = arith.constant 0 : index
    %395 = vector.load %arg30[%c0_89, %c0_90] : memref<8x1xf32, #tpu.memory_space<vmem>>, vector<8x1xf32>
    %cst_91 = arith.constant 0.000000e+00 : f32
    %396 = vector.broadcast %cst_91 : f32 to vector<8x128xf32>
    %397 = arith.cmpf oge, %389, %396 : vector<8x128xf32>
    %cst_92 = arith.constant 2.000000e-01 : f32
    %398 = vector.broadcast %cst_92 : f32 to vector<8x128xf32>
    %399 = arith.mulf %398, %389 : vector<8x128xf32>
    %400 = arith.select %397, %389, %399 : vector<8x128xi1>, vector<8x128xf32>
    %401 = vector.extract_strided_slice %400 {offsets = [0, 3], sizes = [8, 1], strides = [1, 1]} : vector<8x128xf32> to vector<8x1xf32>
    %402 = vector.extract_strided_slice %400 {offsets = [0, 2], sizes = [8, 1], strides = [1, 1]} : vector<8x128xf32> to vector<8x1xf32>
    %403 = vector.extract_strided_slice %400 {offsets = [0, 1], sizes = [8, 1], strides = [1, 1]} : vector<8x128xf32> to vector<8x1xf32>
    %404 = vector.extract_strided_slice %400 {offsets = [0, 126], sizes = [8, 1], strides = [1, 1]} : vector<8x128xf32> to vector<8x1xf32>
    %405 = vector.extract_strided_slice %400 {offsets = [0, 125], sizes = [8, 1], strides = [1, 1]} : vector<8x128xf32> to vector<8x1xf32>
    %406 = vector.extract_strided_slice %400 {offsets = [0, 124], sizes = [8, 1], strides = [1, 1]} : vector<8x128xf32> to vector<8x1xf32>
    %407 = tpu.concatenate %401, %402, %403, %400, %404, %405, %406 in 1 : vector<8x1xf32>, vector<8x1xf32>, vector<8x1xf32>, vector<8x128xf32>, vector<8x1xf32>, vector<8x1xf32>, vector<8x1xf32> -> vector<8x134xf32>
    %408 = vector.extract_strided_slice %407 {offsets = [0, 0], sizes = [8, 128], strides = [1, 1]} : vector<8x134xf32> to vector<8x128xf32>
    %409 = vector.extract_strided_slice %407 {offsets = [0, 3], sizes = [8, 128], strides = [1, 1]} : vector<8x134xf32> to vector<8x128xf32>
    %410 = vector.extract_strided_slice %407 {offsets = [0, 6], sizes = [8, 128], strides = [1, 1]} : vector<8x134xf32> to vector<8x128xf32>
    %411 = tpu.concatenate %408, %409, %410 in 0 : vector<8x128xf32>, vector<8x128xf32>, vector<8x128xf32> -> vector<24x128xf32>
    %412 = arith.truncf %411 : vector<24x128xf32> to vector<24x128xbf16>
    %cst_93 = arith.constant dense<0.000000e+00> : vector<8x128xf32>
    %413 = tpu.matmul %390, %412, %cst_93 {dimension_numbers = #tpu.dot_dimension_numbers<[1], [0], [0], [1], [0, 0, 1, 1], [], []>} : vector<8x24xbf16>, vector<24x128xbf16>, vector<8x128xf32> -> vector<8x128xf32>
    %414 = vector.broadcast %391 : vector<8x1xf32> to vector<8x128xf32>
    %415 = arith.addf %413, %414 : vector<8x128xf32>
    %cst_94 = arith.constant 0.000000e+00 : f32
    %416 = vector.broadcast %cst_94 : f32 to vector<8x128xf32>
    %417 = arith.cmpf oge, %415, %416 : vector<8x128xf32>
    %cst_95 = arith.constant 2.000000e-01 : f32
    %418 = vector.broadcast %cst_95 : f32 to vector<8x128xf32>
    %419 = arith.mulf %418, %415 : vector<8x128xf32>
    %420 = arith.select %417, %415, %419 : vector<8x128xi1>, vector<8x128xf32>
    %421 = arith.truncf %420 : vector<8x128xf32> to vector<8x128xbf16>
    %cst_96 = arith.constant dense<0.000000e+00> : vector<8x128xf32>
    %422 = tpu.matmul %392, %421, %cst_96 {dimension_numbers = #tpu.dot_dimension_numbers<[1], [0], [0], [1], [0, 0, 1, 1], [], []>} : vector<8x8xbf16>, vector<8x128xbf16>, vector<8x128xf32> -> vector<8x128xf32>
    %423 = vector.broadcast %393 : vector<8x1xf32> to vector<8x128xf32>
    %424 = arith.addf %422, %423 : vector<8x128xf32>
    %425 = arith.truncf %389 : vector<8x128xf32> to vector<8x128xbf16>
    %cst_97 = arith.constant dense<0.000000e+00> : vector<8x128xf32>
    %426 = tpu.matmul %394, %425, %cst_97 {dimension_numbers = #tpu.dot_dimension_numbers<[1], [0], [0], [1], [0, 0, 1, 1], [], []>} : vector<8x8xbf16>, vector<8x128xbf16>, vector<8x128xf32> -> vector<8x128xf32>
    %427 = vector.broadcast %395 : vector<8x1xf32> to vector<8x128xf32>
    %428 = arith.addf %426, %427 : vector<8x128xf32>
    %429 = arith.addf %428, %424 : vector<8x128xf32>
    %c0_98 = arith.constant 0 : index
    %c0_99 = arith.constant 0 : index
    %430 = vector.load %arg31[%c0_98, %c0_99] : memref<1x56xbf16, #tpu.memory_space<vmem>>, vector<1x56xbf16>
    %c0_100 = arith.constant 0 : index
    %c0_101 = arith.constant 0 : index
    %431 = vector.load %arg32[%c0_100, %c0_101] : memref<1x1xf32, #tpu.memory_space<vmem>>, vector<1x1xf32>
    %cst_102 = arith.constant 0.000000e+00 : f32
    %432 = vector.broadcast %cst_102 : f32 to vector<8x128xf32>
    %433 = arith.cmpf oge, %429, %432 : vector<8x128xf32>
    %cst_103 = arith.constant 2.000000e-01 : f32
    %434 = vector.broadcast %cst_103 : f32 to vector<8x128xf32>
    %435 = arith.mulf %434, %429 : vector<8x128xf32>
    %436 = arith.select %433, %429, %435 : vector<8x128xi1>, vector<8x128xf32>
    %437 = vector.extract_strided_slice %436 {offsets = [0, 3], sizes = [8, 1], strides = [1, 1]} : vector<8x128xf32> to vector<8x1xf32>
    %438 = vector.extract_strided_slice %436 {offsets = [0, 2], sizes = [8, 1], strides = [1, 1]} : vector<8x128xf32> to vector<8x1xf32>
    %439 = vector.extract_strided_slice %436 {offsets = [0, 1], sizes = [8, 1], strides = [1, 1]} : vector<8x128xf32> to vector<8x1xf32>
    %440 = vector.extract_strided_slice %436 {offsets = [0, 126], sizes = [8, 1], strides = [1, 1]} : vector<8x128xf32> to vector<8x1xf32>
    %441 = vector.extract_strided_slice %436 {offsets = [0, 125], sizes = [8, 1], strides = [1, 1]} : vector<8x128xf32> to vector<8x1xf32>
    %442 = vector.extract_strided_slice %436 {offsets = [0, 124], sizes = [8, 1], strides = [1, 1]} : vector<8x128xf32> to vector<8x1xf32>
    %443 = tpu.concatenate %437, %438, %439, %436, %440, %441, %442 in 1 : vector<8x1xf32>, vector<8x1xf32>, vector<8x1xf32>, vector<8x128xf32>, vector<8x1xf32>, vector<8x1xf32>, vector<8x1xf32> -> vector<8x134xf32>
    %444 = vector.extract_strided_slice %443 {offsets = [0, 0], sizes = [8, 128], strides = [1, 1]} : vector<8x134xf32> to vector<8x128xf32>
    %445 = vector.extract_strided_slice %443 {offsets = [0, 1], sizes = [8, 128], strides = [1, 1]} : vector<8x134xf32> to vector<8x128xf32>
    %446 = vector.extract_strided_slice %443 {offsets = [0, 2], sizes = [8, 128], strides = [1, 1]} : vector<8x134xf32> to vector<8x128xf32>
    %447 = vector.extract_strided_slice %443 {offsets = [0, 3], sizes = [8, 128], strides = [1, 1]} : vector<8x134xf32> to vector<8x128xf32>
    %448 = vector.extract_strided_slice %443 {offsets = [0, 4], sizes = [8, 128], strides = [1, 1]} : vector<8x134xf32> to vector<8x128xf32>
    %449 = vector.extract_strided_slice %443 {offsets = [0, 5], sizes = [8, 128], strides = [1, 1]} : vector<8x134xf32> to vector<8x128xf32>
    %450 = vector.extract_strided_slice %443 {offsets = [0, 6], sizes = [8, 128], strides = [1, 1]} : vector<8x134xf32> to vector<8x128xf32>
    %451 = tpu.concatenate %444, %445, %446, %447, %448, %449, %450 in 0 : vector<8x128xf32>, vector<8x128xf32>, vector<8x128xf32>, vector<8x128xf32>, vector<8x128xf32>, vector<8x128xf32>, vector<8x128xf32> -> vector<56x128xf32>
    %452 = arith.truncf %451 : vector<56x128xf32> to vector<56x128xbf16>
    %cst_104 = arith.constant dense<0.000000e+00> : vector<1x128xf32>
    %453 = tpu.matmul %430, %452, %cst_104 {dimension_numbers = #tpu.dot_dimension_numbers<[1], [0], [0], [1], [0, 0, 1, 1], [], []>} : vector<1x56xbf16>, vector<56x128xbf16>, vector<1x128xf32> -> vector<1x128xf32>
    %454 = vector.broadcast %431 : vector<1x1xf32> to vector<1x128xf32>
    %455 = arith.addf %453, %454 : vector<1x128xf32>
    %456 = math.tanh %455 : vector<1x128xf32>
    %c0_105 = arith.constant 0 : index
    %c0_106 = arith.constant 0 : index
    %457 = vector.load %arg33[%c0_105, %c0_106] : memref<1x128xf32, #tpu.memory_space<vmem>>, vector<1x128xf32>
    tpu.vector_store %arg33[%c0_105, %c0_106], %456 {strides = array<i32>} : memref<1x128xf32, #tpu.memory_space<vmem>>, vector<1x128xf32>,
    return
  }
}

</mosaic_0001>

<bundles_post_ra>
// kernel: pallas_forward.1
= control target key start
LH: loop header
LB: loop body
LE: loop exit
PB: predicated region body
PF: predicated region fallthrough
CT: control target
= control target key end

     0   :  { %s4520_s6 = smov 1   ;;  %s4521_s10 = smov 2   ;;  %s6450_s0 = inlined_call_operand.smem [shape: u32[34], index: -1, kind: input, shape index: {}] }
   0x1   :  { %s4664_s5 = sld [smem:[%s6450_s0]]   ;;  %s4522_s14 = smov 3  }
   0x2   :  { %s4669_s9 = sld [smem:[%s6450_s0 + %s4520_s6]]   ;;  %s4523_s18 = smov 4  }
   0x3   :  { %s4674_s13 = sld [smem:[%s6450_s0 + %s4521_s10]]   ;;  %s4524_s22 = smov 5  }
   0x4   :  { %s4679_s17 = sld [smem:[%s6450_s0 + %s4522_s14]]   ;;  %s4525_s26 = smov 6  }
   0x5   :  { %s4684_s21 = sld [smem:[%s6450_s0 + %s4523_s18]]   ;;  %s4526_s30 = smov 7  }
   0x6   :  { %s4689_s25 = sld [smem:[%s6450_s0 + %s4524_s22]]   ;;  %s4527_s4 = smov 8  }
   0x7   :  { %6528 = sst [smem:[#allocation52_spill]] %s4664_s5  ;;  %s4528_s10 = smov 9  }
   0x8   :  { %6529 = sst [smem:[#allocation53_spill]] %s4669_s9  ;;  %s4529_s15 = smov 10  }
   0x9   :  { %6530 = sst [smem:[#allocation54_spill]] %s4674_s13  ;;  %s4530_s20 = smov 11  }
   0xa   :  { %6531 = sst [smem:[#allocation55_spill]] %s4679_s17  ;;  %s4532_s1 = smov 13  }
   0xb   :  { %s4694_s29 = sld [smem:[%s6450_s0 + %s4525_s26]]   ;;  %s4531_s26 = smov 12  }
   0xc   :  { %s4699_s3 = sld [smem:[%s6450_s0 + %s4526_s30]]   ;;  %s4533_s7 = smov 14  }
   0xd   :  { %s4704_s8 = sld [smem:[%s6450_s0 + %s4527_s4]]   ;;  %s4535_s22 = smov 16  }
   0xe   :  { %s4709_s14 = sld [smem:[%s6450_s0 + %s4528_s10]]   ;;  %s4536_s28 = smov 17  }
   0xf   :  { %s4714_s19 = sld [smem:[%s6450_s0 + %s4529_s15]]   ;;  %s4534_s15 = smov 15  }
  0x10   :  { %s4719_s24 = sld [smem:[%s6450_s0 + %s4530_s20]]  }
  0x11   :  { %s4724_s30 = sld [smem:[%s6450_s0 + %s4531_s26]]  }
  0x12   :  { %6532 = sst [smem:[#allocation56_spill]] %s4699_s3 }
  0x13   :  { %s4729_s6 = sld [smem:[%s6450_s0 + %s4532_s1]]   ;;  %s4552_s1 = smov 33  }
  0x14   :  { %6533 = sst [smem:[#allocation57_spill]] %s4709_s14 }
  0x15   :  { %s4734_s12 = sld [smem:[%s6450_s0 + %s4533_s7]]   ;;  %s4537_s7 = smov 18  }
  0x16   :  { %6534 = sst [smem:[#allocation58_spill]] %s4719_s24 }
  0x17   :  { %s4739_s20 = sld [smem:[%s6450_s0 + %s4534_s15]]   ;;  %s4538_s15 = smov 19  }
  0x18   :  { %s4744_s27 = sld [smem:[%s6450_s0 + %s4535_s22]]   ;;  %s4539_s22 = smov 20  }
  0x19   :  { %6535 = sst [smem:[#allocation59_spill]] %s4729_s6 }
  0x1a   :  { %s4749_s4 = sld [smem:[%s6450_s0 + %s4536_s28]]   ;;  %s4540_s28 = smov 21  }
  0x1b   :  { %s4754_s6 = sld [smem:[%s6450_s0 + %s4537_s7]]   ;;  %s4541_s7 = smov 22  }
  0x1c   :  { %s4764_s24 = sld [smem:[%s6450_s0 + %s4539_s22]]   ;;  %s4543_s22 = smov 24  }
  0x1d   :  { %6536 = sst [smem:[#allocation60_spill]] %s4739_s20 }
  0x1e   :  { %s4759_s20 = sld [smem:[%s6450_s0 + %s4538_s15]]   ;;  %s4542_s15 = smov 23  }
  0x1f   :  { %s4774_s14 = sld [smem:[%s6450_s0 + %s4541_s7]]   ;;  %s4545_s7 = smov 26  }
  0x20   :  { %6537 = sst [smem:[#allocation61_spill]] %s4749_s4 }
  0x21   :  { %6538 = sst [smem:[#allocation62_spill]] %s4754_s6 }
  0x22   :  { %6539 = sst [smem:[#allocation63_spill]] %s4764_s24 }
  0x23   :  { %s4769_s4 = sld [smem:[%s6450_s0 + %s4540_s28]]   ;;  %s4544_s28 = smov 25  }
  0x24   :  { %s4779_s3 = sld [smem:[%s6450_s0 + %s4542_s15]]   ;;  %s4546_s15 = smov 27  }
  0x25   :  { %6540 = sst [smem:[#allocation64_spill]] %s4774_s14 }
  0x26   :  { %s4784_s17 = sld [smem:[%s6450_s0 + %s4543_s22]]   ;;  %s4547_s22 = smov 28  }
  0x27   :  { %s4789_s13 = sld [smem:[%s6450_s0 + %s4544_s28]]   ;;  %s4548_s28 = smov 29  }
  0x28   :  { %s4794_s9 = sld [smem:[%s6450_s0 + %s4545_s7]]   ;;  %s4549_s7 = smov 30  }
  0x29   :  { %s4799_s5 = sld [smem:[%s6450_s0 + %s4546_s15]]   ;;  %s4550_s15 = smov 31  }
  0x2a   :  { %s4809_s14 = sld [smem:[%s6450_s0 + %s4548_s28]]  }
  0x2b   :  { %s4819_s24 = sld [smem:[%s6450_s0 + %s4550_s15]]  }
  0x2c   :  { %6541 = sst [smem:[#allocation65_spill]] %s4784_s17 }
  0x2d   :  { %s4804_s17 = sld [smem:[%s6450_s0 + %s4547_s22]]   ;;  %s4551_s22 = smov 32  }
  0x2e   :  { %6542 = sst [smem:[#allocation66_spill]] %s4794_s9 }
  0x2f   :  { %s4814_s9 = sld [smem:[%s6450_s0 + %s4549_s7]]  }
  0x30   :  { %s4827_s6 = sld [smem:[%s6450_s0 + %s4552_s1]]  }
  0x33   :  { %6543 = sst [smem:[#allocation67_spill]] %s4804_s17 }
  0x34   :  { %s3307_s17 = sld [smem:[%s6450_s0 + %s4551_s22]]  }
  0x3a   :  { %v72_v0 = vstv %s3307_s17 }
  0x3b   :  { %73 = vst [vmem:[#allocation2] sm:$0x1] %v72_v0 }
  0x3c   :  { %74 = vsyncpa [#allocation4], 0 }
  0x3d   :  { %75 = vsyncpa [#allocation7], 0 }
  0x3e   :  { %76 = vsyncpa [#allocation10], 0 }
  0x3f   :  { %77 = vsyncpa [#allocation13], 0 }
  0x40   :  { %78 = vsyncpa [#allocation16], 0 }
  0x41   :  { %79 = vsyncpa [#allocation19], 0 }
  0x42   :  { %80 = vsyncpa [#allocation22], 0 }
  0x43   :  { %81 = vsyncpa [#allocation25], 0 }
  0x44   :  { %82 = vsyncpa [#allocation28], 0 }
  0x45   :  { %83 = vsyncpa [#allocation31], 0 }
  0x46   :  { %84 = vsyncpa [#allocation34], 0 }
  0x47   :  { %85 = vsyncpa [#allocation37], 0 }
  0x48   :  { %86 = vsyncpa [#allocation5], 0  ;;  %s4553_s0 = smov [#allocation6]   ;;  %s3988_s17 = scalar_lea.hbm %s4689_s25, 128 }
  0x49   :  { %s112_s7 = sshll.u32 %s4553_s0, 4  ;;  %p3989_p0 = scmp.ne.s32.totalorder %s4689_s25, %s3988_s17  ;;  %s113_s7 = int_to_ptr.vmem [resolvable:$true] %s112_s7 }
  0x4a   :  { %p3992_p1 = scmp.lt.u32.totalorder %s3988_s17, %s4689_s25 }
  0x4c   :  { %p3994_p2 = pnand %p3992_p1, %p3989_p0 }
  0x4e   :  { %3997 = shalt.err (!%p3994_p2)
}
  0x4f   :  { %s3998_s10 = scalar_lea.vmem %s113_s7, 128  ;;  %p4003_p4 = scmp.lt.s32.totalorder %s113_s7, %s113_s7 }
  0x50   :  { %p3999_p3 = scmp.ne.s32.totalorder %s113_s7, %s3998_s10  ;;  %p4004_p5 = scmp.lt.s32.totalorder %s3998_s10, %s3998_s10 }
  0x52   :  { %p4005_p6 = por %p4004_p5, %p4003_p4 }
  0x54   :  { %p4006_p7 = pnand %p4005_p6, %p3999_p3 }
  0x56   :  { %4009 = shalt.err (!%p4006_p7)
}
  0x57   :  { %s6478_s11 = smov 64   ;;  %s6479_s15 = smov 4  }
  0x58   :  { %118 = dma.hbm_to_vmem [thread:$0]  %s4689_s25, 128, %s113_s7, [#allocation7], %s6478_s11, %s6478_s11, %s6479_s15  }
  0x59   :  { %s4556_s16 = smov [#allocation9]   ;;  %s4557_s22 = smov [#allocation12]  }
  0x5a   :  { %s138_s18 = sshll.u32 %s4556_s16, 4  ;;  %s166_s23 = sshll.u32 %s4557_s22, 4  ;;  %s139_s18 = int_to_ptr.vmem [resolvable:$true] %s138_s18  ;;  %s167_s23 = int_to_ptr.vmem [resolvable:$true] %s166_s23 }
  0x5b   :  { %s4010_s26 = scalar_lea.hbm %s4704_s8, 256 }
  0x5c   :  { %p4011_p8 = scmp.ne.s32.totalorder %s4704_s8, %s4010_s26  ;;  %p4014_p9 = scmp.lt.u32.totalorder %s4010_s26, %s4704_s8 }
  0x5e   :  { %p4016_p10 = pnand %p4014_p9, %p4011_p8 }
  0x60   :  { %4019 = shalt.err (!%p4016_p10)
}
  0x61   :  { %s4020_s1 = scalar_lea.vmem %s139_s18, 256  ;;  %p4025_p12 = scmp.lt.s32.totalorder %s139_s18, %s139_s18 }
  0x62   :  { %p4021_p11 = scmp.ne.s32.totalorder %s139_s18, %s4020_s1  ;;  %p4026_p13 = scmp.lt.s32.totalorder %s4020_s1, %s4020_s1 }
  0x64   :  { %p4027_p0 = por %p4026_p13, %p4025_p12 }
  0x66   :  { %p4028_p1 = pnand %p4027_p0, %p4021_p11 }
  0x68   :  { %4031 = shalt.err (!%p4028_p1)
}
  0x69   :  { %s4558_s28 = smov 128   ;;  %s6498_s25 = smov 8  }
  0x6a   :  { %144 = dma.hbm_to_vmem [thread:$0]  %s4704_s8, 256, %s139_s18, [#allocation10], %s4558_s28, %s4558_s28, %s6498_s25  }
  0x6b   :  { %s4032_s2 = scalar_lea.hbm %s4724_s30, 256 }
  0x6c   :  { %p4033_p2 = scmp.ne.s32.totalorder %s4724_s30, %s4032_s2  ;;  %p4036_p3 = scmp.lt.u32.totalorder %s4032_s2, %s4724_s30 }
  0x6e   :  { %p4038_p4 = pnand %p4036_p3, %p4033_p2 }
  0x70   :  { %4041 = shalt.err (!%p4038_p4)
}
  0x71   :  { %s4042_s0 = scalar_lea.vmem %s167_s23, 256  ;;  %p4047_p6 = scmp.lt.s32.totalorder %s167_s23, %s167_s23 }
  0x72   :  { %p4043_p5 = scmp.ne.s32.totalorder %s167_s23, %s4042_s0  ;;  %p4048_p7 = scmp.lt.s32.totalorder %s4042_s0, %s4042_s0 }
  0x74   :  { %p4049_p8 = por %p4048_p7, %p4047_p6 }
  0x76   :  { %p4050_p9 = pnand %p4049_p8, %p4043_p5 }
  0x78   :  { %4053 = shalt.err (!%p4050_p9)
}
  0x79   :  { %172 = dma.hbm_to_vmem [thread:$0]  %s4724_s30, 256, %s167_s23, [#allocation13], %s4558_s28, %s4558_s28, %s6498_s25  }
  0x7a   :  { %s4560_s8 = smov [#allocation15]   ;;  %s4561_s17 = smov [#allocation18]  }
  0x7b   :  { %s194_s7 = sshll.u32 %s4560_s8, 4  ;;  %s221_s10 = sshll.u32 %s4561_s17, 4  ;;  %s195_s7 = int_to_ptr.vmem [resolvable:$true] %s194_s7  ;;  %s222_s10 = int_to_ptr.vmem [resolvable:$true] %s221_s10 }
  0x7c   :  { %s4054_s16 = scalar_lea.hbm %s4744_s27, 256 }
  0x7d   :  { %p4055_p10 = scmp.ne.s32.totalorder %s4744_s27, %s4054_s16  ;;  %p4058_p11 = scmp.lt.u32.totalorder %s4054_s16, %s4744_s27 }
  0x7f   :  { %p4060_p12 = pnand %p4058_p11, %p4055_p10 }
  0x81   :  { %4063 = shalt.err (!%p4060_p12)
}
  0x82   :  { %s4064_s18 = scalar_lea.vmem %s195_s7, 256  ;;  %p4069_p0 = scmp.lt.s32.totalorder %s195_s7, %s195_s7 }
  0x83   :  { %p4065_p13 = scmp.ne.s32.totalorder %s195_s7, %s4064_s18  ;;  %p4070_p1 = scmp.lt.s32.totalorder %s4064_s18, %s4064_s18 }
  0x85   :  { %p4071_p2 = por %p4070_p1, %p4069_p0 }
  0x87   :  { %p4072_p3 = pnand %p4071_p2, %p4065_p13 }
  0x89   :  { %4075 = shalt.err (!%p4072_p3)
}
  0x8a   :  { %200 = dma.hbm_to_vmem [thread:$0]  %s4744_s27, 256, %s195_s7, [#allocation16], %s4558_s28, %s4558_s28, %s6498_s25  }
  0x8b   :  { %s4076_s30 = scalar_lea.hbm %s4759_s20, 64 }
  0x8c   :  { %p4077_p4 = scmp.ne.s32.totalorder %s4759_s20, %s4076_s30  ;;  %p4080_p5 = scmp.lt.u32.totalorder %s4076_s30, %s4759_s20 }
  0x8e   :  { %p4082_p6 = pnand %p4080_p5, %p4077_p4 }
  0x90   :  { %4085 = shalt.err (!%p4082_p6)
}
  0x91   :  { %s4086_s22 = scalar_lea.vmem %s222_s10, 64  ;;  %p4091_p8 = scmp.lt.s32.totalorder %s222_s10, %s222_s10 }
  0x92   :  { %p4087_p7 = scmp.ne.s32.totalorder %s222_s10, %s4086_s22  ;;  %p4092_p9 = scmp.lt.s32.totalorder %s4086_s22, %s4086_s22 }
  0x94   :  { %p4093_p10 = por %p4092_p9, %p4091_p8 }
  0x96   :  { %p4094_p11 = pnand %p4093_p10, %p4087_p7 }
  0x98   :  { %4097 = shalt.err (!%p4094_p11)
}
  0x99   :  { %224 = dma.hbm_to_vmem [thread:$0]  %s4759_s20, 64, %s222_s10, [#allocation19]  }
  0x9a   :  { %s4562_s23 = smov [#allocation21]   ;;  %s4563_s26 = smov [#allocation24]  }
  0x9b   :  { %s241_s27 = sshll.u32 %s4562_s23, 4  ;;  %s261_s1 = sshll.u32 %s4563_s26, 4  ;;  %s242_s27 = int_to_ptr.vmem [resolvable:$true] %s241_s27  ;;  %s262_s1 = int_to_ptr.vmem [resolvable:$true] %s261_s1 }
  0x9c   :  { %s4098_s2 = scalar_lea.hbm %s4769_s4, 64 }
  0x9d   :  { %p4099_p12 = scmp.ne.s32.totalorder %s4769_s4, %s4098_s2  ;;  %p4102_p13 = scmp.lt.u32.totalorder %s4098_s2, %s4769_s4 }
  0x9f   :  { %p4104_p0 = pnand %p4102_p13, %p4099_p12 }
  0xa1   :  { %4107 = shalt.err (!%p4104_p0)
}
  0xa2   :  { %s4108_s0 = scalar_lea.vmem %s242_s27, 64  ;;  %p4113_p2 = scmp.lt.s32.totalorder %s242_s27, %s242_s27 }
  0xa3   :  { %p4109_p1 = scmp.ne.s32.totalorder %s242_s27, %s4108_s0  ;;  %p4114_p3 = scmp.lt.s32.totalorder %s4108_s0, %s4108_s0 }
  0xa5   :  { %p4115_p4 = por %p4114_p3, %p4113_p2 }
  0xa7   :  { %p4116_p5 = pnand %p4115_p4, %p4109_p1 }
  0xa9   :  { %4119 = shalt.err (!%p4116_p5)
}
  0xaa   :  { %244 = dma.hbm_to_vmem [thread:$0]  %s4769_s4, 64, %s242_s27, [#allocation22]  }
  0xab   :  { %s4120_s20 = scalar_lea.hbm %s4779_s3, 64 }
  0xac   :  { %p4121_p6 = scmp.ne.s32.totalorder %s4779_s3, %s4120_s20  ;;  %p4124_p7 = scmp.lt.u32.totalorder %s4120_s20, %s4779_s3 }
  0xae   :  { %p4126_p8 = pnand %p4124_p7, %p4121_p6 }
  0xb0   :  { %4129 = shalt.err (!%p4126_p8)
}
  0xb1   :  { %s4130_s8 = scalar_lea.vmem %s262_s1, 64  ;;  %p4135_p10 = scmp.lt.s32.totalorder %s262_s1, %s262_s1 }
  0xb2   :  { %p4131_p9 = scmp.ne.s32.totalorder %s262_s1, %s4130_s8  ;;  %p4136_p11 = scmp.lt.s32.totalorder %s4130_s8, %s4130_s8 }
  0xb4   :  { %p4137_p12 = por %p4136_p11, %p4135_p10 }
  0xb6   :  { %p4138_p13 = pnand %p4137_p12, %p4131_p9 }
  0xb8   :  { %4141 = shalt.err (!%p4138_p13)
}
  0xb9   :  { %264 = dma.hbm_to_vmem [thread:$0]  %s4779_s3, 64, %s262_s1, [#allocation25]  }
  0xba   :  { %s4564_s7 = smov [#allocation27]   ;;  %s4565_s17 = smov [#allocation30]  }
  0xbb   :  { %s281_s4 = sshll.u32 %s4564_s7, 4  ;;  %s301_s10 = sshll.u32 %s4565_s17, 4  ;;  %s282_s4 = int_to_ptr.vmem [resolvable:$true] %s281_s4  ;;  %s302_s10 = int_to_ptr.vmem [resolvable:$true] %s301_s10 }
  0xbc   :  { %s4142_s16 = scalar_lea.hbm %s4789_s13, 64 }
  0xbd   :  { %p4143_p0 = scmp.ne.s32.totalorder %s4789_s13, %s4142_s16  ;;  %p4146_p1 = scmp.lt.u32.totalorder %s4142_s16, %s4789_s13 }
  0xbf   :  { %p4148_p2 = pnand %p4146_p1, %p4143_p0 }
  0xc1   :  { %4151 = shalt.err (!%p4148_p2)
}
  0xc2   :  { %s4152_s18 = scalar_lea.vmem %s282_s4, 64  ;;  %p4157_p4 = scmp.lt.s32.totalorder %s282_s4, %s282_s4 }
  0xc3   :  { %p4153_p3 = scmp.ne.s32.totalorder %s282_s4, %s4152_s18  ;;  %p4158_p5 = scmp.lt.s32.totalorder %s4152_s18, %s4152_s18 }
  0xc5   :  { %p4159_p6 = por %p4158_p5, %p4157_p4 }
  0xc7   :  { %p4160_p7 = pnand %p4159_p6, %p4153_p3 }
  0xc9   :  { %4163 = shalt.err (!%p4160_p7)
}
  0xca   :  { %284 = dma.hbm_to_vmem [thread:$0]  %s4789_s13, 64, %s282_s4, [#allocation28]  }
  0xcb   :  { %s4164_s3 = scalar_lea.hbm %s4799_s5, 64 }
  0xcc   :  { %p4165_p8 = scmp.ne.s32.totalorder %s4799_s5, %s4164_s3  ;;  %p4168_p9 = scmp.lt.u32.totalorder %s4164_s3, %s4799_s5 }
  0xce   :  { %p4170_p10 = pnand %p4168_p9, %p4165_p8 }
  0xd0   :  { %4173 = shalt.err (!%p4170_p10)
}
  0xd1   :  { %s4174_s30 = scalar_lea.vmem %s302_s10, 64  ;;  %p4179_p12 = scmp.lt.s32.totalorder %s302_s10, %s302_s10 }
  0xd2   :  { %p4175_p11 = scmp.ne.s32.totalorder %s302_s10, %s4174_s30  ;;  %p4180_p13 = scmp.lt.s32.totalorder %s4174_s30, %s4174_s30 }
  0xd4   :  { %p4181_p0 = por %p4180_p13, %p4179_p12 }
  0xd6   :  { %p4182_p1 = pnand %p4181_p0, %p4175_p11 }
  0xd8   :  { %4185 = shalt.err (!%p4182_p1)
}
  0xd9   :  { %304 = dma.hbm_to_vmem [thread:$0]  %s4799_s5, 64, %s302_s10, [#allocation31]  }
  0xda   :  { %s4566_s22 = smov [#allocation33]   ;;  %s4567_s23 = smov [#allocation3]  }
  0xdb   :  { %s321_s13 = sshll.u32 %s4566_s22, 4  ;;  %s100_s27 = sshll.u32 %s4567_s23, 4  ;;  %s322_s13 = int_to_ptr.vmem [resolvable:$true] %s321_s13  ;;  %s101_s27 = int_to_ptr.vmem [resolvable:$true] %s100_s27 }
  0xdc   :  { %s4186_s26 = scalar_lea.hbm %s4809_s14, 64 }
  0xdd   :  { %p4187_p2 = scmp.ne.s32.totalorder %s4809_s14, %s4186_s26  ;;  %p4190_p3 = scmp.lt.u32.totalorder %s4186_s26, %s4809_s14 }
  0xdf   :  { %p4192_p4 = pnand %p4190_p3, %p4187_p2 }
  0xe1   :  { %4195 = shalt.err (!%p4192_p4)
}
  0xe2   :  { %s4196_s1 = scalar_lea.vmem %s322_s13, 64  ;;  %p4201_p6 = scmp.lt.s32.totalorder %s322_s13, %s322_s13 }
  0xe3   :  { %p4197_p5 = scmp.ne.s32.totalorder %s322_s13, %s4196_s1  ;;  %p4202_p7 = scmp.lt.s32.totalorder %s4196_s1, %s4196_s1 }
  0xe5   :  { %p4203_p8 = por %p4202_p7, %p4201_p6 }
  0xe7   :  { %p4204_p9 = pnand %p4203_p8, %p4197_p5 }
  0xe9   :  { %4207 = shalt.err (!%p4204_p9)
}
  0xea   :  { %324 = dma.hbm_to_vmem [thread:$0]  %s4809_s14, 64, %s322_s13, [#allocation34]  }
  0xeb   :  { %s4208_s5 = scalar_lea.hbm %s4684_s21, 2048 }
  0xec   :  { %p4209_p10 = scmp.ne.s32.totalorder %s4684_s21, %s4208_s5  ;;  %p4212_p11 = scmp.lt.u32.totalorder %s4208_s5, %s4684_s21 }
  0xee   :  { %p4214_p12 = pnand %p4212_p11, %p4209_p10 }
  0xf0   :  { %4217 = shalt.err (!%p4214_p12)
}
  0xf1   :  { %s4218_s2 = scalar_lea.vmem %s101_s27, 2048  ;;  %p4223_p0 = scmp.lt.s32.totalorder %s101_s27, %s101_s27 }
  0xf2   :  { %p4219_p13 = scmp.ne.s32.totalorder %s101_s27, %s4218_s2  ;;  %p4224_p1 = scmp.lt.s32.totalorder %s4218_s2, %s4218_s2 }
  0xf4   :  { %p4225_p2 = por %p4224_p1, %p4223_p0 }
  0xf6   :  { %p4226_p3 = pnand %p4225_p2, %p4219_p13 }
  0xf8   :  { %4229 = shalt.err (!%p4226_p3)
}
  0xf9   :  { %106 = dma.hbm_to_vmem [thread:$0]  %s4684_s21, 2048, %s101_s27, [#allocation4], %s4558_s28, %s4558_s28, %s6498_s25  }
  0xfa   :  { %s4568_s14 = smov [#allocation8]   ;;  %s4569_s20 = smov [#allocation11]  }
  0xfb   :  { %s124_s0 = sshll.u32 %s4568_s14, 4  ;;  %s152_s8 = sshll.u32 %s4569_s20, 4  ;;  %s125_s0 = int_to_ptr.vmem [resolvable:$true] %s124_s0  ;;  %s153_s8 = int_to_ptr.vmem [resolvable:$true] %s152_s8 }
  0xfc   :  { %s4230_s7 = scalar_lea.hbm %s4694_s29, 256 }
  0xfd   :  { %p4231_p4 = scmp.ne.s32.totalorder %s4694_s29, %s4230_s7  ;;  %p4234_p5 = scmp.lt.u32.totalorder %s4230_s7, %s4694_s29 }
  0xff   :  { %p4236_p6 = pnand %p4234_p5, %p4231_p4 }
 0x101   :  { %4239 = shalt.err (!%p4236_p6)
}
 0x102   :  { %s4240_s4 = scalar_lea.vmem %s125_s0, 256  ;;  %p4245_p8 = scmp.lt.s32.totalorder %s125_s0, %s125_s0 }
 0x103   :  { %p4241_p7 = scmp.ne.s32.totalorder %s125_s0, %s4240_s4  ;;  %p4246_p9 = scmp.lt.s32.totalorder %s4240_s4, %s4240_s4 }
 0x105   :  { %p4247_p10 = por %p4246_p9, %p4245_p8 }
 0x107   :  { %p4248_p11 = pnand %p4247_p10, %p4241_p7 }
 0x109   :  { %4251 = shalt.err (!%p4248_p11)
}
 0x10a   :  { %130 = dma.hbm_to_vmem [thread:$0]  %s4694_s29, 256, %s125_s0, [#allocation7], %s4558_s28, %s4558_s28, %s6498_s25  }
 0x10b   :  { %s4252_s21 = scalar_lea.hbm %s4714_s19, 256 }
 0x10c   :  { %p4253_p12 = scmp.ne.s32.totalorder %s4714_s19, %s4252_s21  ;;  %p4256_p13 = scmp.lt.u32.totalorder %s4252_s21, %s4714_s19 }
 0x10e   :  { %p4258_p0 = pnand %p4256_p13, %p4253_p12 }
 0x110   :  { %4261 = shalt.err (!%p4258_p0)
}
 0x111   :  { %s4262_s17 = scalar_lea.vmem %s153_s8, 256  ;;  %p4267_p2 = scmp.lt.s32.totalorder %s153_s8, %s153_s8 }
 0x112   :  { %p4263_p1 = scmp.ne.s32.totalorder %s153_s8, %s4262_s17  ;;  %p4268_p3 = scmp.lt.s32.totalorder %s4262_s17, %s4262_s17 }
 0x114   :  { %p4269_p4 = por %p4268_p3, %p4267_p2 }
 0x116   :  { %p4270_p5 = pnand %p4269_p4, %p4263_p1 }
 0x118   :  { %4273 = shalt.err (!%p4270_p5)
}
 0x119   :  { %158 = dma.hbm_to_vmem [thread:$0]  %s4714_s19, 256, %s153_s8, [#allocation10], %s4558_s28, %s4558_s28, %s6498_s25  }
 0x11a   :  { %s4570_s29 = smov [#allocation14]   ;;  %s4571_s16 = smov [#allocation17]  }
 0x11b   :  { %s180_s10 = sshll.u32 %s4570_s29, 4  ;;  %s208_s18 = sshll.u32 %s4571_s16, 4  ;;  %s181_s10 = int_to_ptr.vmem [resolvable:$true] %s180_s10  ;;  %s209_s18 = int_to_ptr.vmem [resolvable:$true] %s208_s18 }
 0x11c   :  { %s4274_s3 = scalar_lea.hbm %s4734_s12, 256 }
 0x11d   :  { %p4275_p6 = scmp.ne.s32.totalorder %s4734_s12, %s4274_s3  ;;  %p4278_p7 = scmp.lt.u32.totalorder %s4274_s3, %s4734_s12 }
 0x11f   :  { %p4280_p8 = pnand %p4278_p7, %p4275_p6 }
 0x121   :  { %4283 = shalt.err (!%p4280_p8)
}
 0x122   :  { %s4284_s30 = scalar_lea.vmem %s181_s10, 256  ;;  %p4289_p10 = scmp.lt.s32.totalorder %s181_s10, %s181_s10 }
 0x123   :  { %p4285_p9 = scmp.ne.s32.totalorder %s181_s10, %s4284_s30  ;;  %p4290_p11 = scmp.lt.s32.totalorder %s4284_s30, %s4284_s30 }
 0x125   :  { %p4291_p12 = por %p4290_p11, %p4289_p10 }
 0x127   :  { %p4292_p13 = pnand %p4291_p12, %p4285_p9 }
 0x129   :  { %4295 = shalt.err (!%p4292_p13)
}
 0x12a   :  { %s6544_s19 = sld [smem:[#allocation62_spill]] }
 0x12b   :  { %186 = dma.hbm_to_vmem [thread:$0]  %s4734_s12, 256, %s181_s10, [#allocation13], %s4558_s28, %s4558_s28, %s6498_s25  }
 0x130   :  { %s4296_s22 = scalar_lea.hbm %s6544_s19, 256 }
 0x131   :  { %p4297_p0 = scmp.ne.s32.totalorder %s6544_s19, %s4296_s22  ;;  %p4300_p1 = scmp.lt.u32.totalorder %s4296_s22, %s6544_s19 }
 0x133   :  { %p4302_p2 = pnand %p4300_p1, %p4297_p0 }
 0x135   :  { %4305 = shalt.err (!%p4302_p2)
}
 0x136   :  { %s4306_s13 = scalar_lea.vmem %s209_s18, 256  ;;  %p4311_p4 = scmp.lt.s32.totalorder %s209_s18, %s209_s18 }
 0x137   :  { %p4307_p3 = scmp.ne.s32.totalorder %s209_s18, %s4306_s13  ;;  %p4312_p5 = scmp.lt.s32.totalorder %s4306_s13, %s4306_s13 }
 0x139   :  { %p4313_p6 = por %p4312_p5, %p4311_p4 }
 0x13b   :  { %p4314_p7 = pnand %p4313_p6, %p4307_p3 }
 0x13d   :  { %4317 = shalt.err (!%p4314_p7)
}
 0x13e   :  { %s6545_s23 = sld [smem:[#allocation63_spill]]  ;;  %s4572_s12 = smov [#allocation20]  }
 0x13f   :  { %214 = dma.hbm_to_vmem [thread:$0]  %s6544_s19, 256, %s209_s18, [#allocation16], %s4558_s28, %s4558_s28, %s6498_s25  }
 0x140   :  { %s231_s27 = sshll.u32 %s4572_s12, 4  ;;  %s4573_s26 = smov [#allocation23]   ;;  %s232_s27 = int_to_ptr.vmem [resolvable:$true] %s231_s27 }
 0x141   :  { %s251_s1 = sshll.u32 %s4573_s26, 4  ;;  %s252_s1 = int_to_ptr.vmem [resolvable:$true] %s251_s1 }
 0x144   :  { %s4318_s5 = scalar_lea.hbm %s6545_s23, 128 }
 0x145   :  { %p4319_p8 = scmp.ne.s32.totalorder %s6545_s23, %s4318_s5  ;;  %p4322_p9 = scmp.lt.u32.totalorder %s4318_s5, %s6545_s23 }
 0x147   :  { %p4324_p10 = pnand %p4322_p9, %p4319_p8 }
 0x149   :  { %4327 = shalt.err (!%p4324_p10)
}
 0x14a   :  { %s4328_s2 = scalar_lea.vmem %s232_s27, 128  ;;  %p4333_p12 = scmp.lt.s32.totalorder %s232_s27, %s232_s27 }
 0x14b   :  { %p4329_p11 = scmp.ne.s32.totalorder %s232_s27, %s4328_s2  ;;  %p4334_p13 = scmp.lt.s32.totalorder %s4328_s2, %s4328_s2 }
 0x14d   :  { %p4335_p0 = por %p4334_p13, %p4333_p12 }
 0x14f   :  { %p4336_p1 = pnand %p4335_p0, %p4329_p11 }
 0x151   :  { %4339 = shalt.err (!%p4336_p1)
}
 0x152   :  { %s6546_s14 = sld [smem:[#allocation64_spill]] }
 0x153   :  { %234 = dma.hbm_to_vmem [thread:$0]  %s6545_s23, 128, %s232_s27, [#allocation19]  }
 0x158   :  { %s4340_s28 = scalar_lea.hbm %s6546_s14, 128 }
 0x159   :  { %p4341_p2 = scmp.ne.s32.totalorder %s6546_s14, %s4340_s28  ;;  %p4344_p3 = scmp.lt.u32.totalorder %s4340_s28, %s6546_s14 }
 0x15b   :  { %p4346_p4 = pnand %p4344_p3, %p4341_p2 }
 0x15d   :  { %4349 = shalt.err (!%p4346_p4)
}
 0x15e   :  { %s4350_s0 = scalar_lea.vmem %s252_s1, 128  ;;  %p4355_p6 = scmp.lt.s32.totalorder %s252_s1, %s252_s1 }
 0x15f   :  { %p4351_p5 = scmp.ne.s32.totalorder %s252_s1, %s4350_s0  ;;  %p4356_p7 = scmp.lt.s32.totalorder %s4350_s0, %s4350_s0 }
 0x161   :  { %p4357_p8 = por %p4356_p7, %p4355_p6 }
 0x163   :  { %p4358_p9 = pnand %p4357_p8, %p4351_p5 }
 0x165   :  { %4361 = shalt.err (!%p4358_p9)
}
 0x166   :  { %s6547_s20 = sld [smem:[#allocation65_spill]]  ;;  %s4574_s8 = smov [#allocation26]  }
 0x167   :  { %254 = dma.hbm_to_vmem [thread:$0]  %s6546_s14, 128, %s252_s1, [#allocation22]  }
 0x168   :  { %s271_s7 = sshll.u32 %s4574_s8, 4  ;;  %s4575_s4 = smov [#allocation29]   ;;  %s272_s7 = int_to_ptr.vmem [resolvable:$true] %s271_s7 }
 0x169   :  { %s291_s21 = sshll.u32 %s4575_s4, 4  ;;  %s292_s21 = int_to_ptr.vmem [resolvable:$true] %s291_s21 }
 0x16c   :  { %s4362_s17 = scalar_lea.hbm %s6547_s20, 128 }
 0x16d   :  { %p4363_p10 = scmp.ne.s32.totalorder %s6547_s20, %s4362_s17  ;;  %p4366_p11 = scmp.lt.u32.totalorder %s4362_s17, %s6547_s20 }
 0x16f   :  { %p4368_p12 = pnand %p4366_p11, %p4363_p10 }
 0x171   :  { %4371 = shalt.err (!%p4368_p12)
}
 0x172   :  { %s4372_s29 = scalar_lea.vmem %s272_s7, 128  ;;  %p4377_p0 = scmp.lt.s32.totalorder %s272_s7, %s272_s7 }
 0x173   :  { %p4373_p13 = scmp.ne.s32.totalorder %s272_s7, %s4372_s29  ;;  %p4378_p1 = scmp.lt.s32.totalorder %s4372_s29, %s4372_s29 }
 0x175   :  { %p4379_p2 = por %p4378_p1, %p4377_p0 }
 0x177   :  { %p4380_p3 = pnand %p4379_p2, %p4373_p13 }
 0x179   :  { %4383 = shalt.err (!%p4380_p3)
}
 0x17a   :  { %s6548_s10 = sld [smem:[#allocation66_spill]] }
 0x17b   :  { %274 = dma.hbm_to_vmem [thread:$0]  %s6547_s20, 128, %s272_s7, [#allocation25]  }
 0x180   :  { %s4384_s16 = scalar_lea.hbm %s6548_s10, 128 }
 0x181   :  { %p4385_p4 = scmp.ne.s32.totalorder %s6548_s10, %s4384_s16  ;;  %p4388_p5 = scmp.lt.u32.totalorder %s4384_s16, %s6548_s10 }
 0x183   :  { %p4390_p6 = pnand %p4388_p5, %p4385_p4 }
 0x185   :  { %4393 = shalt.err (!%p4390_p6)
}
 0x186   :  { %s4394_s18 = scalar_lea.vmem %s292_s21, 128  ;;  %p4399_p8 = scmp.lt.s32.totalorder %s292_s21, %s292_s21 }
 0x187   :  { %p4395_p7 = scmp.ne.s32.totalorder %s292_s21, %s4394_s18  ;;  %p4400_p9 = scmp.lt.s32.totalorder %s4394_s18, %s4394_s18 }
 0x189   :  { %p4401_p10 = por %p4400_p9, %p4399_p8 }
 0x18b   :  { %p4402_p11 = pnand %p4401_p10, %p4395_p7 }
 0x18d   :  { %4405 = shalt.err (!%p4402_p11)
}
 0x18e   :  { %s6549_s3 = sld [smem:[#allocation67_spill]]  ;;  %s4576_s30 = smov [#allocation32]  }
 0x18f   :  { %294 = dma.hbm_to_vmem [thread:$0]  %s6548_s10, 128, %s292_s21, [#allocation28]  }
 0x190   :  { %s311_s19 = sshll.u32 %s4576_s30, 4  ;;  %s4577_s22 = smov [#allocation35]   ;;  %s312_s19 = int_to_ptr.vmem [resolvable:$true] %s311_s19 }
 0x191   :  { %s331_s13 = sshll.u32 %s4577_s22, 4  ;;  %s332_s13 = int_to_ptr.vmem [resolvable:$true] %s331_s13 }
 0x194   :  { %s4406_s23 = scalar_lea.hbm %s6549_s3, 128 }
 0x195   :  { %p4407_p12 = scmp.ne.s32.totalorder %s6549_s3, %s4406_s23  ;;  %p4410_p13 = scmp.lt.u32.totalorder %s4406_s23, %s6549_s3 }
 0x197   :  { %p4412_p0 = pnand %p4410_p13, %p4407_p12 }
 0x199   :  { %4415 = shalt.err (!%p4412_p0)
}
 0x19a   :  { %s4416_s12 = scalar_lea.vmem %s312_s19, 128  ;;  %p4421_p2 = scmp.lt.s32.totalorder %s312_s19, %s312_s19 }
 0x19b   :  { %p4417_p1 = scmp.ne.s32.totalorder %s312_s19, %s4416_s12  ;;  %p4422_p3 = scmp.lt.s32.totalorder %s4416_s12, %s4416_s12 }
 0x19d   :  { %p4423_p4 = por %p4422_p3, %p4421_p2 }
 0x19f   :  { %p4424_p5 = pnand %p4423_p4, %p4417_p1 }
 0x1a1   :  { %4427 = shalt.err (!%p4424_p5)
}
 0x1a2   :  { %314 = dma.hbm_to_vmem [thread:$0]  %s6549_s3, 128, %s312_s19, [#allocation31]  }
 0x1a3   :  { %s4428_s27 = scalar_lea.hbm %s4814_s9, 128 }
 0x1a4   :  { %p4429_p6 = scmp.ne.s32.totalorder %s4814_s9, %s4428_s27  ;;  %p4432_p7 = scmp.lt.u32.totalorder %s4428_s27, %s4814_s9 }
 0x1a6   :  { %p4434_p8 = pnand %p4432_p7, %p4429_p6 }
 0x1a8   :  { %4437 = shalt.err (!%p4434_p8)
}
 0x1a9   :  { %s4438_s26 = scalar_lea.vmem %s332_s13, 128  ;;  %p4443_p10 = scmp.lt.s32.totalorder %s332_s13, %s332_s13 }
 0x1aa   :  { %p4439_p9 = scmp.ne.s32.totalorder %s332_s13, %s4438_s26  ;;  %p4444_p11 = scmp.lt.s32.totalorder %s4438_s26, %s4438_s26 }
 0x1ac   :  { %p4445_p12 = por %p4444_p11, %p4443_p10 }
 0x1ae   :  { %p4446_p13 = pnand %p4445_p12, %p4439_p9 }
 0x1b0   :  { %4449 = shalt.err (!%p4446_p13)
}
 0x1b1   :  { %334 = dma.hbm_to_vmem [thread:$0]  %s4814_s9, 128, %s332_s13, [#allocation34]  }
 0x1b2   :  { %s4578_s1 = smov [#allocation36]   ;;  %s4450_s2 = scalar_lea.hbm %s4819_s24, 16 }
 0x1b3   :  { %s341_s5 = sshll.u32 %s4578_s1, 4  ;;  %p4451_p0 = scmp.ne.s32.totalorder %s4819_s24, %s4450_s2  ;;  %s342_s5 = int_to_ptr.vmem [resolvable:$true] %s341_s5 }
 0x1b4   :  { %p4454_p1 = scmp.lt.u32.totalorder %s4450_s2, %s4819_s24 }
 0x1b6   :  { %p4456_p2 = pnand %p4454_p1, %p4451_p0 }
 0x1b8   :  { %4459 = shalt.err (!%p4456_p2)
}
 0x1b9   :  { %s4460_s14 = scalar_lea.vmem %s342_s5, 16  ;;  %s4464_s28 = scalar_lea.vmem %s342_s5, 32 }
 0x1ba   :  { %p4461_p3 = scmp.ne.s32.totalorder %s342_s5, %s4460_s14  ;;  %p4465_p4 = scmp.lt.s32.totalorder %s342_s5, %s342_s5 }
 0x1bb   :  { %p4466_p5 = scmp.lt.s32.totalorder %s4464_s28, %s4460_s14 }
 0x1bd   :  { %p4467_p6 = por %p4466_p5, %p4465_p4 }
 0x1bf   :  { %p4468_p7 = pnand %p4467_p6, %p4461_p3 }
 0x1c1   :  { %4471 = shalt.err (!%p4468_p7)
}
 0x1c2   :  { %344 = dma.hbm_to_vmem [thread:$0]  %s4819_s24, 16, %s342_s5, [#allocation37]  }
 0x1c3   :  { %4494 = dma.done.wait [#allocation4], 2048  }
 0x1c4   :  { %4495 = vsyncadd [#allocation4], 4294965248 }
 0x1c5   :  { %4496 = dma.done.wait [#allocation7], 384  }
 0x1c6   :  { %4497 = vsyncadd [#allocation7], 4294966912 }
 0x1c7   :  { %4498 = dma.done.wait [#allocation10], 512  }
 0x1c8   :  { %4499 = vsyncadd [#allocation10], 4294966784 }
 0x1c9   :  { %4500 = dma.done.wait [#allocation13], 512  }
 0x1ca   :  { %4501 = vsyncadd [#allocation13], 4294966784 }
 0x1cb   :  { %4502 = dma.done.wait [#allocation16], 512  }
 0x1cc   :  { %4503 = vsyncadd [#allocation16], 4294966784 }
 0x1cd   :  { %4504 = dma.done.wait [#allocation19], 192  }
 0x1ce   :  { %4505 = vsyncadd [#allocation19], 4294967104 }
 0x1cf   :  { %4506 = dma.done.wait [#allocation22], 192  }
 0x1d0   :  { %4507 = vsyncadd [#allocation22], 4294967104 }
 0x1d1   :  { %4508 = dma.done.wait [#allocation25], 192  }
 0x1d2   :  { %4509 = vsyncadd [#allocation25], 4294967104 }
 0x1d3   :  { %4510 = dma.done.wait [#allocation28], 192  }
 0x1d4   :  { %4511 = vsyncadd [#allocation28], 4294967104 }
 0x1d5   :  { %4512 = dma.done.wait [#allocation31], 192  }
 0x1d6   :  { %4513 = vsyncadd [#allocation31], 4294967104 }
 0x1d7   :  { %4514 = dma.done.wait [#allocation34], 192  }
 0x1d8   :  { %4515 = vsyncadd [#allocation34], 4294967104 }
 0x1d9   :  { %4516 = dma.done.wait [#allocation37], 16  }
 0x1da   :  { %4517 = vsyncadd [#allocation37], 4294967280  ;;  %s6550_s9 = sld [smem:[#allocation52_spill]]  ;;  %s6519_s24 = smov 125   ;;  %vm470_vm0 = vcmask 7168   ;;  %vm473_vm1 = vcmask 15360  }
 0x1db   :  { %s6484_s0 = smov 1   ;;  %s4581_s20 = smov 127   ;;  %vm476_vm2 = vcmask 23552   ;;  %vm479_vm3 = vcmask 89088   ;;  %vm482_vm4 = vcmask 97280   ;;  %vm485_vm5 = vcmask 105472  }
 0x1dc   :  { %s6480_s8 = smov 3   ;;  %s6476_s7 = smov 5   ;;  %vm563_vm6 = vcmask 916480   ;;  %v4590_v43 = vmov 0   ;;  %vm683_vm11 = vcmask 72704   ;;  %vm842_vm13 = vcmask 785408  }
 0x1dd   :  { %s6474_s4 = smov 7   ;;  %s6472_s21 = smov 9   ;;  %3802 = vset.pattern.permute.xlu1 %v4590_v43  ;;  %3803 = vset.pattern.permute.xlu0 %v4590_v43  ;;  %vm3321_vm12 = vmpackc.low %vm683_vm11, %vm683_vm11  ;;  %vm1026_vm14 = vcmask 31744   ;;  %vm1029_vm15 = vcmask 39936  }
 0x1de   :  { %s6551_s17 = sld [smem:[#allocation53_spill]]  ;;  %s6552_s29 = sld [smem:[#allocation54_spill]] }
 0x1df   :  { %s6508_s10 = smov 126   ;;  %s6515_s16 = smov 124  }
 0x1e0   :  { %v414_v1 = vld [vmem:[%s6550_s9] sm:$0xff]  ;;  %v415_v2 = vld [vmem:[%s6550_s9 + $0x8] sm:$0xff]  ;;  %s4588_s18 = smov 122   ;;  %s4589_s3 = smov 123  }
 0x1e1   :  { %v416_v3 = vmul.f32 0.4342945, %v414_v1  ;;  %v417_v4 = vmul.f32 0.4342945, %v415_v2  ;;  %s6553_s30 = sld [smem:[#allocation55_spill]]  ;;  %s6506_s19 = smov 121  }
 0x1e2   :  { %s6482_s22 = smov 2   ;;  %s4593_s13 = smov 6  }
 0x1e3   :  { %v3737_v5 = vpack.i.bf16 %v417_v4, %v416_v3  ;;  %s6488_s23 = smov 48   ;;  %s6496_s12 = smov 16  }
 0x1e4   :  { %v3969_v41 = vld [vmem:[%s6551_s17] sm:$0xff]   ;;  %v423_v44 = vld [vmem:[%s6552_s29 + $0x8] sm:$0xff]  ;;  %v424_v45 = vld [vmem:[%s6552_s29 + $0x10] sm:$0xff]  ;;  %s6494_s27 = smov 24   ;;  %s6492_s26 = smov 32  }
 0x1e5   :  { %3738 = vrot.lane.b32.xlu0 %v3737_v5, %s6519_s24  ;;  %3748 = vrot.lane.b32.xlu1 %v3737_v5, %s6484_s0  ;;  %v422_v42 = vld [vmem:[%s6552_s29] sm:$0xff]  ;;  %v425_v46 = vld [vmem:[%s6552_s29 + $0x18] sm:$0xff]  ;;  %s6490_s1 = smov 40   ;;  %s6486_s5 = smov 56  }
 0x1e6   :  { %3435 = vmatprep.mubr.msk.bf16.mxu0 %vm563_vm6, %v3969_v41  ;;  %s6634_s2 = sld [smem:[#allocation56_spill]]  ;;  %s6635_s14 = sld [smem:[#allocation57_spill]] }
 0x1e7   :  { %s6636_s28 = sld [smem:[#allocation58_spill]]  ;;  %s6637_s9 = sld [smem:[#allocation59_spill]] }
 0x1e8   :  { %s6639_s29 = sld [smem:[#allocation61_spill]]  ;;  %s4613_s11 = smov 95  }
 0x1e9   :  { %3743 = vrot.lane.b32.xlu0 %v3737_v5, %s4581_s20  ;;  %3753 = vrot.lane.b32.xlu1 %v3737_v5, %s6480_s8 }
 0x1ed   :  { %3758 = vrot.lane.b32.xlu0 %v3737_v5, %s6476_s7  ;;  %3763 = vrot.lane.b32.xlu1 %v3737_v5, %s6474_s4 }
 0x1f1   :  { %3768 = vrot.lane.b32.xlu0 %v3737_v5, %s6472_s21 }
 0x257   :  { %v3739_v6 = vpop.permute.xlu0 %3738  ;;  %v3749_v7 = vpop.permute.xlu1 %3748 }
 0x258   :  { %v3741_v8 = vunpack.i.h.bf16 %v3739_v6  ;;  %v3740_v9 = vunpack.i.l.bf16 %v3739_v6  ;;  %v3751_v16 = vunpack.i.h.bf16 %v3749_v7  ;;  %v3750_v17 = vunpack.i.l.bf16 %v3749_v7  ;;  %v3970_v7 = vld [vmem:[%s6551_s17 + $0x8] sm:$0xff]   ;;  %s6638_s17 = sld [smem:[#allocation60_spill]] }
 0x25b   :  { %v3744_v10 = vpop.permute.xlu0 %3743  ;;  %v3754_v11 = vpop.permute.xlu1 %3753 }
 0x25c   :  { %v3746_v12 = vunpack.i.h.bf16 %v3744_v10  ;;  %v3745_v13 = vunpack.i.l.bf16 %v3744_v10  ;;  %v3756_v14 = vunpack.i.h.bf16 %v3754_v11  ;;  %v3755_v15 = vunpack.i.l.bf16 %v3754_v11 }
 0x25e   :  { %v471_v18 = vsel %vm470_vm0, %v3740_v9, %v3745_v13  ;;  %v472_v19 = vsel %vm470_vm0, %v3741_v8, %v3746_v12 }
 0x25f   :  { %v474_v20 = vsel %vm473_vm1, %v471_v18, %v3750_v17  ;;  %v475_v21 = vsel %vm473_vm1, %v472_v19, %v3751_v16  ;;  %v3759_v22 = vpop.permute.xlu0 %3758  ;;  %v3764_v23 = vpop.permute.xlu1 %3763 }
 0x260   :  { %v477_v24 = vsel %vm476_vm2, %v474_v20, %v3755_v15  ;;  %v478_v25 = vsel %vm476_vm2, %v475_v21, %v3756_v14  ;;  %v3761_v26 = vunpack.i.h.bf16 %v3759_v22  ;;  %v3760_v27 = vunpack.i.l.bf16 %v3759_v22 }
 0x261   :  { %v3766_v28 = vunpack.i.h.bf16 %v3764_v23  ;;  %v3765_v29 = vunpack.i.l.bf16 %v3764_v23 }
 0x262   :  { %v480_v30 = vsel %vm479_vm3, %v477_v24, %v3760_v27  ;;  %v481_v31 = vsel %vm479_vm3, %v478_v25, %v3761_v26  ;;  %vm1032_vm3 = vcmask 48128  }
 0x263   :  { %v3769_v32 = vpop.permute.xlu0 %3768  ;;  %v483_v35 = vsel %vm482_vm4, %v480_v30, %v3765_v29  ;;  %v484_v36 = vsel %vm482_vm4, %v481_v31, %v3766_v28  ;;  %vm1035_vm4 = vcmask 56320  }
 0x264   :  { %v3771_v33 = vunpack.i.h.bf16 %v3769_v32  ;;  %v3770_v34 = vunpack.i.l.bf16 %v3769_v32 }
 0x266   :  { %v486_v37 = vsel %vm485_vm5, %v483_v35, %v3770_v34  ;;  %v487_v38 = vsel %vm485_vm5, %v484_v36, %v3771_v33  ;;  %vm1488_vm5 = vcmask 64512  }
 0x267   :  { %v3777_v39 = vpack.i.bf16 %v487_v38, %v486_v37  ;;  %v526_v40 = vpack.c.bf16 %v487_v38, %v486_v37 }
 0x269   :  { %3778 = vrot.lane.b32.xlu0 %v3777_v39, %s6508_s10  ;;  %3773 = vrot.lane.b32.xlu1 %v3777_v39, %s4581_s20 }
 0x26a   :  { %3421 = vmatprep.subr.bf16.mxu0 %v526_v40 }
 0x26b   :  { %3422 = vmatpush3.bf16.msra.mxu0 %v526_v40 }
 0x26d   :  { %3788 = vrot.lane.b32.xlu0 %v3777_v39, %s6515_s16  ;;  %3783 = vrot.lane.b32.xlu1 %v3777_v39, %s6519_s24 }
 0x271   :  { %3798 = vrot.lane.b32.xlu0 %v3777_v39, %s4588_s18  ;;  %3793 = vrot.lane.b32.xlu1 %v3777_v39, %s4589_s3 }
 0x275   :  { %535 = vperm.xlu1 %3802, %v422_v42   ;;  %540 = vperm.xlu0 %3803, %v423_v44  }
 0x279   :  { %545 = vperm.xlu1 %3802, %v424_v45  }
 0x27d   :  { %550 = vperm.xlu1 %3802, %v425_v46  }
 0x2db   :  { %v3779_v47 = vpop.permute.xlu0 %3778  ;;  %v3774_v48 = vpop.permute.xlu1 %3773 }
 0x2dc   :  { %v3781_v49 = vunpack.i.h.bf16 %v3779_v47  ;;  %v3780_v50 = vunpack.i.l.bf16 %v3779_v47  ;;  %v3776_v51 = vunpack.i.h.bf16 %v3774_v48  ;;  %v3775_v52 = vunpack.i.l.bf16 %v3774_v48  ;;  %v636_v48 = vld [vmem:[#allocation3 + $0x8] sm:$0xff] }
 0x2de   :  { %v527_v53 = vpack.c.bf16 %v3776_v51, %v3775_v52  ;;  %v528_v57 = vpack.c.bf16 %v3781_v49, %v3780_v50  ;;  %v3971_v49 = vld [vmem:[%s6553_s30] sm:$0xff]   ;;  %v637_v52 = vld [vmem:[#allocation3 + $0x10] sm:$0xff] }
 0x2df   :  { %v3784_v54 = vpop.permute.xlu1 %3783  ;;  %v3789_v58 = vpop.permute.xlu0 %3788  ;;  %v635_v50 = vld [vmem:[#allocation3] sm:$0xff]  ;;  %3451 = vmatprep.mubr.msk.bf16.mxu1 %vm842_vm13, %v3971_v49  ;;  %v638_v51 = vld [vmem:[#allocation3 + $0x18] sm:$0xff] }
 0x2e0   :  { %v3786_v55 = vunpack.i.h.bf16 %v3784_v54  ;;  %v3785_v56 = vunpack.i.l.bf16 %v3784_v54  ;;  %3423 = vmatprep.subr.bf16.mxu0 %v527_v53  ;;  %v3791_v59 = vunpack.i.h.bf16 %v3789_v58  ;;  %v3790_v60 = vunpack.i.l.bf16 %v3789_v58  ;;  %v639_v54 = vld [vmem:[#allocation3 + $0x20] sm:$0xff] }
 0x2e1   :  { %3424 = vmatpush3.bf16.msra.mxu0 %v527_v53  ;;  %v640_v53 = vld [vmem:[#allocation3 + $0x28] sm:$0xff]  ;;  %v643_v58 = vld [vmem:[#allocation3 + $0x40] sm:$0xff] }
 0x2e2   :  { %3425 = vmatprep.subr.bf16.mxu0 %v528_v57  ;;  %v529_v61 = vpack.c.bf16 %v3786_v55, %v3785_v56  ;;  %v530_v1 = vpack.c.bf16 %v3791_v59, %v3790_v60  ;;  %v642_v55 = vld [vmem:[#allocation3 + $0x38] sm:$0xff]  ;;  %v641_v56 = vld [vmem:[#allocation3 + $0x30] sm:$0xff] }
 0x2e3   :  { %v3794_v62 = vpop.permute.xlu1 %3793  ;;  %v3799_v2 = vpop.permute.xlu0 %3798  ;;  %v646_v59 = vld [vmem:[#allocation3 + $0x58] sm:$0xff]  ;;  %v645_v60 = vld [vmem:[#allocation3 + $0x50] sm:$0xff] }
 0x2e4   :  { %v3796_v63 = vunpack.i.h.bf16 %v3794_v62  ;;  %v3795_v0 = vunpack.i.l.bf16 %v3794_v62  ;;  %v3801_v3 = vunpack.i.h.bf16 %v3799_v2  ;;  %v3800_v4 = vunpack.i.l.bf16 %v3799_v2  ;;  %v647_v62 = vld [vmem:[#allocation3 + $0x60] sm:$0xff] }
 0x2e5   :  { %3426 = vmatpush3.bf16.msra.mxu0 %v528_v57  ;;  %v644_v57 = vld [vmem:[#allocation3 + $0x48] sm:$0xff] }
 0x2e6   :  { %3427 = vmatprep.subr.bf16.mxu0 %v529_v61  ;;  %v531_v5 = vpack.c.bf16 %v3796_v63, %v3795_v0  ;;  %v532_v6 = vpack.c.bf16 %v3801_v3, %v3800_v4  ;;  %v650_v63 = vld [vmem:[#allocation3 + $0x78] sm:$0xff]  ;;  %v649_v0 = vld [vmem:[#allocation3 + $0x70] sm:$0xff] }
 0x2e9   :  { %3428 = vmatpush3.bf16.msra.mxu0 %v529_v61  ;;  %v648_v61 = vld [vmem:[#allocation3 + $0x68] sm:$0xff] }
 0x2ea   :  { %3429 = vmatprep.subr.bf16.mxu0 %v530_v1 }
 0x2ed   :  { %3430 = vmatpush3.bf16.msra.mxu0 %v530_v1 }
 0x2ee   :  { %3431 = vmatprep.subr.bf16.mxu0 %v531_v5 }
 0x2f1   :  { %3432 = vmatpush3.bf16.msra.mxu0 %v531_v5 }
 0x2f2   :  { %3433 = vmatprep.subr.bf16.mxu0 %v532_v6 }
 0x2f4   :  { %v536_v8 = vpop.permute.xlu1 %535  ;;  %v541_v13 = vpop.permute.xlu0 %540 }
 0x2f5   :  { %3434 = vmatpush3.bf16.msra.mxu0 %v532_v6 }
 0x2f8   :  { %3436 = vmatmul.mubr.msk.bf16.vlgmr.msra.gmra.mrb[0].mxu0 %vm563_vm6, %v3970_v7  ;;  %v546_v9 = vpop.permute.xlu1 %545  ;;  %vm1491_vm6 = vcmask 130048  }
 0x2fc   :  { %v551_v14 = vpop.permute.xlu1 %550 }
 0x3cb   :  { %v3437_v10 = vpop.f32.mrb[0].mxu0 }
 0x3cc   :  { %v613_v11 = vadd.f32 %v3437_v10, %v546_v9  ;;  %v604_v12 = vpop.f32.mrb[1].mxu0 }
 0x3cd   :  { %v605_v15 = vadd.f32 %v604_v12, %v536_v8  ;;  %v3438_v16 = vpop.f32.mrb[2].mxu0 }
 0x3ce   :  { %v657_v17 = vmul.f32 0.2, %v613_v11  ;;  %v616_v18 = vadd.f32 %v3438_v16, %v551_v14  ;;  %v607_v19 = vpop.f32.mrb[3].mxu0  ;;  %vm653_vm7 = vcmp.ge.f32.partialorder %v613_v11, 0.0 }
 0x3cf   :  { %v655_v20 = vmul.f32 0.2, %v605_v15  ;;  %v608_v21 = vadd.f32 %v607_v19, %v541_v13  ;;  %vm651_vm8 = vcmp.ge.f32.partialorder %v605_v15, 0.0  ;;  %v3974_v19 = vld [vmem:[%s6553_s30 + $0x18] sm:$0xff]  }
 0x3d0   :  { %vm654_vm9 = vcmp.ge.f32.partialorder %v616_v18, 0.0  ;;  %v658_v22 = vmul.f32 0.2, %v616_v18  ;;  %v661_v24 = vsel %vm653_vm7, %v613_v11, %v657_v17  ;;  %v3972_v17 = vld [vmem:[%s6553_s30 + $0x8] sm:$0xff]   ;;  %vm1494_vm7 = vcmask 195584  }
 0x3d1   :  { %vm652_vm10 = vcmp.ge.f32.partialorder %v608_v21, 0.0  ;;  %v656_v23 = vmul.f32 0.2, %v608_v21  ;;  %v659_v27 = vsel %vm651_vm8, %v605_v15, %v655_v20  ;;  %v3975_v20 = vld [vmem:[%s6553_s30 + $0x20] sm:$0xff]   ;;  %vm6471_vm8 = vcmask 261120  }
 0x3d2   :  { %v662_v25 = vsel %vm654_vm9, %v616_v18, %v658_v22  ;;  %v3973_v18 = vld [vmem:[%s6553_s30 + $0x10] sm:$0xff]   ;;  %vm6470_vm9 = vcmask 326656  }
 0x3d3   :  { %v3809_v26 = vpack.i.bf16 %v662_v25, %v661_v24  ;;  %v660_v28 = vsel %vm652_vm10, %v608_v21, %v656_v23  ;;  %v3976_v21 = vld [vmem:[%s6553_s30 + $0x28] sm:$0xff]   ;;  %v3977_v22 = vld [vmem:[%s6553_s30 + $0x30] sm:$0xff]   ;;  %v3978_v23 = vld [vmem:[%s6553_s30 + $0x38] sm:$0xff]   ;;  %vm1503_vm10 = vcmask 392192   ;;  %s4602_s30 = smov 88  }
 0x3d4   :  { %v3804_v29 = vpack.i.bf16 %v660_v28, %v659_v27 }
 0x3d5   :  { %3810 = vrot.lane.b32.xlu1 %v3809_v26, %s6484_s0 }
 0x3d6   :  { %3805 = vrot.lane.b32.xlu0 %v3804_v29, %s6484_s0 }
 0x447   :  { %v3811_v30 = vpop.permute.xlu1 %3810 }
 0x448   :  { %v3813_v31 = vunpack.i.h.bf16 %v3811_v30  ;;  %v3812_v32 = vunpack.i.l.bf16 %v3811_v30  ;;  %v3806_v33 = vpop.permute.xlu0 %3805 }
 0x449   :  { %v3808_v34 = vunpack.i.h.bf16 %v3806_v33  ;;  %v3807_v35 = vunpack.i.l.bf16 %v3806_v33 }
 0x44a   :  { %v682_v36 = vsel %vm470_vm0, 0.0, %v3813_v31  ;;  %v681_v37 = vsel %vm470_vm0, 0.0, %v3812_v32 }
 0x44b   :  { %v686_v38 = vsel %vm683_vm11, %v681_v37, 0.0  ;;  %v687_v39 = vsel %vm683_vm11, %v682_v36, 0.0  ;;  %v679_v40 = vsel %vm470_vm0, 0.0, %v3807_v35  ;;  %v680_v42 = vsel %vm470_vm0, 0.0, %v3808_v34 }
 0x44c   :  { %v3819_v41 = vpack.i.bf16 %v687_v39, %v686_v38  ;;  %v684_v43 = vsel %vm683_vm11, %v679_v40, 0.0  ;;  %v685_v44 = vsel %vm683_vm11, %v680_v42, 0.0  ;;  %v3322_v45 = vpack.c.bf16 %v680_v42, %v679_v40 }
 0x44d   :  { %v3814_v46 = vpack.i.bf16 %v685_v44, %v684_v43  ;;  %v3325_v47 = vpack.c.bf16 %v682_v36, %v681_v37  ;;  %vm6469_vm11 = vcmask 457728  }
 0x44e   :  { %3820 = vrot.lane.b32.xlu1 %v3819_v41, %s4581_s20  ;;  %3439 = vmatprep.subr.msk.bf16.mxu1 %vm3321_vm12, %v3322_v45 }
 0x44f   :  { %3440 = vmatpush3.bf16.msk.msra.mxu1 %vm3321_vm12, %v3322_v45  ;;  %3815 = vrot.lane.b32.xlu0 %v3814_v46, %s4581_s20 }
 0x450   :  { %3441 = vmatprep.subr.msk.bf16.mxu1 %vm3321_vm12, %v3325_v47 }
 0x452   :  { %3830 = vrot.lane.b32.xlu1 %v3819_v41, %s6508_s10 }
 0x453   :  { %3442 = vmatpush3.bf16.msk.msra.mxu1 %vm3321_vm12, %v3325_v47  ;;  %3825 = vrot.lane.b32.xlu0 %v3814_v46, %s6508_s10 }
 0x456   :  { %729 = vperm.xlu1 %3802, %v636_v48  }
 0x457   :  { %724 = vperm.xlu0 %3803, %v635_v50  }
 0x45a   :  { %739 = vperm.xlu1 %3802, %v638_v51  }
 0x45b   :  { %734 = vperm.xlu0 %3803, %v637_v52  }
 0x45e   :  { %749 = vperm.xlu1 %3802, %v640_v53  }
 0x45f   :  { %744 = vperm.xlu0 %3803, %v639_v54  }
 0x462   :  { %759 = vperm.xlu1 %3802, %v642_v55  }
 0x463   :  { %754 = vperm.xlu0 %3803, %v641_v56  }
 0x466   :  { %769 = vperm.xlu1 %3802, %v644_v57  }
 0x467   :  { %764 = vperm.xlu0 %3803, %v643_v58  }
 0x46a   :  { %779 = vperm.xlu1 %3802, %v646_v59  }
 0x46b   :  { %774 = vperm.xlu0 %3803, %v645_v60  }
 0x46e   :  { %789 = vperm.xlu1 %3802, %v648_v61  }
 0x46f   :  { %784 = vperm.xlu0 %3803, %v647_v62  }
 0x472   :  { %799 = vperm.xlu1 %3802, %v650_v63  }
 0x473   :  { %794 = vperm.xlu0 %3803, %v649_v0  }
 0x4c0   :  { %v3821_v1 = vpop.permute.xlu1 %3820 }
 0x4c1   :  { %v3816_v2 = vpop.permute.xlu0 %3815  ;;  %v3823_v3 = vunpack.i.h.bf16 %v3821_v1  ;;  %v3822_v4 = vunpack.i.l.bf16 %v3821_v1 }
 0x4c2   :  { %v3818_v5 = vunpack.i.h.bf16 %v3816_v2  ;;  %v3817_v6 = vunpack.i.l.bf16 %v3816_v2 }
 0x4c3   :  { %v719_v11 = vpack.c.bf16 %v3823_v3, %v3822_v4 }
 0x4c4   :  { %v718_v7 = vpack.c.bf16 %v3818_v5, %v3817_v6  ;;  %v3831_v12 = vpop.permute.xlu1 %3830 }
 0x4c5   :  { %v3826_v8 = vpop.permute.xlu0 %3825  ;;  %v3833_v13 = vunpack.i.h.bf16 %v3831_v12  ;;  %v3832_v14 = vunpack.i.l.bf16 %v3831_v12 }
 0x4c6   :  { %v3828_v9 = vunpack.i.h.bf16 %v3826_v8  ;;  %v3827_v10 = vunpack.i.l.bf16 %v3826_v8  ;;  %3443 = vmatprep.subr.bf16.mxu1 %v718_v7 }
 0x4c7   :  { %3444 = vmatpush3.bf16.msra.mxu1 %v718_v7  ;;  %v721_v16 = vpack.c.bf16 %v3833_v13, %v3832_v14 }
 0x4c8   :  { %3445 = vmatprep.subr.bf16.mxu1 %v719_v11  ;;  %v720_v15 = vpack.c.bf16 %v3828_v9, %v3827_v10 }
 0x4cb   :  { %3446 = vmatpush3.bf16.msra.mxu1 %v719_v11 }
 0x4cc   :  { %3447 = vmatprep.subr.bf16.mxu1 %v720_v15 }
 0x4cf   :  { %3448 = vmatpush3.bf16.msra.mxu1 %v720_v15 }
 0x4d0   :  { %3449 = vmatprep.subr.bf16.mxu1 %v721_v16 }
 0x4d3   :  { %3450 = vmatpush3.bf16.msra.mxu1 %v721_v16 }
 0x4d5   :  { %v730_v25 = vpop.permute.xlu1 %729 }
 0x4d6   :  { %3452 = vmatmul.mubr.msk.bf16.vlgmr.msra.gmra.mrb[0].mxu1 %vm842_vm13, %v3972_v17  ;;  %v725_v24 = vpop.permute.xlu0 %724 }
 0x4d7   :  { %3455 = vmatprep.mubr.msk.bf16.mxu1 %vm842_vm13, %v3973_v18 }
 0x4d9   :  { %v740_v30 = vpop.permute.xlu1 %739 }
 0x4da   :  { %v735_v26 = vpop.permute.xlu0 %734 }
 0x4dd   :  { %v750_v49 = vpop.permute.xlu1 %749 }
 0x4de   :  { %3456 = vmatmul.mubr.msk.bf16.gmra.mrb[4].mxu1 %vm842_vm13, %v3974_v19  ;;  %v745_v48 = vpop.permute.xlu0 %744 }
 0x4df   :  { %3459 = vmatprep.mubr.msk.bf16.mxu1 %vm842_vm13, %v3975_v20 }
 0x4e1   :  { %v760_v52 = vpop.permute.xlu1 %759 }
 0x4e2   :  { %v755_v50 = vpop.permute.xlu0 %754 }
 0x4e5   :  { %v770_v57 = vpop.permute.xlu1 %769 }
 0x4e6   :  { %3460 = vmatmul.mubr.msk.bf16.gmra.mrb[8].mxu1 %vm842_vm13, %v3976_v21  ;;  %v765_v56 = vpop.permute.xlu0 %764 }
 0x4e7   :  { %3463 = vmatprep.mubr.msk.bf16.mxu1 %vm842_vm13, %v3977_v22 }
 0x4e9   :  { %v780_v60 = vpop.permute.xlu1 %779 }
 0x4ea   :  { %v775_v58 = vpop.permute.xlu0 %774 }
 0x4ed   :  { %v5145_v63 = vpop.permute.xlu1 %789 }
 0x4ee   :  { %3464 = vmatmul.mubr.msk.bf16.gmra.mrb[12].mxu1 %vm842_vm13, %v3978_v23  ;;  %v5141_v62 = vpop.permute.xlu0 %784 }
 0x4f1   :  { %v800_v1 = vpop.permute.xlu1 %799 }
 0x4f2   :  { %v795_v0 = vpop.permute.xlu0 %794 }
 0x5a9   :  { %v3453_v27 = vpop.f32.mrb[0].mxu1 }
 0x5aa   :  { %v4999_v28 = vadd.f32 %v3453_v27, %v735_v26  ;;  %v901_v29 = vpop.f32.mrb[1].mxu1 }
 0x5ab   :  { %v3454_v31 = vpop.f32.mrb[2].mxu1  ;;  %v5035_v43 = vadd.f32 %v901_v29, %v725_v24 }
 0x5ac   :  { %v5001_v32 = vadd.f32 %v3454_v31, %v740_v30  ;;  %1102 = vrot.lane.b32.xlu0 %v4999_v28, %s4581_s20  ;;  %v904_v33 = vpop.f32.mrb[3].mxu1 }
 0x5ad   :  { %6554 = vst [vmem:[#allocation68_spill] sm:$0xff] %v5035_v43  ;;  %v5043_v46 = vadd.f32 %v904_v33, %v730_v25 }
 0x5ae   :  { %1104 = vrot.lane.b32.xlu1 %v5001_v32, %s4581_s20 }
 0x5af   :  { %6555 = vst [vmem:[#allocation69_spill] sm:$0xff] %v5043_v46 }
 0x5b0   :  { %1158 = vrot.lane.b32.xlu0 %v4999_v28, %s6508_s10 }
 0x5b1   :  { %v3457_v34 = vpop.f32.mrb[4].mxu1 }
 0x5b2   :  { %1160 = vrot.lane.b32.xlu1 %v5001_v32, %s6508_s10  ;;  %v917_v35 = vpop.f32.mrb[5].mxu1  ;;  %v5073_v51 = vadd.f32 %v3457_v34, %v755_v50 }
 0x5b3   :  { %v3458_v36 = vpop.f32.mrb[6].mxu1  ;;  %v5101_v54 = vadd.f32 %v917_v35, %v745_v48 }
 0x5b4   :  { %1214 = vrot.lane.b32.xlu0 %v4999_v28, %s6519_s24  ;;  %v920_v37 = vpop.f32.mrb[7].mxu1  ;;  %v5077_v53 = vadd.f32 %v3458_v36, %v760_v52 }
 0x5b5   :  { %v5105_v55 = vadd.f32 %v920_v37, %v750_v49 }
 0x5b6   :  { %1216 = vrot.lane.b32.xlu1 %v5001_v32, %s6519_s24 }
 0x5b8   :  { %1270 = vrot.lane.b32.xlu0 %v4999_v28, %s6515_s16 }
 0x5b9   :  { %v5017_v38 = vpop.f32.mrb[8].mxu1 }
 0x5ba   :  { %1272 = vrot.lane.b32.xlu1 %v5001_v32, %s6515_s16  ;;  %v5021_v39 = vpop.f32.mrb[9].mxu1  ;;  %v5130_v59 = vadd.f32 %v5017_v38, %v775_v58 }
 0x5bb   :  { %v5023_v40 = vpop.f32.mrb[10].mxu1  ;;  %v5172_v6 = vadd.f32 %v5021_v39, %v765_v56 }
 0x5bc   :  { %1326 = vrot.lane.b32.xlu0 %v4999_v28, %s4589_s3  ;;  %v5027_v41 = vpop.f32.mrb[11].mxu1  ;;  %6556 = vst [vmem:[#allocation70_spill] sm:$0xff] %v5130_v59  ;;  %v5135_v61 = vadd.f32 %v5023_v40, %v780_v60 }
 0x5bd   :  { %6558 = vst [vmem:[#allocation72_spill] sm:$0xff] %v5172_v6  ;;  %v5179_v8 = vadd.f32 %v5027_v41, %v770_v57 }
 0x5be   :  { %1328 = vrot.lane.b32.xlu1 %v5001_v32, %s4589_s3  ;;  %6557 = vst [vmem:[#allocation71_spill] sm:$0xff] %v5135_v61 }
 0x5bf   :  { %6559 = vst [vmem:[#allocation73_spill] sm:$0xff] %v5179_v8 }
 0x5c0   :  { %1382 = vrot.lane.b32.xlu0 %v4999_v28, %s4588_s18 }
 0x5c1   :  { %v5033_v42 = vpop.f32.mrb[12].mxu1 }
 0x5c2   :  { %1384 = vrot.lane.b32.xlu1 %v5001_v32, %s4588_s18  ;;  %v5039_v44 = vpop.f32.mrb[13].mxu1  ;;  %v5226_v20 = vadd.f32 %v5033_v42, %v795_v0 }
 0x5c3   :  { %v5041_v45 = vpop.f32.mrb[14].mxu1  ;;  %v5281_v36 = vadd.f32 %v5039_v44, %v5141_v62 }
 0x5c4   :  { %v5045_v47 = vpop.f32.mrb[15].mxu1  ;;  %1040 = vrot.lane.b32.xlu0 %v5035_v43, %s4581_s20  ;;  %6564 = vst [vmem:[#allocation78_spill] sm:$0xff] %v5226_v20  ;;  %v5233_v22 = vadd.f32 %v5041_v45, %v800_v1 }
 0x5c5   :  { %v5289_v38 = vadd.f32 %v5045_v47, %v5145_v63 }
 0x5c6   :  { %1042 = vrot.lane.b32.xlu1 %v5043_v46, %s4581_s20  ;;  %6565 = vst [vmem:[#allocation79_spill] sm:$0xff] %v5233_v22 }
 0x5c8   :  { %1096 = vrot.lane.b32.xlu0 %v5035_v43, %s6508_s10 }
 0x5ca   :  { %1098 = vrot.lane.b32.xlu1 %v5043_v46, %s6508_s10 }
 0x5cc   :  { %1152 = vrot.lane.b32.xlu0 %v5035_v43, %s6519_s24 }
 0x5ce   :  { %1154 = vrot.lane.b32.xlu1 %v5043_v46, %s6519_s24 }
 0x5d0   :  { %1208 = vrot.lane.b32.xlu0 %v5035_v43, %s6515_s16 }
 0x5d2   :  { %1210 = vrot.lane.b32.xlu1 %v5043_v46, %s6515_s16 }
 0x5d4   :  { %1264 = vrot.lane.b32.xlu0 %v5035_v43, %s4589_s3 }
 0x5d6   :  { %1266 = vrot.lane.b32.xlu1 %v5043_v46, %s4589_s3 }
 0x5d8   :  { %1320 = vrot.lane.b32.xlu0 %v5035_v43, %s4588_s18 }
 0x5da   :  { %1322 = vrot.lane.b32.xlu1 %v5043_v46, %s4588_s18 }
 0x5dc   :  { %1376 = vrot.lane.b32.xlu0 %v5035_v43, %s6506_s19 }
 0x5de   :  { %1378 = vrot.lane.b32.xlu1 %v5043_v46, %s6506_s19 }
 0x5e0   :  { %1052 = vrot.lane.b32.xlu0 %v5073_v51, %s6482_s22 }
 0x5e2   :  { %1054 = vrot.lane.b32.xlu1 %v5077_v53, %s6482_s22 }
 0x5e4   :  { %1108 = vrot.lane.b32.xlu0 %v5073_v51, %s6484_s0 }
 0x5e6   :  { %1110 = vrot.lane.b32.xlu1 %v5077_v53, %s6484_s0 }
 0x5e8   :  { %1226 = vrot.lane.b32.xlu0 %v5073_v51, %s4581_s20 }
 0x5ea   :  { %1228 = vrot.lane.b32.xlu1 %v5077_v53, %s4581_s20 }
 0x5ec   :  { %1282 = vrot.lane.b32.xlu0 %v5073_v51, %s6508_s10 }
 0x5ee   :  { %1284 = vrot.lane.b32.xlu1 %v5077_v53, %s6508_s10 }
 0x5f0   :  { %1338 = vrot.lane.b32.xlu0 %v5073_v51, %s6519_s24 }
 0x5f2   :  { %1340 = vrot.lane.b32.xlu1 %v5077_v53, %s6519_s24 }
 0x5f4   :  { %1394 = vrot.lane.b32.xlu0 %v5073_v51, %s6515_s16 }
 0x5f6   :  { %1396 = vrot.lane.b32.xlu1 %v5077_v53, %s6515_s16 }
 0x5f8   :  { %1046 = vrot.lane.b32.xlu0 %v5101_v54, %s6484_s0 }
 0x5fa   :  { %1048 = vrot.lane.b32.xlu1 %v5105_v55, %s6484_s0 }
 0x5fc   :  { %1164 = vrot.lane.b32.xlu0 %v5101_v54, %s4581_s20 }
 0x5fe   :  { %1166 = vrot.lane.b32.xlu1 %v5105_v55, %s4581_s20 }
 0x600   :  { %1220 = vrot.lane.b32.xlu0 %v5101_v54, %s6508_s10 }
 0x602   :  { %1222 = vrot.lane.b32.xlu1 %v5105_v55, %s6508_s10 }
 0x604   :  { %1276 = vrot.lane.b32.xlu0 %v5101_v54, %s6519_s24 }
 0x606   :  { %1278 = vrot.lane.b32.xlu1 %v5105_v55, %s6519_s24 }
 0x608   :  { %1332 = vrot.lane.b32.xlu0 %v5101_v54, %s6515_s16 }
 0x60a   :  { %1334 = vrot.lane.b32.xlu1 %v5105_v55, %s6515_s16 }
 0x60c   :  { %1388 = vrot.lane.b32.xlu0 %v5101_v54, %s4589_s3 }
 0x60e   :  { %1390 = vrot.lane.b32.xlu1 %v5105_v55, %s4589_s3 }
 0x610   :  { %1064 = vrot.lane.b32.xlu0 %v5130_v59, %s6479_s15 }
 0x612   :  { %1066 = vrot.lane.b32.xlu1 %v5135_v61, %s6479_s15 }
 0x614   :  { %1120 = vrot.lane.b32.xlu0 %v5130_v59, %s6480_s8 }
 0x616   :  { %1122 = vrot.lane.b32.xlu1 %v5135_v61, %s6480_s8 }
 0x618   :  { %1176 = vrot.lane.b32.xlu0 %v5130_v59, %s6482_s22 }
 0x61a   :  { %1178 = vrot.lane.b32.xlu1 %v5135_v61, %s6482_s22 }
 0x61c   :  { %1232 = vrot.lane.b32.xlu0 %v5130_v59, %s6484_s0 }
 0x61e   :  { %v5155_v2 = vpop.permute.xlu0 %1102  ;;  %1234 = vrot.lane.b32.xlu1 %v5135_v61, %s6484_s0 }
 0x620   :  { %v5159_v3 = vpop.permute.xlu1 %1104  ;;  %1350 = vrot.lane.b32.xlu0 %v5130_v59, %s4581_s20 }
 0x622   :  { %v5163_v4 = vpop.permute.xlu0 %1158  ;;  %1352 = vrot.lane.b32.xlu1 %v5135_v61, %s4581_s20 }
 0x624   :  { %v5167_v5 = vpop.permute.xlu1 %1160  ;;  %1406 = vrot.lane.b32.xlu0 %v5130_v59, %s6508_s10 }
 0x626   :  { %v5174_v7 = vpop.permute.xlu0 %1214  ;;  %1408 = vrot.lane.b32.xlu1 %v5135_v61, %s6508_s10 }
 0x628   :  { %v5181_v9 = vpop.permute.xlu1 %1216  ;;  %1058 = vrot.lane.b32.xlu0 %v5172_v6, %s6480_s8 }
 0x62a   :  { %v5185_v10 = vpop.permute.xlu0 %1270  ;;  %1060 = vrot.lane.b32.xlu1 %v5179_v8, %s6480_s8 }
 0x62b   :  { %6560 = vst [vmem:[#allocation74_spill] sm:$0xff] %v5185_v10 }
 0x62c   :  { %v5189_v11 = vpop.permute.xlu1 %1272  ;;  %1114 = vrot.lane.b32.xlu0 %v5172_v6, %s6482_s22 }
 0x62d   :  { %6561 = vst [vmem:[#allocation75_spill] sm:$0xff] %v5189_v11 }
 0x62e   :  { %v5193_v12 = vpop.permute.xlu0 %1326  ;;  %1116 = vrot.lane.b32.xlu1 %v5179_v8, %s6482_s22 }
 0x630   :  { %v5197_v13 = vpop.permute.xlu1 %1328  ;;  %1170 = vrot.lane.b32.xlu0 %v5172_v6, %s6484_s0 }
 0x632   :  { %v5201_v14 = vpop.permute.xlu0 %1382  ;;  %1172 = vrot.lane.b32.xlu1 %v5179_v8, %s6484_s0 }
 0x633   :  { %6562 = vst [vmem:[#allocation76_spill] sm:$0xff] %v5201_v14 }
 0x634   :  { %v5205_v15 = vpop.permute.xlu1 %1384  ;;  %1288 = vrot.lane.b32.xlu0 %v5172_v6, %s4581_s20 }
 0x635   :  { %6563 = vst [vmem:[#allocation77_spill] sm:$0xff] %v5205_v15 }
 0x636   :  { %1290 = vrot.lane.b32.xlu1 %v5179_v8, %s4581_s20  ;;  %v5211_v16 = vpop.permute.xlu0 %1040 }
 0x638   :  { %v5213_v17 = vpop.permute.xlu1 %1042  ;;  %1344 = vrot.lane.b32.xlu0 %v5172_v6, %s6508_s10 }
 0x63a   :  { %1346 = vrot.lane.b32.xlu1 %v5179_v8, %s6508_s10  ;;  %v5219_v18 = vpop.permute.xlu0 %1096 }
 0x63c   :  { %v5221_v19 = vpop.permute.xlu1 %1098  ;;  %1400 = vrot.lane.b32.xlu0 %v5172_v6, %s6519_s24 }
 0x63e   :  { %1402 = vrot.lane.b32.xlu1 %v5179_v8, %s6519_s24  ;;  %v5230_v21 = vpop.permute.xlu0 %1152 }
 0x640   :  { %v5235_v23 = vpop.permute.xlu1 %1154  ;;  %1076 = vrot.lane.b32.xlu0 %v5226_v20, %s4593_s13 }
 0x642   :  { %1078 = vrot.lane.b32.xlu1 %v5233_v22, %s4593_s13  ;;  %v5241_v24 = vpop.permute.xlu0 %1208 }
 0x644   :  { %v5243_v25 = vpop.permute.xlu1 %1210  ;;  %1132 = vrot.lane.b32.xlu0 %v5226_v20, %s6476_s7 }
 0x646   :  { %1134 = vrot.lane.b32.xlu1 %v5233_v22, %s6476_s7  ;;  %v5249_v26 = vpop.permute.xlu0 %1264 }
 0x647   :  { %6566 = vst [vmem:[#allocation80_spill] sm:$0xff] %v5249_v26 }
 0x648   :  { %v5251_v27 = vpop.permute.xlu1 %1266  ;;  %1188 = vrot.lane.b32.xlu0 %v5226_v20, %s6479_s15 }
 0x649   :  { %6567 = vst [vmem:[#allocation81_spill] sm:$0xff] %v5251_v27 }
 0x64a   :  { %1190 = vrot.lane.b32.xlu1 %v5233_v22, %s6479_s15  ;;  %v5257_v29 = vpop.permute.xlu0 %1320 }
 0x64c   :  { %v5259_v30 = vpop.permute.xlu1 %1322  ;;  %1244 = vrot.lane.b32.xlu0 %v5226_v20, %s6480_s8 }
 0x64e   :  { %1246 = vrot.lane.b32.xlu1 %v5233_v22, %s6480_s8  ;;  %v5265_v31 = vpop.permute.xlu0 %1376 }
 0x64f   :  { %6568 = vst [vmem:[#allocation82_spill] sm:$0xff] %v5265_v31 }
 0x650   :  { %v5267_v33 = vpop.permute.xlu1 %1378  ;;  %1300 = vrot.lane.b32.xlu0 %v5226_v20, %s6482_s22 }
 0x651   :  { %6569 = vst [vmem:[#allocation83_spill] sm:$0xff] %v5267_v33 }
 0x652   :  { %1302 = vrot.lane.b32.xlu1 %v5233_v22, %s6482_s22  ;;  %v5273_v34 = vpop.permute.xlu0 %1052 }
 0x654   :  { %v5275_v35 = vpop.permute.xlu1 %1054  ;;  %1356 = vrot.lane.b32.xlu0 %v5226_v20, %s6484_s0 }
 0x656   :  { %1358 = vrot.lane.b32.xlu1 %v5233_v22, %s6484_s0  ;;  %v5285_v37 = vpop.permute.xlu0 %1108 }
 0x658   :  { %v5291_v39 = vpop.permute.xlu1 %1110  ;;  %1070 = vrot.lane.b32.xlu0 %v5281_v36, %s6476_s7 }
 0x65a   :  { %1072 = vrot.lane.b32.xlu1 %v5289_v38, %s6476_s7  ;;  %v5297_v40 = vpop.permute.xlu0 %1226 }
 0x65b   :  { %6570 = vst [vmem:[#allocation84_spill] sm:$0xff] %v5297_v40 }
 0x65c   :  { %v5299_v41 = vpop.permute.xlu1 %1228  ;;  %1126 = vrot.lane.b32.xlu0 %v5281_v36, %s6479_s15 }
 0x65d   :  { %6571 = vst [vmem:[#allocation85_spill] sm:$0xff] %v5299_v41 }
 0x65e   :  { %1128 = vrot.lane.b32.xlu1 %v5289_v38, %s6479_s15  ;;  %v5305_v42 = vpop.permute.xlu0 %1282 }
 0x65f   :  { %6572 = vst [vmem:[#allocation86_spill] sm:$0xff] %v5305_v42 }
 0x660   :  { %v5307_v44 = vpop.permute.xlu1 %1284  ;;  %1182 = vrot.lane.b32.xlu0 %v5281_v36, %s6480_s8 }
 0x661   :  { %6573 = vst [vmem:[#allocation87_spill] sm:$0xff] %v5307_v44 }
 0x662   :  { %1184 = vrot.lane.b32.xlu1 %v5289_v38, %s6480_s8  ;;  %v5313_v45 = vpop.permute.xlu0 %1338 }
 0x664   :  { %v5315_v47 = vpop.permute.xlu1 %1340  ;;  %1238 = vrot.lane.b32.xlu0 %v5281_v36, %s6482_s22 }
 0x666   :  { %1240 = vrot.lane.b32.xlu1 %v5289_v38, %s6482_s22  ;;  %v5321_v48 = vpop.permute.xlu0 %1394 }
 0x667   :  { %6574 = vst [vmem:[#allocation88_spill] sm:$0xff] %v5321_v48 }
 0x668   :  { %v5323_v49 = vpop.permute.xlu1 %1396  ;;  %1294 = vrot.lane.b32.xlu0 %v5281_v36, %s6484_s0 }
 0x669   :  { %6575 = vst [vmem:[#allocation89_spill] sm:$0xff] %v5323_v49 }
 0x66a   :  { %1296 = vrot.lane.b32.xlu1 %v5289_v38, %s6484_s0  ;;  %v5329_v50 = vpop.permute.xlu0 %1046 }
 0x66c   :  { %v5331_v52 = vpop.permute.xlu1 %1048  ;;  %1412 = vrot.lane.b32.xlu0 %v5281_v36, %s4581_s20 }
 0x66e   :  { %1414 = vrot.lane.b32.xlu1 %v5289_v38, %s4581_s20  ;;  %v5337_v56 = vpop.permute.xlu0 %1164 }
 0x670   :  { %v5339_v57 = vpop.permute.xlu1 %1166  ;;  %966 = vrot.lane.b32.xlu0 %v4999_v28, %s6484_s0 }
 0x672   :  { %968 = vrot.lane.b32.xlu1 %v5001_v32, %s6484_s0  ;;  %v5345_v58 = vpop.permute.xlu0 %1220 }
 0x674   :  { %v5347_v60 = vpop.permute.xlu1 %1222  ;;  %974 = vrot.lane.b32.xlu0 %v5101_v54, %s6482_s22 }
 0x675   :  { %6576 = vst [vmem:[#allocation90_spill] sm:$0xff] %v5347_v60 }
 0x676   :  { %976 = vrot.lane.b32.xlu1 %v5105_v55, %s6482_s22  ;;  %v5353_v62 = vpop.permute.xlu0 %1276  ;;  %s4616_s22 = smov 68  }
 0x677   :  { %6577 = vst [vmem:[#allocation91_spill] sm:$0xff] %v5353_v62 }
 0x678   :  { %v5355_v63 = vpop.permute.xlu1 %1278  ;;  %982 = vrot.lane.b32.xlu0 %v5073_v51, %s6480_s8 }
 0x679   :  { %6578 = vst [vmem:[#allocation92_spill] sm:$0xff] %v5355_v63 }
 0x67a   :  { %984 = vrot.lane.b32.xlu1 %v5077_v53, %s6480_s8  ;;  %v1333_v0 = vpop.permute.xlu0 %1332 }
 0x67c   :  { %v1335_v1 = vpop.permute.xlu1 %1334  ;;  %990 = vrot.lane.b32.xlu0 %v5172_v6, %s6479_s15 }
 0x67e   :  { %992 = vrot.lane.b32.xlu1 %v5179_v8, %s6479_s15  ;;  %v5365_v46 = vpop.permute.xlu0 %1388  ;;  %s6504_s15 = smov 72  }
 0x67f   :  { %6579 = vst [vmem:[#allocation93_spill] sm:$0xff] %v5365_v46 }
 0x680   :  { %v5367_v43 = vpop.permute.xlu1 %1390  ;;  %998 = vrot.lane.b32.xlu0 %v5130_v59, %s6476_s7 }
 0x681   :  { %6580 = vst [vmem:[#allocation94_spill] sm:$0xff] %v5367_v43 }
 0x682   :  { %1000 = vrot.lane.b32.xlu1 %v5135_v61, %s6476_s7  ;;  %v5373_v49 = vpop.permute.xlu0 %1064 }
 0x684   :  { %v5375_v48 = vpop.permute.xlu1 %1066  ;;  %1006 = vrot.lane.b32.xlu0 %v5281_v36, %s4593_s13 }
 0x686   :  { %1016 = vrot.lane.b32.xlu1 %v5233_v22, %s6474_s4  ;;  %v5381_v44 = vpop.permute.xlu0 %1120 }
 0x688   :  { %v5383_v33 = vpop.permute.xlu1 %1122  ;;  %1014 = vrot.lane.b32.xlu0 %v5226_v20, %s6474_s4 }
 0x68a   :  { %1008 = vrot.lane.b32.xlu1 %v5289_v38, %s4593_s13  ;;  %v5389_v61 = vpop.permute.xlu0 %1176  ;;  %s4603_s13 = smov 92  }
 0x68b   :  { %6581 = vst [vmem:[#allocation95_spill] sm:$0xff] %v5389_v61 }
 0x68c   :  { %v5391_v59 = vpop.permute.xlu1 %1178 }
 0x68d   :  { %6582 = vst [vmem:[#allocation96_spill] sm:$0xff] %v5391_v59 }
 0x68e   :  { %v5393_v43 = vpop.permute.xlu0 %1232 }
 0x68f   :  { %6583 = vst [vmem:[#allocation97_spill] sm:$0xff] %v5393_v43 }
 0x690   :  { %v5395_v15 = vpop.permute.xlu1 %1234 }
 0x691   :  { %6584 = vst [vmem:[#allocation98_spill] sm:$0xff] %v5395_v15 }
 0x692   :  { %v1351_v8 = vpop.permute.xlu0 %1350 }
 0x694   :  { %v1353_v22 = vpop.permute.xlu1 %1352 }
 0x696   :  { %v5397_v46 = vpop.permute.xlu0 %1406 }
 0x697   :  { %6585 = vst [vmem:[#allocation99_spill] sm:$0xff] %v5397_v46 }
 0x698   :  { %v5399_v42 = vpop.permute.xlu1 %1408 }
 0x699   :  { %6586 = vst [vmem:[#allocation100_spill] sm:$0xff] %v5399_v42 }
 0x69a   :  { %v1059_v31 = vpop.permute.xlu0 %1058 }
 0x69c   :  { %v1061_v14 = vpop.permute.xlu1 %1060 }
 0x69e   :  { %v1115_v20 = vpop.permute.xlu0 %1114 }
 0x6a0   :  { %v5401_v6 = vpop.permute.xlu1 %1116 }
 0x6a2   :  { %v5403_v63 = vpop.permute.xlu0 %1170 }
 0x6a4   :  { %v5405_v41 = vpop.permute.xlu1 %1172 }
 0x6a5   :  { %6587 = vst [vmem:[#allocation101_spill] sm:$0xff] %v5405_v41 }
 0x6a6   :  { %v5407_v59 = vpop.permute.xlu0 %1288 }
 0x6a7   :  { %6588 = vst [vmem:[#allocation102_spill] sm:$0xff] %v5407_v59  ;;  %v1362_v59 = vsel %vm470_vm0, %v5257_v29, %v5193_v12  ;;  %v1082_v12 = vsel %vm470_vm0, %v5211_v16, %v4999_v28 }
 0x6a8   :  { %v5409_v43 = vpop.permute.xlu1 %1290  ;;  %v1084_v29 = vsel %vm473_vm1, %v1082_v12, %v5329_v50 }
 0x6a9   :  { %6589 = vst [vmem:[#allocation103_spill] sm:$0xff] %v5409_v43  ;;  %v1364_v43 = vsel %vm473_vm1, %v1362_v59, %v1333_v0 }
 0x6aa   :  { %v1345_v15 = vpop.permute.xlu0 %1344 }
 0x6ac   :  { %v1347_v27 = vpop.permute.xlu1 %1346  ;;  %v6595_v0 = vld [vmem:[#allocation101_spill] sm:$0xff] }
 0x6ae   :  { %v5411_v11 = vpop.permute.xlu0 %1400 }
 0x6af   :  { %6590 = vst [vmem:[#allocation104_spill] sm:$0xff] %v5411_v11 }
 0x6b0   :  { %v5413_v46 = vpop.permute.xlu1 %1402 }
 0x6b1   :  { %6591 = vst [vmem:[#allocation105_spill] sm:$0xff] %v5413_v46  ;;  %v1363_v46 = vsel %vm470_vm0, %v5259_v30, %v5197_v13 }
 0x6b2   :  { %v1077_v42 = vpop.permute.xlu0 %1076  ;;  %v1365_v11 = vsel %vm473_vm1, %v1363_v46, %v1335_v1 }
 0x6b3   :  { %v1367_v59 = vsel %vm476_vm2, %v1365_v11, %v5315_v47 }
 0x6b4   :  { %v5415_v62 = vpop.permute.xlu1 %1078  ;;  %v1369_v46 = vsel %vm1026_vm14, %v1367_v59, %v1347_v27 }
 0x6b5   :  { %v1371_v16 = vsel %vm1029_vm15, %v1369_v46, %v1353_v22  ;;  %v6599_v46 = vld [vmem:[#allocation95_spill] sm:$0xff] }
 0x6b6   :  { %v5417_v61 = vpop.permute.xlu0 %1132 }
 0x6b8   :  { %v5419_v40 = vpop.permute.xlu1 %1134 }
 0x6b9   :  { %6592 = vst [vmem:[#allocation106_spill] sm:$0xff] %v5419_v40 }
 0x6ba   :  { %v5421_v26 = vpop.permute.xlu0 %1188 }
 0x6bb   :  { %6593 = vst [vmem:[#allocation107_spill] sm:$0xff] %v5421_v26  ;;  %v1366_v26 = vsel %vm476_vm2, %v1364_v43, %v5313_v45 }
 0x6bc   :  { %v5427_v10 = vpop.permute.xlu1 %1190  ;;  %v1368_v40 = vsel %vm1026_vm14, %v1366_v26, %v1345_v15  ;;  %v1083_v15 = vsel %vm470_vm0, %v5213_v17, %v5001_v32  ;;  %v1138_v26 = vsel %vm470_vm0, %v5219_v18, %v5155_v2  ;;  %v1373_v2 = vsel %vm1032_vm3, %v1371_v16, %v5289_v38 }
 0x6bd   :  { %v1370_v43 = vsel %vm1029_vm15, %v1368_v40, %v1351_v8  ;;  %v1085_v28 = vsel %vm473_vm1, %v1083_v15, %v5331_v52  ;;  %v1086_v8 = vsel %vm476_vm2, %v1084_v29, %v5273_v34  ;;  %v1139_v40 = vsel %vm470_vm0, %v5221_v19, %v5159_v3 }
 0x6be   :  { %v5433_v41 = vpop.permute.xlu0 %1244  ;;  %v1372_v27 = vsel %vm1032_vm3, %v1370_v43, %v5281_v36  ;;  %v1088_v32 = vsel %vm1026_vm14, %v1086_v8, %v1059_v31  ;;  %v1087_v22 = vsel %vm476_vm2, %v1085_v28, %v5275_v35  ;;  %v1140_v34 = vsel %vm473_vm1, %v1138_v26, %v5101_v54  ;;  %v6601_v28 = vld [vmem:[#allocation91_spill] sm:$0xff] }
 0x6bf   :  { %v1089_v31 = vsel %vm1026_vm14, %v1087_v22, %v1061_v14  ;;  %v1194_v3 = vsel %vm470_vm0, %v5230_v21, %v5163_v4  ;;  %v1142_v19 = vsel %vm476_vm2, %v1140_v34, %v5285_v37  ;;  %v1090_v35 = vsel %vm1029_vm15, %v1088_v32, %v5373_v49  ;;  %v6602_v8 = vld [vmem:[#allocation75_spill] sm:$0xff]  ;;  %v6604_v32 = vld [vmem:[#allocation85_spill] sm:$0xff] }
 0x6c0   :  { %v5438_v60 = vpop.permute.xlu1 %1246  ;;  %v1141_v54 = vsel %vm473_vm1, %v1139_v40, %v5105_v55  ;;  %v1196_v14 = vsel %vm473_vm1, %v1194_v3, %v5337_v56  ;;  %v1144_v45 = vsel %vm1026_vm14, %v1142_v19, %v1115_v20  ;;  %v1195_v4 = vsel %vm470_vm0, %v5235_v23, %v5167_v5  ;;  %v6600_v43 = vld [vmem:[#allocation106_spill] sm:$0xff]  ;;  %v6605_v40 = vld [vmem:[#allocation96_spill] sm:$0xff] }
 0x6c1   :  { %v1143_v21 = vsel %vm476_vm2, %v1141_v54, %v5291_v39  ;;  %v1091_v37 = vsel %vm1029_vm15, %v1089_v31, %v5375_v48  ;;  %v1197_v50 = vsel %vm473_vm1, %v1195_v4, %v5339_v57  ;;  %v1250_v5 = vsel %vm470_vm0, %v5241_v24, %v5174_v7  ;;  %v6607_v31 = vld [vmem:[#allocation92_spill] sm:$0xff]  ;;  %v6610_v54 = vld [vmem:[#allocation82_spill] sm:$0xff] }
 0x6c2   :  { %v5446_v13 = vpop.permute.xlu0 %1300  ;;  %v1145_v20 = vsel %vm1026_vm14, %v1143_v21, %v5401_v6  ;;  %v1198_v23 = vsel %vm476_vm2, %v1196_v14, %v5073_v51  ;;  %v1146_v39 = vsel %vm1029_vm15, %v1144_v45, %v5381_v44  ;;  %v1252_v6 = vsel %vm473_vm1, %v1250_v5, %v5345_v58  ;;  %v6608_v3 = vld [vmem:[#allocation72_spill] sm:$0xff]  ;;  %v6611_v45 = vld [vmem:[#allocation97_spill] sm:$0xff]  ;;  %v6612_v4 = vld [vmem:[#allocation86_spill] sm:$0xff] }
 0x6c3   :  { %v1200_v56 = vsel %vm1026_vm14, %v1198_v23, %v5403_v63  ;;  %v1251_v51 = vsel %vm470_vm0, %v5243_v25, %v5181_v9  ;;  %v1199_v7 = vsel %vm476_vm2, %v1197_v50, %v5077_v53  ;;  %v1147_v24 = vsel %vm1029_vm15, %v1145_v20, %v5383_v33  ;;  %v6596_v9 = vld [vmem:[#allocation74_spill] sm:$0xff]  ;;  %v6597_v53 = vld [vmem:[#allocation80_spill] sm:$0xff]  ;;  %v6614_v20 = vld [vmem:[#allocation73_spill] sm:$0xff] }
 0x6c4   :  { %v5454_v11 = vpop.permute.xlu1 %1302  ;;  %v1201_v1 = vsel %vm1026_vm14, %v1199_v7, %v6595_v0  ;;  %v1306_v25 = vsel %vm470_vm0, %v6597_v53, %v6596_v9  ;;  %v6598_v33 = vld [vmem:[#allocation84_spill] sm:$0xff]  ;;  %v6615_v5 = vld [vmem:[#allocation102_spill] sm:$0xff] }
 0x6c5   :  { %v1254_v12 = vsel %vm476_vm2, %v1252_v6, %v6598_v33  ;;  %v1308_v16 = vsel %vm473_vm1, %v1306_v25, %v6601_v28  ;;  %v1203_v22 = vsel %vm1029_vm15, %v1201_v1, %v6605_v40  ;;  %v6622_v1 = vld [vmem:[#allocation88_spill] sm:$0xff]  ;;  %v6623_v9 = vld [vmem:[#allocation70_spill] sm:$0xff] }
 0x6c6   :  { %v1357_v30 = vpop.permute.xlu0 %1356  ;;  %v1256_v19 = vsel %vm1026_vm14, %v1254_v12, %v6608_v3  ;;  %v1310_v21 = vsel %vm476_vm2, %v1308_v16, %v6612_v4  ;;  %v6624_v33 = vld [vmem:[#allocation104_spill] sm:$0xff] }
 0x6c7   :  { %v1374_v17 = vsel %vm1035_vm4, %v1372_v27, %v1357_v30  ;;  %v6603_v27 = vld [vmem:[#allocation81_spill] sm:$0xff]  ;;  %v1312_v23 = vsel %vm1026_vm14, %v1310_v21, %v6615_v5 }
 0x6c8   :  { %v1359_v18 = vpop.permute.xlu1 %1358  ;;  %1474 = vrot.lane.b32.xlu0 %v1374_v17, %s6488_s23  ;;  %v1307_v30 = vsel %vm470_vm0, %v6603_v27, %v6602_v8  ;;  %v1314_v53 = vsel %vm1029_vm15, %v1312_v23, %v6623_v9  ;;  %v6628_v27 = vld [vmem:[#allocation99_spill] sm:$0xff] }
 0x6c9   :  { %v1375_v36 = vsel %vm1035_vm4, %v1373_v2, %v1359_v18  ;;  %v6606_v18 = vld [vmem:[#allocation107_spill] sm:$0xff] }
 0x6ca   :  { %1476 = vrot.lane.b32.xlu1 %v1375_v36, %s6488_s23  ;;  %v1071_v38 = vpop.permute.xlu0 %1070  ;;  %v1309_v36 = vsel %vm473_vm1, %v1307_v30, %v6607_v31  ;;  %s4619_s23 = smov 91  }
 0x6cb   :  { %v1092_v47 = vsel %vm1032_vm3, %v1090_v35, %v1071_v38  ;;  %v6609_v38 = vld [vmem:[#allocation76_spill] sm:$0xff] }
 0x6cc   :  { %v1073_v49 = vpop.permute.xlu1 %1072  ;;  %v1094_v55 = vsel %vm1035_vm4, %v1092_v47, %v1077_v42  ;;  %v1418_v14 = vsel %vm470_vm0, %v6610_v54, %v6609_v38  ;;  %v1258_v47 = vsel %vm1029_vm15, %v1256_v19, %v6611_v45 }
 0x6cd   :  { %v1093_v52 = vsel %vm1032_vm3, %v1091_v37, %v1073_v49  ;;  %1434 = vrot.lane.b32.xlu0 %v1094_v55, %s6498_s25  ;;  %v6613_v55 = vld [vmem:[#allocation93_spill] sm:$0xff] }
 0x6ce   :  { %v1127_v42 = vpop.permute.xlu0 %1126  ;;  %v1095_v48 = vsel %vm1035_vm4, %v1093_v52, %v5415_v62  ;;  %v6594_v62 = vld [vmem:[#allocation90_spill] sm:$0xff]  ;;  %v1420_v50 = vsel %vm473_vm1, %v1418_v14, %v6613_v55 }
 0x6cf   :  { %v1148_v57 = vsel %vm1032_vm3, %v1146_v39, %v1127_v42  ;;  %1436 = vrot.lane.b32.xlu1 %v1095_v48, %s6498_s25  ;;  %v1253_v63 = vsel %vm473_vm1, %v1251_v51, %v6594_v62  ;;  %v6616_v42 = vld [vmem:[#allocation77_spill] sm:$0xff]  ;;  %v6617_v48 = vld [vmem:[#allocation83_spill] sm:$0xff]  ;;  %s4625_s25 = smov 87  }
 0x6d0   :  { %v1129_v44 = vpop.permute.xlu1 %1128  ;;  %v1150_v58 = vsel %vm1035_vm4, %v1148_v57, %v5417_v61  ;;  %v1202_v61 = vsel %vm1029_vm15, %v1200_v56, %v6599_v46  ;;  %v1255_v17 = vsel %vm476_vm2, %v1253_v63, %v6604_v32  ;;  %v1419_v6 = vsel %vm470_vm0, %v6617_v48, %v6616_v42  ;;  %v6618_v56 = vld [vmem:[#allocation98_spill] sm:$0xff]  ;;  %v6619_v57 = vld [vmem:[#allocation87_spill] sm:$0xff]  ;;  %v6632_v42 = vld [vmem:[#allocation68_spill] sm:$0xff] }
 0x6d1   :  { %v1149_v59 = vsel %vm1032_vm3, %v1147_v24, %v1129_v44  ;;  %1442 = vrot.lane.b32.xlu0 %v1150_v58, %s6496_s12  ;;  %v1257_v52 = vsel %vm1026_vm14, %v1255_v17, %v6614_v20  ;;  %v1311_v51 = vsel %vm476_vm2, %v1309_v36, %v6619_v57  ;;  %v6620_v44 = vld [vmem:[#allocation94_spill] sm:$0xff]  ;;  %v6621_v62 = vld [vmem:[#allocation103_spill] sm:$0xff] }
 0x6d2   :  { %v1183_v29 = vpop.permute.xlu0 %1182  ;;  %v1151_v15 = vsel %vm1035_vm4, %v1149_v59, %v6600_v43  ;;  %v1421_v58 = vsel %vm473_vm1, %v1419_v6, %v6620_v44  ;;  %v1313_v63 = vsel %vm1026_vm14, %v1311_v51, %v6621_v62  ;;  %v1422_v59 = vsel %vm476_vm2, %v1420_v50, %v6622_v1  ;;  %v6626_v43 = vld [vmem:[#allocation71_spill] sm:$0xff]  ;;  %v6633_v6 = vld [vmem:[#allocation69_spill] sm:$0xff] }
 0x6d3   :  { %v1204_v26 = vsel %vm1032_vm3, %v1202_v61, %v1183_v29  ;;  %1444 = vrot.lane.b32.xlu1 %v1151_v15, %s6496_s12  ;;  %v1424_v12 = vsel %vm1026_vm14, %v1422_v59, %v6624_v33  ;;  %v6625_v61 = vld [vmem:[#allocation89_spill] sm:$0xff]  ;;  %v1315_v15 = vsel %vm1029_vm15, %v1313_v63, %v6626_v43  ;;  %v6631_v36 = vld [vmem:[#allocation79_spill] sm:$0xff]  ;;  %s6503_s12 = smov 120  }
 0x6d4   :  { %v1185_v2 = vpop.permute.xlu1 %1184  ;;  %v1206_v34 = vsel %vm1035_vm4, %v1204_v26, %v6606_v18  ;;  %v1423_v29 = vsel %vm476_vm2, %v1421_v58, %v6625_v61  ;;  %v6627_v26 = vld [vmem:[#allocation105_spill] sm:$0xff]  ;;  %v1426_v30 = vsel %vm1029_vm15, %v1424_v12, %v6628_v27  ;;  %v6630_v18 = vld [vmem:[#allocation78_spill] sm:$0xff] }
 0x6d5   :  { %v1205_v35 = vsel %vm1032_vm3, %v1203_v22, %v1185_v2  ;;  %1450 = vrot.lane.b32.xlu0 %v1206_v34, %s6494_s27 }
 0x6d6   :  { %v1239_v37 = vpop.permute.xlu0 %1238  ;;  %v1207_v49 = vsel %vm1035_vm4, %v1205_v35, %v5427_v10  ;;  %v1259_v10 = vsel %vm1029_vm15, %v1257_v52, %v6618_v56 }
 0x6d7   :  { %v1260_v39 = vsel %vm1032_vm3, %v1258_v47, %v1239_v37  ;;  %1452 = vrot.lane.b32.xlu1 %v1207_v49, %s6494_s27  ;;  %s4623_s27 = smov 73  }
 0x6d8   :  { %v1241_v7 = vpop.permute.xlu1 %1240  ;;  %v1262_v24 = vsel %vm1035_vm4, %v1260_v39, %v5433_v41 }
 0x6d9   :  { %v1261_v0 = vsel %vm1032_vm3, %v1259_v10, %v1241_v7  ;;  %1458 = vrot.lane.b32.xlu0 %v1262_v24, %s6492_s26 }
 0x6da   :  { %v1295_v25 = vpop.permute.xlu0 %1294  ;;  %v1263_v41 = vsel %vm1035_vm4, %v1261_v0, %v5438_v60  ;;  %v1425_v60 = vsel %vm1026_vm14, %v1423_v29, %v6627_v26 }
 0x6db   :  { %v1316_v46 = vsel %vm1032_vm3, %v1314_v53, %v1295_v25  ;;  %1460 = vrot.lane.b32.xlu1 %v1263_v41, %s6492_s26  ;;  %s4621_s26 = smov 82  }
 0x6dc   :  { %v1297_v28 = vpop.permute.xlu1 %1296  ;;  %v1318_v16 = vsel %vm1035_vm4, %v1316_v46, %v5446_v13  ;;  %v6629_v13 = vld [vmem:[#allocation100_spill] sm:$0xff] }
 0x6dd   :  { %v1317_v8 = vsel %vm1032_vm3, %v1315_v15, %v1297_v28  ;;  %1466 = vrot.lane.b32.xlu0 %v1318_v16, %s6490_s1  ;;  %v1427_v22 = vsel %vm1029_vm15, %v1425_v60, %v6629_v13 }
 0x6de   :  { %v1413_v32 = vpop.permute.xlu0 %1412  ;;  %v1319_v17 = vsel %vm1035_vm4, %v1317_v8, %v5454_v11 }
 0x6df   :  { %v1428_v40 = vsel %vm1032_vm3, %v1426_v30, %v1413_v32  ;;  %1468 = vrot.lane.b32.xlu1 %v1319_v17, %s6490_s1  ;;  %s4620_s1 = smov 70  }
 0x6e0   :  { %v1415_v2 = vpop.permute.xlu1 %1414  ;;  %v1430_v34 = vsel %vm1035_vm4, %v1428_v40, %v6630_v18  ;;  %v6526_v18 = vmov 0.0  }
 0x6e1   :  { %v1429_v31 = vsel %vm1032_vm3, %v1427_v22, %v1415_v2  ;;  %1482 = vrot.lane.b32.xlu0 %v1430_v34, %s6486_s5  ;;  %3467 = vmatprep.subr.bf16.mxu0 %v6526_v18 }
 0x6e2   :  { %v1431_v3 = vsel %vm1035_vm4, %v1429_v31, %v6631_v36  ;;  %v967_v11 = vpop.permute.xlu0 %966  ;;  %3489 = vmatprep.subr.bf16.mxu1 %v6526_v18 }
 0x6e3   :  { %1484 = vrot.lane.b32.xlu1 %v1431_v3, %s6486_s5  ;;  %v1020_v48 = vsel %vm470_vm0, %v6632_v42, %v967_v11  ;;  %v1515_v42 = vld [vmem:[#allocation9] sm:$0xff]  ;;  %s4618_s5 = smov 79  }
 0x6e4   :  { %v969_v19 = vpop.permute.xlu1 %968 }
 0x6e5   :  { %v1021_v56 = vsel %vm470_vm0, %v6633_v6, %v969_v19  ;;  %v1519_v6 = vld [vmem:[#allocation11] sm:$0xff] }
 0x6e6   :  { %v975_v35 = vpop.permute.xlu0 %974 }
 0x6e7   :  { %v1022_v57 = vsel %vm473_vm1, %v1020_v48, %v975_v35  ;;  %v1520_v48 = vld [vmem:[#allocation11 + $0x8] sm:$0xff] }
 0x6e8   :  { %v977_v38 = vpop.permute.xlu1 %976 }
 0x6e9   :  { %v1023_v51 = vsel %vm473_vm1, %v1021_v56, %v977_v38 }
 0x6ea   :  { %v983_v54 = vpop.permute.xlu0 %982 }
 0x6eb   :  { %v1024_v7 = vsel %vm476_vm2, %v1022_v57, %v983_v54 }
 0x6ec   :  { %v985_v14 = vpop.permute.xlu1 %984 }
 0x6ed   :  { %v1025_v24 = vsel %vm476_vm2, %v1023_v51, %v985_v14 }
 0x6ee   :  { %v991_v45 = vpop.permute.xlu0 %990 }
 0x6ef   :  { %v1027_v58 = vsel %vm1026_vm14, %v1024_v7, %v991_v45 }
 0x6f0   :  { %v993_v47 = vpop.permute.xlu1 %992 }
 0x6f1   :  { %v1028_v62 = vsel %vm1026_vm14, %v1025_v24, %v993_v47 }
 0x6f2   :  { %v999_v4 = vpop.permute.xlu0 %998 }
 0x6f3   :  { %v1030_v63 = vsel %vm1029_vm15, %v1027_v58, %v999_v4 }
 0x6f4   :  { %v1001_v21 = vpop.permute.xlu1 %1000 }
 0x6f5   :  { %v1031_v0 = vsel %vm1029_vm15, %v1028_v62, %v1001_v21  ;;  %v3979_v62 = vld [vmem:[#allocation6] sm:$0xff]  }
 0x6f6   :  { %v1007_v37 = vpop.permute.xlu0 %1006 }
 0x6f7   :  { %v1033_v59 = vsel %vm1032_vm3, %v1030_v63, %v1007_v37 }
 0x6f8   :  { %v1017_v49 = vpop.permute.xlu1 %1016 }
 0x6fa   :  { %v1015_v55 = vpop.permute.xlu0 %1014 }
 0x6fb   :  { %v1036_v53 = vsel %vm1035_vm4, %v1033_v59, %v1015_v55 }
 0x6fc   :  { %v1009_v50 = vpop.permute.xlu1 %1008 }
 0x6fd   :  { %v1034_v9 = vsel %vm1032_vm3, %v1031_v0, %v1009_v50 }
 0x6fe   :  { %v1037_v33 = vsel %vm1035_vm4, %v1034_v9, %v1017_v49 }
 0x73a   :  { %v1475_v20 = vpop.permute.xlu0 %1474 }
 0x73c   :  { %v1477_v52 = vpop.permute.xlu1 %1476 }
 0x73f   :  { %v1435_v5 = vpop.permute.xlu0 %1434 }
 0x740   :  { %v1489_v41 = vsel %vm1488_vm5, %v1036_v53, %v1435_v5  ;;  %v1512_v5 = vld [vmem:[#allocation8 + $0x8] sm:$0xff] }
 0x741   :  { %v1437_v23 = vpop.permute.xlu1 %1436 }
 0x742   :  { %v1490_v61 = vsel %vm1488_vm5, %v1037_v33, %v1437_v23  ;;  %v1511_v23 = vld [vmem:[#allocation8] sm:$0xff] }
 0x743   :  { %v1443_v39 = vpop.permute.xlu0 %1442 }
 0x744   :  { %v1492_v12 = vsel %vm1491_vm6, %v1489_v41, %v1443_v39  ;;  %v1516_v39 = vld [vmem:[#allocation9 + $0x8] sm:$0xff] }
 0x745   :  { %v1445_v10 = vpop.permute.xlu1 %1444 }
 0x746   :  { %v1493_v43 = vsel %vm1491_vm6, %v1490_v61, %v1445_v10 }
 0x747   :  { %v1451_v44 = vpop.permute.xlu0 %1450 }
 0x748   :  { %v1495_v29 = vsel %vm1494_vm7, %v1492_v12, %v1451_v44 }
 0x749   :  { %v1453_v1 = vpop.permute.xlu1 %1452 }
 0x74a   :  { %v1496_v16 = vsel %vm1494_vm7, %v1493_v43, %v1453_v1  ;;  %v3980_v43 = vld [vmem:[%s6634_s2] sm:$0xff]   ;;  %s6501_s2 = smov 84  }
 0x74b   :  { %v1459_v25 = vpop.permute.xlu0 %1458 }
 0x74c   :  { %v1498_v15 = vsel %vm6471_vm8, %v1495_v29, %v1459_v25 }
 0x74d   :  { %v1461_v46 = vpop.permute.xlu1 %1460 }
 0x74e   :  { %v1499_v60 = vsel %vm6471_vm8, %v1496_v16, %v1461_v46  ;;  %vm1830_vm8 = vcmask 564224  }
 0x74f   :  { %v1467_v28 = vpop.permute.xlu0 %1466 }
 0x750   :  { %v1501_v26 = vsel %vm6470_vm9, %v1498_v15, %v1467_v28  ;;  %v3981_v15 = vld [vmem:[%s6635_s14] sm:$0xff]   ;;  %s4605_s14 = smov 93  }
 0x751   :  { %v1469_v8 = vpop.permute.xlu1 %1468  ;;  %v1504_v30 = vsel %vm1503_vm10, %v1501_v26, %v1475_v20 }
 0x752   :  { %v1502_v27 = vsel %vm6470_vm9, %v1499_v60, %v1469_v8 }
 0x753   :  { %v1483_v32 = vpop.permute.xlu0 %1482  ;;  %v1505_v13 = vsel %vm1503_vm10, %v1502_v27, %v1477_v52 }
 0x754   :  { %v5661_v17 = vsel %vm6469_vm11, %v1504_v30, %v1483_v32 }
 0x755   :  { %v1523_v40 = vmul.f32 0.2, %v5661_v17  ;;  %v1485_v22 = vpop.permute.xlu1 %1484  ;;  %vm1521_vm12 = vcmp.ge.f32.partialorder %v5661_v17, 0.0 }
 0x756   :  { %v5667_v2 = vsel %vm6469_vm11, %v1505_v13, %v1485_v22  ;;  %vm1549_vm11 = vcmask 531456  }
 0x757   :  { %vm1522_vm13 = vcmp.ge.f32.partialorder %v5667_v2, 0.0  ;;  %v1524_v34 = vmul.f32 0.2, %v5667_v2  ;;  %v1694_v31 = vpack.c.bf16 %v5667_v2, %v5661_v17  ;;  %v1525_v36 = vsel %vm1521_vm12, %v5661_v17, %v1523_v40 }
 0x758   :  { %vm4601_vm12 = vmmov 0  }
 0x759   :  { %v1526_v3 = vsel %vm1522_vm13, %v5667_v2, %v1524_v34  ;;  %3473 = vmatprep.mubr.msk.bf16.mxu0 %vm4601_vm12, %v6526_v18  ;;  %3495 = vmatprep.mubr.msk.bf16.mxu1 %vm4601_vm12, %v6526_v18 }
 0x75a   :  { %v3839_v11 = vpack.i.bf16 %v1526_v3, %v1525_v36 }
 0x75c   :  { %3840 = vrot.lane.b32.xlu1 %v3839_v11, %s6484_s0  ;;  %3835 = vrot.lane.b32.xlu0 %v3839_v11, %s4581_s20 }
 0x760   :  { %3845 = vrot.lane.b32.xlu0 %v3839_v11, %s6480_s8 }
 0x7ce   :  { %v3841_v19 = vpop.permute.xlu1 %3840  ;;  %v3836_v35 = vpop.permute.xlu0 %3835 }
 0x7cf   :  { %v3843_v38 = vunpack.i.h.bf16 %v3841_v19  ;;  %v3842_v54 = vunpack.i.l.bf16 %v3841_v19  ;;  %v3838_v14 = vunpack.i.h.bf16 %v3836_v35  ;;  %v3837_v45 = vunpack.i.l.bf16 %v3836_v35 }
 0x7d1   :  { %v1548_v37 = vsel %vm470_vm0, %v3838_v14, %v3843_v38  ;;  %v1547_v49 = vsel %vm470_vm0, %v3837_v45, %v3842_v54 }
 0x7d2   :  { %v3846_v47 = vpop.permute.xlu0 %3845 }
 0x7d3   :  { %v3848_v4 = vunpack.i.h.bf16 %v3846_v47  ;;  %v3847_v21 = vunpack.i.l.bf16 %v3846_v47 }
 0x7d5   :  { %v1550_v55 = vsel %vm1549_vm11, %v1547_v49, %v3847_v21  ;;  %v1551_v50 = vsel %vm1549_vm11, %v1548_v37, %v3848_v4 }
 0x7d6   :  { %v3854_v20 = vpack.i.bf16 %v1551_v50, %v1550_v55  ;;  %v1566_v52 = vpack.c.bf16 %v1551_v50, %v1550_v55 }
 0x7d8   :  { %3855 = vrot.lane.b32.xlu0 %v3854_v20, %s6508_s10  ;;  %3850 = vrot.lane.b32.xlu1 %v3854_v20, %s4581_s20 }
 0x7d9   :  { %3468 = vmatpush3.bf16.msra.mxu0 %v1566_v52 }
 0x7da   :  { %3469 = vmatprep.subr.bf16.mxu0 %v6526_v18 }
 0x7dc   :  { %1576 = vperm.xlu0 %3803, %v1512_v5   ;;  %1571 = vperm.xlu1 %3802, %v1511_v23  }
 0x7e0   :  { %1642 = vperm.xlu0 %3803, %v1516_v39   ;;  %1637 = vperm.xlu1 %3802, %v1515_v42  }
 0x7e4   :  { %1702 = vperm.xlu0 %3803, %v1520_v48   ;;  %1697 = vperm.xlu1 %3802, %v1519_v6  }
 0x84a   :  { %v3856_v56 = vpop.permute.xlu0 %3855  ;;  %v3851_v10 = vpop.permute.xlu1 %3850 }
 0x84b   :  { %v3853_v57 = vunpack.i.h.bf16 %v3851_v10  ;;  %v3852_v51 = vunpack.i.l.bf16 %v3851_v10  ;;  %v3858_v7 = vunpack.i.h.bf16 %v3856_v56  ;;  %v3857_v24 = vunpack.i.l.bf16 %v3856_v56 }
 0x84d   :  { %v1567_v44 = vpack.c.bf16 %v3853_v57, %v3852_v51  ;;  %v1568_v58 = vpack.c.bf16 %v3858_v7, %v3857_v24 }
 0x84f   :  { %3470 = vmatpush3.bf16.msra.mxu0 %v1567_v44 }
 0x850   :  { %3471 = vmatprep.subr.bf16.mxu0 %v6526_v18 }
 0x853   :  { %3472 = vmatpush3.bf16.msra.mxu0 %v1568_v58 }
 0x854   :  { %3477 = vmatprep.subr.bf16.mxu0 %v6526_v18 }
 0x856   :  { %3474 = vmatmul.mubr.msk.bf16.vlgmr.msra.gmra.mrb[4].mxu0 %vm1503_vm10, %v3979_v62 }
 0x857   :  { %3479 = vmatprep.mubr.msk.bf16.mxu0 %vm4601_vm12, %v6526_v18 }
 0x85b   :  { %v1572_v63 = vpop.permute.xlu1 %1571  ;;  %v1577_v9 = vpop.permute.xlu0 %1576 }
 0x85f   :  { %v1638_v28 = vpop.permute.xlu1 %1637  ;;  %v1643_v16 = vpop.permute.xlu0 %1642 }
 0x863   :  { %v1698_v26 = vpop.permute.xlu1 %1697  ;;  %v1703_v60 = vpop.permute.xlu0 %1702 }
 0x864   :  { %v3573_v8 = vadd.f32 %v1698_v26, %v1638_v28  ;;  %v3575_v30 = vadd.f32 %v1703_v60, %v1643_v16 }
 0x929   :  { %v1621_v0 = vpop.f32.mrb[4].mxu0 }
 0x92a   :  { %v1622_v1 = vadd.f32 %v1621_v0, %v1572_v63  ;;  %v3475_v59 = vpop.f32.mrb[5].mxu0 }
 0x92b   :  { %v1624_v53 = vpop.f32.mrb[6].mxu0 }
 0x92c   :  { %v1630_v25 = vmul.f32 0.2, %v1622_v1  ;;  %v1625_v41 = vadd.f32 %v1624_v53, %v1577_v9  ;;  %v3476_v33 = vpop.f32.mrb[7].mxu0  ;;  %vm1628_vm13 = vcmp.ge.f32.partialorder %v1622_v1, 0.0  ;;  %v1759_v53 = vld [vmem:[#allocation12 + $0x8] sm:$0xff] }
 0x92d   :  { %v1762_v33 = vld [vmem:[#allocation14] sm:$0xff] }
 0x92e   :  { %vm1629_vm9 = vcmp.ge.f32.partialorder %v1625_v41, 0.0  ;;  %v1631_v12 = vmul.f32 0.2, %v1625_v41  ;;  %v1632_v46 = vsel %vm1628_vm13, %v1622_v1, %v1630_v25  ;;  %v1758_v25 = vld [vmem:[#allocation12] sm:$0xff] }
 0x930   :  { %v1633_v61 = vsel %vm1629_vm9, %v1625_v41, %v1631_v12  ;;  %v1763_v41 = vld [vmem:[#allocation14 + $0x8] sm:$0xff]  ;;  %v1767_v12 = vld [vmem:[#allocation15 + $0x8] sm:$0xff] }
 0x931   :  { %v1634_v29 = vpack.c.bf16 %v1633_v61, %v1632_v46  ;;  %v1766_v46 = vld [vmem:[#allocation15] sm:$0xff] }
 0x933   :  { %3478 = vmatpush3.bf16.msra.mxu0 %v1634_v29 }
 0x934   :  { %3483 = vmatprep.subr.bf16.mxu0 %v6526_v18 }
 0x936   :  { %3480 = vmatmul.mubr.msk.bf16.vlgmr.msra.gmra.mrb[8].mxu0 %vm1491_vm6, %v3980_v43 }
 0x937   :  { %3484 = vmatpush3.bf16.msra.mxu0 %v1694_v31  ;;  %3485 = vmatprep.mubr.msk.bf16.mxu0 %vm4601_vm12, %v6526_v18 }
 0x938   :  { %3499 = vmatprep.subr.bf16.mxu0 %v6526_v18 }
 0x942   :  { %3486 = vmatmul.mubr.msk.bf16.vlgmr.msra.gmra.mrb[8].mxu0 %vm1491_vm6, %v3981_v15 }
 0x943   :  { %3501 = vmatprep.mubr.msk.bf16.mxu0 %vm4601_vm12, %v6526_v18 }
 0xa15   :  { %v1747_v27 = vpop.f32.mrb[8].mxu0 }
 0xa16   :  { %v5709_v32 = vadd.f32 %v3573_v8, %v1747_v27  ;;  %v3487_v17 = vpop.f32.mrb[9].mxu0  ;;  %v3982_v8 = vld [vmem:[%s6636_s28] sm:$0xff]   ;;  %s4606_s28 = smov 94  }
 0xa17   :  { %v1750_v40 = vpop.f32.mrb[10].mxu0 }
 0xa18   :  { %v1770_v13 = vmul.f32 0.2, %v5709_v32  ;;  %v5712_v22 = vadd.f32 %v3575_v30, %v1750_v40  ;;  %v3488_v2 = vpop.f32.mrb[11].mxu0  ;;  %vm1768_vm9 = vcmp.ge.f32.partialorder %v5709_v32, 0.0 }
 0xa1a   :  { %vm1769_vm13 = vcmp.ge.f32.partialorder %v5712_v22, 0.0  ;;  %v1771_v34 = vmul.f32 0.2, %v5712_v22  ;;  %v1975_v31 = vpack.c.bf16 %v5712_v22, %v5709_v32  ;;  %v1772_v36 = vsel %vm1768_vm9, %v5709_v32, %v1770_v13 }
 0xa1b   :  { %vm1824_vm9 = vcmask 547840  }
 0xa1c   :  { %v1773_v3 = vsel %vm1769_vm13, %v5712_v22, %v1771_v34  ;;  %vm1827_vm13 = vcmask 556032  }
 0xa1d   :  { %v3864_v11 = vpack.i.bf16 %v1773_v3, %v1772_v36 }
 0xa1f   :  { %3865 = vrot.lane.b32.xlu0 %v3864_v11, %s4581_s20  ;;  %3860 = vrot.lane.b32.xlu1 %v3864_v11, %s6519_s24 }
 0xa23   :  { %3875 = vrot.lane.b32.xlu0 %v3864_v11, %s6480_s8  ;;  %3870 = vrot.lane.b32.xlu1 %v3864_v11, %s6484_s0  ;;  %s4615_s8 = smov 86  }
 0xa27   :  { %3885 = vrot.lane.b32.xlu0 %v3864_v11, %s6474_s4  ;;  %3880 = vrot.lane.b32.xlu1 %v3864_v11, %s6476_s7  ;;  %s6511_s4 = smov 76   ;;  %s4612_s7 = smov 81  }
 0xa2b   :  { %3890 = vrot.lane.b32.xlu1 %v3864_v11, %s6472_s21  ;;  %s4610_s21 = smov 90  }
 0xa91   :  { %v3866_v19 = vpop.permute.xlu0 %3865  ;;  %v3861_v35 = vpop.permute.xlu1 %3860 }
 0xa92   :  { %v3868_v38 = vunpack.i.h.bf16 %v3866_v19  ;;  %v3867_v54 = vunpack.i.l.bf16 %v3866_v19  ;;  %v3863_v14 = vunpack.i.h.bf16 %v3861_v35  ;;  %v3862_v45 = vunpack.i.l.bf16 %v3861_v35 }
 0xa94   :  { %v1819_v49 = vsel %vm470_vm0, %v3863_v14, %v3868_v38  ;;  %v1818_v55 = vsel %vm470_vm0, %v3862_v45, %v3867_v54  ;;  %v3983_v54 = vld [vmem:[%s6637_s9] sm:$0xff]   ;;  %s4607_s9 = smov 89  }
 0xa95   :  { %v3876_v47 = vpop.permute.xlu0 %3875  ;;  %v3871_v4 = vpop.permute.xlu1 %3870  ;;  %v3984_v14 = vld [vmem:[%s6638_s17] sm:$0xff]   ;;  %s4608_s17 = smov 85  }
 0xa96   :  { %v3873_v21 = vunpack.i.h.bf16 %v3871_v4  ;;  %v3872_v37 = vunpack.i.l.bf16 %v3871_v4  ;;  %v3878_v50 = vunpack.i.h.bf16 %v3876_v47  ;;  %v3877_v20 = vunpack.i.l.bf16 %v3876_v47 }
 0xa98   :  { %v1820_v52 = vsel %vm473_vm1, %v1818_v55, %v3872_v37  ;;  %v1821_v5 = vsel %vm473_vm1, %v1819_v49, %v3873_v21 }
 0xa99   :  { %v3886_v23 = vpop.permute.xlu0 %3885  ;;  %v3881_v39 = vpop.permute.xlu1 %3880  ;;  %v1822_v10 = vsel %vm476_vm2, %v1820_v52, %v3877_v20  ;;  %v1823_v57 = vsel %vm476_vm2, %v1821_v5, %v3878_v50 }
 0xa9a   :  { %v3883_v42 = vunpack.i.h.bf16 %v3881_v39  ;;  %v3882_v48 = vunpack.i.l.bf16 %v3881_v39  ;;  %v3888_v6 = vunpack.i.h.bf16 %v3886_v23  ;;  %v3887_v56 = vunpack.i.l.bf16 %v3886_v23 }
 0xa9c   :  { %v1825_v51 = vsel %vm1824_vm9, %v1822_v10, %v3882_v48  ;;  %v1826_v7 = vsel %vm1824_vm9, %v1823_v57, %v3883_v42 }
 0xa9d   :  { %v3891_v24 = vpop.permute.xlu1 %3890  ;;  %v1828_v62 = vsel %vm1827_vm13, %v1825_v51, %v3887_v56  ;;  %v1829_v63 = vsel %vm1827_vm13, %v1826_v7, %v3888_v6 }
 0xa9e   :  { %v3893_v44 = vunpack.i.h.bf16 %v3891_v24  ;;  %v3892_v58 = vunpack.i.l.bf16 %v3891_v24 }
 0xaa0   :  { %v1831_v0 = vsel %vm1830_vm8, %v1828_v62, %v3892_v58  ;;  %v1832_v1 = vsel %vm1830_vm8, %v1829_v63, %v3893_v44  ;;  %v2040_v58 = vld [vmem:[#allocation17 + $0x8] sm:$0xff]  ;;  %v2039_v62 = vld [vmem:[#allocation17] sm:$0xff] }
 0xaa1   :  { %v3899_v59 = vpack.i.bf16 %v1832_v1, %v1831_v0  ;;  %v1847_v9 = vpack.c.bf16 %v1832_v1, %v1831_v0 }
 0xaa3   :  { %3900 = vrot.lane.b32.xlu1 %v3899_v59, %s4588_s18  ;;  %3895 = vrot.lane.b32.xlu0 %v3899_v59, %s6519_s24 }
 0xaa4   :  { %3490 = vmatpush3.bf16.msra.mxu1 %v1847_v9 }
 0xaa5   :  { %3491 = vmatprep.subr.bf16.mxu1 %v6526_v18 }
 0xaa7   :  { %1857 = vperm.xlu1 %3802, %v1759_v53   ;;  %1852 = vperm.xlu0 %3803, %v1758_v25  }
 0xaab   :  { %1923 = vperm.xlu1 %3802, %v1763_v41   ;;  %1918 = vperm.xlu0 %3803, %v1762_v33   ;;  %v3985_v33 = vld [vmem:[%s6639_s29] sm:$0xff]   ;;  %s6500_s29 = smov 80  }
 0xaaf   :  { %1983 = vperm.xlu1 %3802, %v1767_v12   ;;  %1978 = vperm.xlu0 %3803, %v1766_v46  }
 0xb15   :  { %v3901_v61 = vpop.permute.xlu1 %3900  ;;  %v3896_v29 = vpop.permute.xlu0 %3895 }
 0xb16   :  { %v3898_v43 = vunpack.i.h.bf16 %v3896_v29  ;;  %v3897_v15 = vunpack.i.l.bf16 %v3896_v29  ;;  %v3903_v28 = vunpack.i.h.bf16 %v3901_v61  ;;  %v3902_v16 = vunpack.i.l.bf16 %v3901_v61 }
 0xb18   :  { %v1848_v26 = vpack.c.bf16 %v3898_v43, %v3897_v15  ;;  %v1849_v60 = vpack.c.bf16 %v3903_v28, %v3902_v16 }
 0xb1a   :  { %3492 = vmatpush3.bf16.msra.mxu1 %v1848_v26 }
 0xb1b   :  { %3493 = vmatprep.subr.bf16.mxu1 %v6526_v18 }
 0xb1e   :  { %3494 = vmatpush3.bf16.msra.mxu1 %v1849_v60 }
 0xb1f   :  { %3511 = vmatprep.subr.bf16.mxu1 %v6526_v18 }
 0xb21   :  { %3496 = vmatmul.mubr.msk.bf16.vlgmr.msra.gmra.mrb[16].mxu1 %vm1503_vm10, %v3982_v8 }
 0xb22   :  { %3517 = vmatprep.mubr.msk.bf16.mxu1 %vm4601_vm12, %v6526_v18 }
 0xb26   :  { %v1853_v27 = vpop.permute.xlu0 %1852  ;;  %v1858_v13 = vpop.permute.xlu1 %1857 }
 0xb2a   :  { %v1919_v45 = vpop.permute.xlu0 %1918  ;;  %v1924_v47 = vpop.permute.xlu1 %1923 }
 0xb2e   :  { %v1979_v4 = vpop.permute.xlu0 %1978  ;;  %v1984_v21 = vpop.permute.xlu1 %1983 }
 0xb2f   :  { %v3577_v37 = vadd.f32 %v1979_v4, %v1919_v45  ;;  %v3579_v55 = vadd.f32 %v1984_v21, %v1924_v47 }
 0xbf4   :  { %v1902_v30 = vpop.f32.mrb[16].mxu1 }
 0xbf5   :  { %v1903_v17 = vadd.f32 %v1902_v30, %v1853_v27  ;;  %v3497_v40 = vpop.f32.mrb[17].mxu1 }
 0xbf6   :  { %v1905_v2 = vpop.f32.mrb[18].mxu1 }
 0xbf7   :  { %v1911_v34 = vmul.f32 0.2, %v1903_v17  ;;  %v1906_v36 = vadd.f32 %v1905_v2, %v1858_v13  ;;  %v3498_v3 = vpop.f32.mrb[19].mxu1  ;;  %vm1909_vm8 = vcmp.ge.f32.partialorder %v1903_v17, 0.0 }
 0xbf9   :  { %vm1910_vm9 = vcmp.ge.f32.partialorder %v1906_v36, 0.0  ;;  %v1912_v11 = vmul.f32 0.2, %v1906_v36  ;;  %v1913_v19 = vsel %vm1909_vm8, %v1903_v17, %v1911_v34 }
 0xbfb   :  { %v1914_v35 = vsel %vm1910_vm9, %v1906_v36, %v1912_v11  ;;  %vm3348_vm9 = vmpackc.low %vm1549_vm11, %vm1549_vm11 }
 0xbfc   :  { %v1915_v38 = vpack.c.bf16 %v1914_v35, %v1913_v19 }
 0xbfe   :  { %3500 = vmatpush3.bf16.msra.mxu0 %v1915_v38 }
 0xbff   :  { %3505 = vmatprep.subr.bf16.mxu0 %v6526_v18 }
 0xc01   :  { %3502 = vmatmul.mubr.msk.bf16.vlgmr.msra.gmra.mrb[12].mxu0 %vm1491_vm6, %v3983_v54 }
 0xc02   :  { %3506 = vmatpush3.bf16.msra.mxu0 %v1975_v31  ;;  %3507 = vmatprep.mubr.msk.bf16.mxu0 %vm4601_vm12, %v6526_v18 }
 0xc03   :  { %3529 = vmatprep.subr.bf16.mxu0 %v6526_v18 }
 0xc0d   :  { %3508 = vmatmul.mubr.msk.bf16.vlgmr.msra.gmra.mrb[12].mxu0 %vm1491_vm6, %v3984_v14 }
 0xc0e   :  { %3531 = vmatprep.mubr.msk.bf16.mxu0 %vm4601_vm12, %v6526_v18 }
 0xce0   :  { %v2028_v49 = vpop.f32.mrb[12].mxu0 }
 0xce1   :  { %v3578_v32 = vadd.f32 %v3577_v37, %v2028_v49  ;;  %v3509_v22 = vpop.f32.mrb[13].mxu0 }
 0xce2   :  { %v2031_v31 = vpop.f32.mrb[14].mxu0 }
 0xce3   :  { %v2043_v50 = vmul.f32 0.2, %v3578_v32  ;;  %v3580_v20 = vadd.f32 %v3579_v55, %v2031_v31  ;;  %v3510_v52 = vpop.f32.mrb[15].mxu0  ;;  %vm2041_vm13 = vcmp.ge.f32.partialorder %v3578_v32, 0.0 }
 0xce5   :  { %vm2042_vm8 = vcmp.ge.f32.partialorder %v3580_v20, 0.0  ;;  %v2044_v5 = vmul.f32 0.2, %v3580_v20  ;;  %v2045_v23 = vsel %vm2041_vm13, %v3578_v32, %v2043_v50  ;;  %vm6719_vm13 = vcmask 326656  }
 0xce7   :  { %v2046_v39 = vsel %vm2042_vm8, %v3580_v20, %v2044_v5  ;;  %vm6720_vm8 = vcmask 457728  }
 0xce8   :  { %v3904_v42 = vpack.i.bf16 %v2046_v39, %v2045_v23 }
 0xcea   :  { %3905 = vrot.lane.b32.xlu0 %v3904_v42, %s6484_s0  ;;  %s4617_s0 = smov 77  }
 0xd5c   :  { %v3906_v48 = vpop.permute.xlu0 %3905 }
 0xd5d   :  { %v3908_v6 = vunpack.i.h.bf16 %v3906_v48  ;;  %v3907_v56 = vunpack.i.l.bf16 %v3906_v48 }
 0xd5f   :  { %v2056_v10 = vsel %vm470_vm0, 0.0, %v3908_v6  ;;  %v2055_v57 = vsel %vm470_vm0, 0.0, %v3907_v56 }
 0xd60   :  { %v2058_v51 = vsel %vm1549_vm11, %v2056_v10, 0.0  ;;  %v2057_v7 = vsel %vm1549_vm11, %v2055_v57, 0.0  ;;  %v3349_v24 = vpack.c.bf16 %v2056_v10, %v2055_v57  ;;  %vm6718_vm11 = vcmask 261120  }
 0xd61   :  { %v3914_v44 = vpack.i.bf16 %v2058_v51, %v2057_v7 }
 0xd62   :  { %3512 = vmatpush3.bf16.msk.msra.mxu1 %vm3348_vm9, %v3349_v24  ;;  %vm6722_vm9 = vmmov %vm6718_vm11 }
 0xd63   :  { %3915 = vrot.lane.b32.xlu0 %v3914_v44, %s6508_s10  ;;  %3910 = vrot.lane.b32.xlu1 %v3914_v44, %s4581_s20 }
 0xd64   :  { %3513 = vmatprep.subr.bf16.mxu1 %v6526_v18 }
 0xd67   :  { %2083 = vperm.xlu0 %3803, %v2040_v58   ;;  %2078 = vperm.xlu1 %3802, %v2039_v62  }
 0xdd5   :  { %v3916_v63 = vpop.permute.xlu0 %3915  ;;  %v3911_v0 = vpop.permute.xlu1 %3910 }
 0xdd6   :  { %v3913_v1 = vunpack.i.h.bf16 %v3911_v0  ;;  %v3912_v59 = vunpack.i.l.bf16 %v3911_v0  ;;  %v3918_v9 = vunpack.i.h.bf16 %v3916_v63  ;;  %v3917_v53 = vunpack.i.l.bf16 %v3916_v63 }
 0xdd8   :  { %v2074_v25 = vpack.c.bf16 %v3913_v1, %v3912_v59  ;;  %v2075_v41 = vpack.c.bf16 %v3918_v9, %v3917_v53 }
 0xdda   :  { %3514 = vmatpush3.bf16.msra.mxu1 %v2074_v25 }
 0xddb   :  { %3515 = vmatprep.subr.bf16.mxu1 %v6526_v18 }
 0xdde   :  { %3516 = vmatpush3.bf16.msra.mxu1 %v2075_v41 }
 0xddf   :  { %3521 = vmatprep.subr.bf16.mxu1 %v6526_v18 }
 0xde1   :  { %3518 = vmatmul.mubr.msk.bf16.vlgmr.msra.gmra.mrb[20].mxu1 %vm1503_vm10, %v3985_v33 }
 0xde2   :  { %3525 = vmatprep.mubr.msk.bf16.mxu1 %vm4601_vm12, %v6526_v18 }
 0xde6   :  { %v2079_v12 = vpop.permute.xlu1 %2078  ;;  %v2084_v28 = vpop.permute.xlu0 %2083 }
 0xeb4   :  { %v2128_v46 = vpop.f32.mrb[20].mxu1 }
 0xeb5   :  { %v5772_v61 = vadd.f32 %v2128_v46, %v2079_v12  ;;  %v3519_v29 = vpop.f32.mrb[21].mxu1 }
 0xeb6   :  { %v5774_v43 = vpop.f32.mrb[22].mxu1 }
 0xeb7   :  { %2441 = vrot.lane.b32.xlu0 %v5772_v61, %s4602_s30  ;;  %2410 = vrot.lane.b32.xlu1 %v5772_v61, %s4603_s13  ;;  %v3520_v15 = vpop.f32.mrb[23].mxu1  ;;  %v5876_v16 = vadd.f32 %v5774_v43, %v2084_v28 }
 0xebb   :  { %2472 = vrot.lane.b32.xlu0 %v5772_v61, %s6501_s2  ;;  %2416 = vrot.lane.b32.xlu1 %v5772_v61, %s4605_s14  ;;  %s4627_s2 = smov 78  }
 0xebf   :  { %2422 = vrot.lane.b32.xlu0 %v5772_v61, %s4606_s28  ;;  %2447 = vrot.lane.b32.xlu1 %v5772_v61, %s4607_s9 }
 0xec3   :  { %2478 = vrot.lane.b32.xlu0 %v5772_v61, %s4608_s17  ;;  %2503 = vrot.lane.b32.xlu1 %v5772_v61, %s6500_s29  ;;  %s6505_s29 = smov 97  }
 0xec7   :  { %2453 = vrot.lane.b32.xlu0 %v5772_v61, %s4610_s21  ;;  %2534 = vrot.lane.b32.xlu1 %v5772_v61, %s6511_s4  ;;  %s4636_s4 = smov 96  }
 0xecb   :  { %2509 = vrot.lane.b32.xlu0 %v5772_v61, %s4612_s7  ;;  %2428 = vrot.lane.b32.xlu1 %v5772_v61, %s4613_s11 }
 0xecf   :  { %2565 = vrot.lane.b32.xlu0 %v5772_v61, %s6504_s15  ;;  %2484 = vrot.lane.b32.xlu1 %v5772_v61, %s4615_s8  ;;  %s6510_s15 = smov 117  }
 0xed3   :  { %2596 = vrot.lane.b32.xlu0 %v5772_v61, %s4616_s22  ;;  %2540 = vrot.lane.b32.xlu1 %v5772_v61, %s4617_s0  ;;  %s6502_s22 = smov 75  }
 0xed7   :  { %2552 = vrot.lane.b32.xlu0 %v5772_v61, %s4618_s5  ;;  %2459 = vrot.lane.b32.xlu1 %v5772_v61, %s4619_s23 }
 0xedb   :  { %2608 = vrot.lane.b32.xlu0 %v5772_v61, %s4620_s1  ;;  %2515 = vrot.lane.b32.xlu1 %v5772_v61, %s4621_s26 }
 0xedf   :  { %2583 = vrot.lane.b32.xlu0 %v5772_v61, %s6502_s22  ;;  %2571 = vrot.lane.b32.xlu1 %v5772_v61, %s4623_s27  ;;  %s6507_s22 = smov 69  }
 0xee3   :  { %2193 = vrot.lane.b32.xlu0 %v5772_v61, %s6503_s12  ;;  %2490 = vrot.lane.b32.xlu1 %v5772_v61, %s4625_s25  ;;  %s4629_s12 = smov 83  }
 0xee7   :  { %2385 = vrot.lane.b32.xlu0 %v5772_v61, %s6505_s29  ;;  %2546 = vrot.lane.b32.xlu1 %v5772_v61, %s4627_s2  ;;  %s4631_s29 = smov 74  }
 0xeeb   :  { %2199 = vrot.lane.b32.xlu0 %v5772_v61, %s6506_s19  ;;  %2602 = vrot.lane.b32.xlu1 %v5772_v61, %s6507_s22  ;;  %s6512_s19 = smov 108   ;;  %s6513_s22 = smov 71  }
 0xeef   :  { %2177 = vrot.lane.b32.xlu0 %v5772_v61, %s6508_s10  ;;  %2521 = vrot.lane.b32.xlu1 %v5772_v61, %s4629_s12  ;;  %s6514_s10 = smov 104  }
 0xef3   :  { %2230 = vrot.lane.b32.xlu0 %v5772_v61, %s6510_s15  ;;  %2577 = vrot.lane.b32.xlu1 %v5772_v61, %s4631_s29  ;;  %s6517_s15 = smov 99  }
 0xef7   :  { %2286 = vrot.lane.b32.xlu0 %v5772_v61, %s6512_s19  ;;  %2614 = vrot.lane.b32.xlu1 %v5772_v61, %s6513_s22  ;;  %s6518_s19 = smov 100   ;;  %s6521_s22 = smov 119  }
 0xefb   :  { %2317 = vrot.lane.b32.xlu0 %v5772_v61, %s6514_s10  ;;  %2165 = vrot.lane.b32.xlu1 %v5772_v61, %s6515_s16  ;;  %s6522_s10 = smov 116   ;;  %s4640_s16 = smov 110  }
 0xeff   :  { %2397 = vrot.lane.b32.xlu0 %v5772_v61, %s6517_s15  ;;  %2379 = vrot.lane.b32.xlu1 %v5772_v61, %s4636_s4  ;;  %s6523_s15 = smov 112  }
 0xf03   :  { %2348 = vrot.lane.b32.xlu0 %v5772_v61, %s6518_s19  ;;  %2171 = vrot.lane.b32.xlu1 %v5772_v61, %s6519_s24  ;;  %s4642_s19 = smov 101   ;;  %s4643_s24 = smov 98  }
 0xf07   :  { %2242 = vrot.lane.b32.xlu0 %v5772_v61, %s6521_s22  ;;  %2224 = vrot.lane.b32.xlu1 %v5772_v61, %s6522_s10  ;;  %s6524_s22 = smov 107   ;;  %s6525_s10 = smov 103  }
 0xf0b   :  { %2298 = vrot.lane.b32.xlu0 %v5772_v61, %s4640_s16  ;;  %2255 = vrot.lane.b32.xlu1 %v5772_v61, %s6523_s15  ;;  %s4646_s15 = smov 113  }
 0xf0f   :  { %2354 = vrot.lane.b32.xlu0 %v5772_v61, %s4642_s19  ;;  %2391 = vrot.lane.b32.xlu1 %v5772_v61, %s4643_s24 }
 0xf13   :  { %2335 = vrot.lane.b32.xlu0 %v5772_v61, %s6524_s22  ;;  %2205 = vrot.lane.b32.xlu1 %v5772_v61, %s4588_s18  ;;  %s4647_s22 = smov 118  }
 0xf17   :  { %2366 = vrot.lane.b32.xlu0 %v5772_v61, %s6525_s10  ;;  %2261 = vrot.lane.b32.xlu1 %v5772_v61, %s4646_s15  ;;  %s4648_s10 = smov 109  }
 0xf1b   :  { %2183 = vrot.lane.b32.xlu1 %v5772_v61, %s4581_s20  ;;  %2413 = vrot.lane.b32.xlu0 %v5876_v16, %s4605_s14  ;;  %s4649_s14 = smov 114  }
 0xf1f   :  { %2236 = vrot.lane.b32.xlu1 %v5772_v61, %s4647_s22  ;;  %2419 = vrot.lane.b32.xlu0 %v5876_v16, %s4606_s28  ;;  %s6655_s28 = smov 126  }
 0xf23   :  { %2292 = vrot.lane.b32.xlu1 %v5772_v61, %s4648_s10  ;;  %2506 = vrot.lane.b32.xlu0 %v5876_v16, %s4612_s7  ;;  %s4650_s7 = smov 105  }
 0xf27   :  { %2211 = vrot.lane.b32.xlu1 %v5772_v61, %s4589_s3  ;;  %2537 = vrot.lane.b32.xlu0 %v5876_v16, %s4617_s0  ;;  %s4651_s0 = smov 115  }
 0xf29   :  { %v5894_v26 = vpop.permute.xlu0 %2441  ;;  %v5896_v60 = vpop.permute.xlu1 %2410 }
 0xf2b   :  { %2267 = vrot.lane.b32.xlu1 %v5772_v61, %s4649_s14  ;;  %2456 = vrot.lane.b32.xlu0 %v5876_v16, %s4619_s23  ;;  %s4652_s23 = smov 106  }
 0xf2d   :  { %v5902_v8 = vpop.permute.xlu0 %2472  ;;  %v5904_v27 = vpop.permute.xlu1 %2416 }
 0xf2f   :  { %2323 = vrot.lane.b32.xlu1 %v5772_v61, %s4650_s7  ;;  %2512 = vrot.lane.b32.xlu0 %v5876_v16, %s4621_s26  ;;  %s4653_s26 = smov 111  }
 0xf31   :  { %v5910_v30 = vpop.permute.xlu0 %2422  ;;  %v5912_v17 = vpop.permute.xlu1 %2447 }
 0xf33   :  { %2273 = vrot.lane.b32.xlu1 %v5772_v61, %s4651_s0  ;;  %2431 = vrot.lane.b32.xlu0 %v5876_v16, %s4636_s4  ;;  %s4654_s4 = smov 102  }
 0xf35   :  { %v5918_v40 = vpop.permute.xlu0 %2478  ;;  %v5920_v13 = vpop.permute.xlu1 %2503 }
 0xf37   :  { %2329 = vrot.lane.b32.xlu1 %v5772_v61, %s4652_s23  ;;  %2487 = vrot.lane.b32.xlu0 %v5876_v16, %s4625_s25  ;;  %s6641_s25 = smov 69  }
 0xf39   :  { %v5926_v2 = vpop.permute.xlu0 %2453  ;;  %v5928_v34 = vpop.permute.xlu1 %2534 }
 0xf3b   :  { %2304 = vrot.lane.b32.xlu1 %v5772_v61, %s4653_s26  ;;  %2543 = vrot.lane.b32.xlu0 %v5876_v16, %s4627_s2  ;;  %s6653_s2 = smov 121  }
 0xf3d   :  { %v5934_v36 = vpop.permute.xlu0 %2509  ;;  %v5936_v3 = vpop.permute.xlu1 %2428 }
 0xf3f   :  { %2360 = vrot.lane.b32.xlu1 %v5772_v61, %s4654_s4  ;;  %2462 = vrot.lane.b32.xlu0 %v5876_v16, %s4603_s13  ;;  %s6651_s13 = smov 71  }
 0xf41   :  { %v5942_v11 = vpop.permute.xlu0 %2565  ;;  %v5944_v19 = vpop.permute.xlu1 %2484 }
 0xf43   :  { %2444 = vrot.lane.b32.xlu1 %v5876_v16, %s4607_s9  ;;  %2518 = vrot.lane.b32.xlu0 %v5876_v16, %s4629_s12  ;;  %s6644_s12 = smov 125   ;;  %s6668_s9 = smov 100  }
 0xf45   :  { %v5950_v35 = vpop.permute.xlu0 %2596  ;;  %v5952_v38 = vpop.permute.xlu1 %2540 }
 0xf47   :  { %2475 = vrot.lane.b32.xlu1 %v5876_v16, %s4608_s17  ;;  %2574 = vrot.lane.b32.xlu0 %v5876_v16, %s4631_s29  ;;  %s6674_s17 = smov 103   ;;  %s6675_s29 = smov 116  }
 0xf49   :  { %v5958_v54 = vpop.permute.xlu0 %2552  ;;  %v5960_v14 = vpop.permute.xlu1 %2459 }
 0xf4b   :  { %2450 = vrot.lane.b32.xlu1 %v5876_v16, %s4610_s21  ;;  %2493 = vrot.lane.b32.xlu0 %v5876_v16, %s4602_s30  ;;  %s6643_s21 = smov 84   ;;  %s6649_s30 = smov 117  }
 0xf4d   :  { %v5966_v45 = vpop.permute.xlu0 %2608  ;;  %v5968_v47 = vpop.permute.xlu1 %2515 }
 0xf4f   :  { %2425 = vrot.lane.b32.xlu1 %v5876_v16, %s4613_s11  ;;  %2549 = vrot.lane.b32.xlu0 %v5876_v16, %s4618_s5  ;;  %s6640_s11 = smov 76   ;;  %s6648_s5 = smov 80  }
 0xf51   :  { %v5974_v4 = vpop.permute.xlu0 %2583  ;;  %v5976_v21 = vpop.permute.xlu1 %2571 }
 0xf53   :  { %2481 = vrot.lane.b32.xlu1 %v5876_v16, %s4615_s8  ;;  %2605 = vrot.lane.b32.xlu0 %v5876_v16, %s4620_s1  ;;  %s6642_s8 = smov 72   ;;  %s6646_s1 = smov 97  }
 0xf55   :  { %v5982_v37 = vpop.permute.xlu0 %2193  ;;  %v5984_v49 = vpop.permute.xlu1 %2490 }
 0xf57   :  { %2568 = vrot.lane.b32.xlu1 %v5876_v16, %s4623_s27  ;;  %2586 = vrot.lane.b32.xlu0 %v5876_v16, %s6640_s11  ;;  %s6645_s27 = smov 75   ;;  %s6689_s11 = smov 40  }
 0xf59   :  { %v5990_v55 = vpop.permute.xlu0 %2385  ;;  %v5992_v32 = vpop.permute.xlu1 %2546 }
 0xf5b   :  { %2599 = vrot.lane.b32.xlu1 %v5876_v16, %s6641_s25  ;;  %2617 = vrot.lane.b32.xlu0 %v5876_v16, %s6642_s8  ;;  %s6690_s25 = smov 48   ;;  %s6691_s8 = smov 56  }
 0xf5d   :  { %v5998_v22 = vpop.permute.xlu0 %2199  ;;  %v6000_v31 = vpop.permute.xlu1 %2602 }
 0xf5f   :  { %2524 = vrot.lane.b32.xlu1 %v5876_v16, %s6643_s21  ;;  %2168 = vrot.lane.b32.xlu0 %v5876_v16, %s6644_s12  ;;  %s6692_s21 = smov 1  }
 0xf61   :  { %v6006_v50 = vpop.permute.xlu0 %2177  ;;  %v6008_v20 = vpop.permute.xlu1 %2521 }
 0xf63   :  { %2580 = vrot.lane.b32.xlu1 %v5876_v16, %s6645_s27  ;;  %2382 = vrot.lane.b32.xlu0 %v5876_v16, %s6646_s1  ;;  %s6693_s27 = smov 2   ;;  %s6694_s1 = smov 3  }
 0xf65   :  { %v6014_v52 = vpop.permute.xlu0 %2230  ;;  %v6016_v5 = vpop.permute.xlu1 %2577 }
 0xf66   :  { %6647 = vst [vmem:[#allocation90_spill] sm:$0xff] %v6014_v52 }
 0xf67   :  { %2555 = vrot.lane.b32.xlu1 %v5876_v16, %s6648_s5  ;;  %2227 = vrot.lane.b32.xlu0 %v5876_v16, %s6649_s30  ;;  %s6695_s5 = smov 4   ;;  %s6721_s30 = smov 64  }
 0xf69   :  { %v6022_v23 = vpop.permute.xlu0 %2286  ;;  %v6024_v39 = vpop.permute.xlu1 %2614 }
 0xf6a   :  { %6650 = vst [vmem:[#allocation101_spill] sm:$0xff] %v6022_v23 }
 0xf6b   :  { %2611 = vrot.lane.b32.xlu1 %v5876_v16, %s6651_s13  ;;  %2258 = vrot.lane.b32.xlu0 %v5876_v16, %s4646_s15  ;;  %s6657_s15 = smov 99   ;;  %s6726_s13 = smov 5  }
 0xf6d   :  { %v6030_v42 = vpop.permute.xlu0 %2317  ;;  %v6032_v48 = vpop.permute.xlu1 %2165 }
 0xf6e   :  { %6652 = vst [vmem:[#allocation74_spill] sm:$0xff] %v6030_v42 }
 0xf6f   :  { %2196 = vrot.lane.b32.xlu1 %v5876_v16, %s6653_s2  ;;  %2180 = vrot.lane.b32.xlu0 %v5876_v16, %s4581_s20  ;;  %s6727_s2 = smov 7  }
 0xf71   :  { %v6038_v6 = vpop.permute.xlu0 %2397  ;;  %v6040_v56 = vpop.permute.xlu1 %2379 }
 0xf72   :  { %6654 = vst [vmem:[#allocation80_spill] sm:$0xff] %v6038_v6 }
 0xf73   :  { %2174 = vrot.lane.b32.xlu1 %v5876_v16, %s6655_s28  ;;  %2233 = vrot.lane.b32.xlu0 %v5876_v16, %s4647_s22  ;;  %s6677_s22 = smov 108  }
 0xf75   :  { %v6046_v10 = vpop.permute.xlu0 %2348  ;;  %v6048_v57 = vpop.permute.xlu1 %2171 }
 0xf76   :  { %6656 = vst [vmem:[#allocation84_spill] sm:$0xff] %v6046_v10 }
 0xf77   :  { %2388 = vrot.lane.b32.xlu1 %v5876_v16, %s4643_s24  ;;  %2394 = vrot.lane.b32.xlu0 %v5876_v16, %s6657_s15  ;;  %s6662_s24 = smov 119   ;;  %s6728_s15 = smov 9  }
 0xf79   :  { %v6054_v51 = vpop.permute.xlu0 %2242  ;;  %v6056_v7 = vpop.permute.xlu1 %2224 }
 0xf7a   :  { %6658 = vst [vmem:[#allocation95_spill] sm:$0xff] %v6054_v51 }
 0xf7b   :  { %2202 = vrot.lane.b32.xlu1 %v5876_v16, %s4588_s18  ;;  %2208 = vrot.lane.b32.xlu0 %v5876_v16, %s4589_s3 }
 0xf7d   :  { %v6062_v24 = vpop.permute.xlu0 %2298  ;;  %v6064_v44 = vpop.permute.xlu1 %2255 }
 0xf7e   :  { %6659 = vst [vmem:[#allocation106_spill] sm:$0xff] %v6062_v24  ;;  %6660 = vst [vmem:[#allocation91_spill] sm:$0xff] %v6064_v44 }
 0xf7f   :  { %2289 = vrot.lane.b32.xlu1 %v5876_v16, %s4648_s10  ;;  %2264 = vrot.lane.b32.xlu0 %v5876_v16, %s4649_s14  ;;  %s6667_s10 = smov 124   ;;  %s6678_s14 = smov 107  }
 0xf81   :  { %v6070_v58 = vpop.permute.xlu0 %2354  ;;  %v6072_v62 = vpop.permute.xlu1 %2391 }
 0xf82   :  { %6661 = vst [vmem:[#allocation75_spill] sm:$0xff] %v6070_v58 }
 0xf83   :  { %2320 = vrot.lane.b32.xlu1 %v5876_v16, %s4650_s7  ;;  %2239 = vrot.lane.b32.xlu0 %v5876_v16, %s6662_s24  ;;  %s6680_s7 = smov 104  }
 0xf85   :  { %v6078_v63 = vpop.permute.xlu0 %2335  ;;  %v6080_v0 = vpop.permute.xlu1 %2205 }
 0xf86   :  { %6663 = vst [vmem:[#allocation81_spill] sm:$0xff] %v6078_v63  ;;  %6664 = vst [vmem:[#allocation85_spill] sm:$0xff] %v6080_v0 }
 0xf87   :  { %2351 = vrot.lane.b32.xlu1 %v5876_v16, %s4642_s19  ;;  %2295 = vrot.lane.b32.xlu0 %v5876_v16, %s4640_s16  ;;  %s6669_s19 = smov 120   ;;  %s6672_s16 = smov 112  }
 0xf89   :  { %v6086_v1 = vpop.permute.xlu0 %2366  ;;  %v6088_v59 = vpop.permute.xlu1 %2261 }
 0xf8a   :  { %6665 = vst [vmem:[#allocation96_spill] sm:$0xff] %v6086_v1  ;;  %6666 = vst [vmem:[#allocation107_spill] sm:$0xff] %v6088_v59 }
 0xf8b   :  { %2214 = vrot.lane.b32.xlu1 %v5876_v16, %s6667_s10  ;;  %2400 = vrot.lane.b32.xlu0 %v5876_v16, %s6668_s9 }
 0xf8d   :  { %v6094_v9 = vpop.permute.xlu1 %2183  ;;  %v2414_v53 = vpop.permute.xlu0 %2413 }
 0xf8e   :  { %v2434_v23 = vsel %vm470_vm0, %v5896_v60, %v2414_v53 }
 0xf8f   :  { %2270 = vrot.lane.b32.xlu1 %v5876_v16, %s4651_s0  ;;  %2245 = vrot.lane.b32.xlu0 %v5876_v16, %s6669_s19  ;;  %s6685_s0 = smov 8  }
 0xf91   :  { %v6100_v25 = vpop.permute.xlu1 %2236  ;;  %v2420_v41 = vpop.permute.xlu0 %2419 }
 0xf92   :  { %6670 = vst [vmem:[#allocation92_spill] sm:$0xff] %v6100_v25 }
 0xf93   :  { %2326 = vrot.lane.b32.xlu1 %v5876_v16, %s4652_s23  ;;  %2301 = vrot.lane.b32.xlu0 %v5876_v16, %s4653_s26  ;;  %s6686_s23 = smov 16   ;;  %s6687_s26 = smov 24  }
 0xf95   :  { %v6106_v33 = vpop.permute.xlu1 %2292  ;;  %v2507_v12 = vpop.permute.xlu0 %2506 }
 0xf96   :  { %6671 = vst [vmem:[#allocation72_spill] sm:$0xff] %v6106_v33 }
 0xf97   :  { %2307 = vrot.lane.b32.xlu1 %v5876_v16, %s6672_s16  ;;  %2357 = vrot.lane.b32.xlu0 %v5876_v16, %s4654_s4  ;;  %s6688_s4 = smov 32  }
 0xf99   :  { %v6112_v46 = vpop.permute.xlu1 %2211  ;;  %v2538_v29 = vpop.permute.xlu0 %2537 }
 0xf9a   :  { %6673 = vst [vmem:[#allocation76_spill] sm:$0xff] %v6112_v46 }
 0xf9b   :  { %2363 = vrot.lane.b32.xlu1 %v5876_v16, %s6674_s17  ;;  %2276 = vrot.lane.b32.xlu0 %v5876_v16, %s6675_s29 }
 0xf9d   :  { %v6118_v43 = vpop.permute.xlu1 %2267  ;;  %v2457_v15 = vpop.permute.xlu0 %2456 }
 0xf9e   :  { %6676 = vst [vmem:[#allocation82_spill] sm:$0xff] %v6118_v43 }
 0xf9f   :  { %2338 = vrot.lane.b32.xlu1 %v5876_v16, %s6677_s22  ;;  %2332 = vrot.lane.b32.xlu0 %v5876_v16, %s6678_s14 }
 0xfa1   :  { %v6124_v28 = vpop.permute.xlu1 %2323  ;;  %v2513_v18 = vpop.permute.xlu0 %2512 }
 0xfa2   :  { %6679 = vst [vmem:[#allocation97_spill] sm:$0xff] %v6124_v28 }
 0xfa3   :  { %2369 = vrot.lane.b32.xlu0 %v5876_v16, %s6680_s7 }
 0xfa5   :  { %v6128_v1 = vpop.permute.xlu1 %2273  ;;  %v2432_v63 = vpop.permute.xlu0 %2431 }
 0xfa6   :  { %6681 = vst [vmem:[#allocation86_spill] sm:$0xff] %v6128_v1 }
 0xfa9   :  { %v6130_v58 = vpop.permute.xlu1 %2329  ;;  %v2488_v10 = vpop.permute.xlu0 %2487 }
 0xfaa   :  { %6682 = vst [vmem:[#allocation93_spill] sm:$0xff] %v6130_v58  ;;  %v2435_v58 = vsel %vm473_vm1, %v2434_v23, %v5904_v27 }
 0xfad   :  { %v6132_v42 = vpop.permute.xlu1 %2304  ;;  %v2544_v43 = vpop.permute.xlu0 %2543 }
 0xfae   :  { %6683 = vst [vmem:[#allocation73_spill] sm:$0xff] %v6132_v42 }
 0xfb1   :  { %v6134_v24 = vpop.permute.xlu1 %2360  ;;  %v2463_v59 = vpop.permute.xlu0 %2462 }
 0xfb2   :  { %6684 = vst [vmem:[#allocation102_spill] sm:$0xff] %v6134_v24  ;;  %v2436_v24 = vsel %vm476_vm2, %v2435_v58, %v2420_v41 }
 0xfb3   :  { %v2437_v60 = vsel %vm1026_vm14, %v2436_v24, %v5910_v30 }
 0xfb5   :  { %v2445_v44 = vpop.permute.xlu1 %2444  ;;  %v2519_v51 = vpop.permute.xlu0 %2518 }
 0xfb6   :  { %v2465_v1 = vsel %vm470_vm0, %v5894_v26, %v2445_v44 }
 0xfb7   :  { %v2466_v42 = vsel %vm473_vm1, %v2465_v1, %v5912_v17 }
 0xfb9   :  { %v2476_v33 = vpop.permute.xlu1 %2475  ;;  %v2575_v28 = vpop.permute.xlu0 %2574 }
 0xfba   :  { %v2496_v27 = vsel %vm470_vm0, %v5902_v8, %v2476_v33  ;;  %v2527_v8 = vsel %vm470_vm0, %v5920_v13, %v2507_v12 }
 0xfbd   :  { %v2451_v6 = vpop.permute.xlu1 %2450  ;;  %v2494_v46 = vpop.permute.xlu0 %2493 }
 0xfbe   :  { %v2467_v25 = vsel %vm476_vm2, %v2466_v42, %v2451_v6 }
 0xfbf   :  { %v2468_v52 = vsel %vm1026_vm14, %v2467_v25, %v5926_v2  ;;  %v2497_v2 = vsel %vm473_vm1, %v2496_v27, %v5918_v40  ;;  %v2528_v40 = vsel %vm473_vm1, %v2527_v8, %v5934_v36  ;;  %v2558_v36 = vsel %vm470_vm0, %v5928_v34, %v2538_v29 }
 0xfc0   :  { %v2469_v23 = vsel %vm1029_vm15, %v2468_v52, %v2457_v15  ;;  %v2529_v13 = vsel %vm476_vm2, %v2528_v40, %v2513_v18  ;;  %v2559_v18 = vsel %vm473_vm1, %v2558_v36, %v5952_v38 }
 0xfc1   :  { %v2426_v0 = vpop.permute.xlu1 %2425  ;;  %v2550_v26 = vpop.permute.xlu0 %2549  ;;  %v2470_v24 = vsel %vm1032_vm3, %v2469_v23, %v5960_v14 }
 0xfc2   :  { %v2438_v17 = vsel %vm1029_vm15, %v2437_v60, %v2426_v0 }
 0xfc3   :  { %v2439_v44 = vsel %vm1032_vm3, %v2438_v17, %v5936_v3 }
 0xfc4   :  { %v2440_v42 = vsel %vm1035_vm4, %v2439_v44, %v2432_v63  ;;  %v2471_v63 = vsel %vm1035_vm4, %v2470_v24, %v2463_v59 }
 0xfc5   :  { %v2482_v6 = vpop.permute.xlu1 %2481  ;;  %2663 = vrot.lane.b32.xlu1 %v2440_v42, %s6685_s0  ;;  %v2606_v30 = vpop.permute.xlu0 %2605 }
 0xfc6   :  { %v2498_v52 = vsel %vm476_vm2, %v2497_v2, %v2482_v6 }
 0xfc7   :  { %v2499_v3 = vsel %vm1026_vm14, %v2498_v52, %v5944_v19  ;;  %v2530_v19 = vsel %vm1026_vm14, %v2529_v13, %v5968_v47 }
 0xfc8   :  { %v2500_v58 = vsel %vm1029_vm15, %v2499_v3, %v2488_v10  ;;  %v2531_v25 = vsel %vm1029_vm15, %v2530_v19, %v2519_v51 }
 0xfc9   :  { %v2569_v0 = vpop.permute.xlu1 %2568  ;;  %2667 = vrot.lane.b32.xlu1 %v2471_v63, %s6686_s23  ;;  %v2587_v1 = vpop.permute.xlu0 %2586  ;;  %v2501_v14 = vsel %vm1032_vm3, %v2500_v58, %v5984_v49  ;;  %v2532_v47 = vsel %vm1032_vm3, %v2531_v25, %v6008_v20  ;;  %v6696_v25 = vld [vmem:[#allocation85_spill] sm:$0xff] }
 0xfca   :  { %v2502_v53 = vsel %vm1035_vm4, %v2501_v14, %v2494_v46  ;;  %v2589_v41 = vsel %vm470_vm0, %v5942_v11, %v2569_v0  ;;  %v2560_v46 = vsel %vm476_vm2, %v2559_v18, %v2544_v43 }
 0xfcb   :  { %2671 = vrot.lane.b32.xlu0 %v2502_v53, %s6687_s26  ;;  %v2590_v49 = vsel %vm473_vm1, %v2589_v41, %v5976_v21  ;;  %v2561_v38 = vsel %vm1026_vm14, %v2560_v46, %v5992_v32  ;;  %v6697_v41 = vld [vmem:[#allocation90_spill] sm:$0xff] }
 0xfcc   :  { %v2591_v51 = vsel %vm476_vm2, %v2590_v49, %v2575_v28  ;;  %v2562_v15 = vsel %vm1029_vm15, %v2561_v38, %v2550_v26 }
 0xfcd   :  { %v2600_v10 = vpop.permute.xlu1 %2599  ;;  %v2618_v59 = vpop.permute.xlu0 %2617  ;;  %v2592_v43 = vsel %vm1026_vm14, %v2591_v51, %v6016_v5 }
 0xfce   :  { %v2620_v11 = vsel %vm470_vm0, %v5950_v35, %v2600_v10  ;;  %v2563_v35 = vsel %vm1032_vm3, %v2562_v15, %v5958_v54 }
 0xfcf   :  { %v2621_v20 = vsel %vm473_vm1, %v2620_v11, %v6000_v31 }
 0xfd0   :  { %v2622_v32 = vsel %vm476_vm2, %v2621_v20, %v2606_v30 }
 0xfd1   :  { %v2525_v33 = vpop.permute.xlu1 %2524  ;;  %v2169_v12 = vpop.permute.xlu0 %2168  ;;  %v2623_v5 = vsel %vm1026_vm14, %v2622_v32, %v5966_v45 }
 0xfd2   :  { %v2533_v34 = vsel %vm1035_vm4, %v2532_v47, %v2525_v33  ;;  %v2186_v45 = vsel %vm470_vm0, %v6032_v48, %v2169_v12 }
 0xfd3   :  { %2675 = vrot.lane.b32.xlu0 %v2533_v34, %s6688_s4  ;;  %v2187_v24 = vsel %vm473_vm1, %v2186_v45, %v6048_v57  ;;  %v6699_v34 = vld [vmem:[#allocation76_spill] sm:$0xff] }
 0xfd5   :  { %v2581_v21 = vpop.permute.xlu1 %2580  ;;  %v2383_v29 = vpop.permute.xlu0 %2382 }
 0xfd6   :  { %v2593_v60 = vsel %vm1029_vm15, %v2592_v43, %v2581_v21  ;;  %v2403_v8 = vsel %vm470_vm0, %v6040_v56, %v2383_v29  ;;  %v6701_v21 = vld [vmem:[#allocation101_spill] sm:$0xff] }
 0xfd7   :  { %v2594_v26 = vsel %vm1032_vm3, %v2593_v60, %v5974_v4  ;;  %v2404_v58 = vsel %vm473_vm1, %v2403_v8, %v5990_v55  ;;  %v6702_v60 = vld [vmem:[#allocation72_spill] sm:$0xff] }
 0xfd8   :  { %v2595_v54 = vsel %vm1035_vm4, %v2594_v26, %v2587_v1  ;;  %v6704_v26 = vld [vmem:[#allocation91_spill] sm:$0xff] }
 0xfd9   :  { %v2556_v27 = vpop.permute.xlu1 %2555  ;;  %v2228_v28 = vpop.permute.xlu0 %2227 }
 0xfda   :  { %v2564_v23 = vsel %vm1035_vm4, %v2563_v35, %v2556_v27  ;;  %v2248_v36 = vsel %vm470_vm0, %v6056_v7, %v2228_v28  ;;  %v6700_v7 = vld [vmem:[#allocation80_spill] sm:$0xff]  ;;  %v6703_v28 = vld [vmem:[#allocation95_spill] sm:$0xff] }
 0xfdb   :  { %2679 = vrot.lane.b32.xlu1 %v2564_v23, %s6689_s11 }
 0xfdd   :  { %v2612_v31 = vpop.permute.xlu1 %2611  ;;  %v6213_v17 = vpop.permute.xlu0 %2258 }
 0xfde   :  { %v2624_v44 = vsel %vm1029_vm15, %v2623_v5, %v2612_v31  ;;  %v2279_v31 = vsel %vm470_vm0, %v6704_v26, %v6213_v17 }
 0xfdf   :  { %v2625_v42 = vsel %vm1032_vm3, %v2624_v44, %v6024_v39  ;;  %2683 = vrot.lane.b32.xlu1 %v2595_v54, %s6690_s25  ;;  %v6705_v54 = vld [vmem:[#allocation107_spill] sm:$0xff] }
 0xfe0   :  { %v2626_v2 = vsel %vm1035_vm4, %v2625_v42, %v2618_v59  ;;  %v2280_v42 = vsel %vm473_vm1, %v2279_v31, %v6705_v54 }
 0xfe1   :  { %v2197_v4 = vpop.permute.xlu1 %2196  ;;  %2687 = vrot.lane.b32.xlu0 %v2626_v2, %s6691_s8  ;;  %v2181_v6 = vpop.permute.xlu0 %2180 }
 0xfe2   :  { %v2217_v14 = vsel %vm470_vm0, %v5982_v37, %v2197_v4  ;;  %v6706_v4 = vld [vmem:[#allocation106_spill] sm:$0xff] }
 0xfe3   :  { %2136 = vrot.lane.b32.xlu1 %v5876_v16, %s6692_s21  ;;  %v2218_v19 = vsel %vm473_vm1, %v2217_v14, %v5998_v22  ;;  %v6698_v22 = vld [vmem:[#allocation92_spill] sm:$0xff] }
 0xfe5   :  { %v2175_v30 = vpop.permute.xlu1 %2174  ;;  %2140 = vrot.lane.b32.xlu0 %v5772_v61, %s6692_s21  ;;  %v2234_v39 = vpop.permute.xlu0 %2233 }
 0xfe6   :  { %v2188_v52 = vsel %vm476_vm2, %v2187_v24, %v2175_v30 }
 0xfe7   :  { %v2189_v3 = vsel %vm1026_vm14, %v2188_v52, %v6006_v50  ;;  %2143 = vrot.lane.b32.xlu1 %v5876_v16, %s6693_s27  ;;  %v6708_v52 = vld [vmem:[#allocation73_spill] sm:$0xff] }
 0xfe8   :  { %v2190_v56 = vsel %vm1029_vm15, %v2189_v3, %v2181_v6 }
 0xfe9   :  { %v2389_v48 = vpop.permute.xlu1 %2388  ;;  %2146 = vrot.lane.b32.xlu0 %v5772_v61, %s6693_s27  ;;  %v2395_v57 = vpop.permute.xlu0 %2394  ;;  %v2191_v1 = vsel %vm1032_vm3, %v2190_v56, %v6094_v9 }
 0xfea   :  { %v2405_v63 = vsel %vm476_vm2, %v2404_v58, %v2389_v48  ;;  %v6709_v58 = vld [vmem:[#allocation74_spill] sm:$0xff] }
 0xfeb   :  { %v2406_v40 = vsel %vm1026_vm14, %v2405_v63, %v6072_v62  ;;  %2149 = vrot.lane.b32.xlu1 %v5876_v16, %s6694_s1  ;;  %v2192_v62 = vsel %vm1035_vm4, %v2191_v1, %v5876_v16  ;;  %v6710_v63 = vld [vmem:[#allocation84_spill] sm:$0xff]  ;;  %v6712_v1 = vld [vmem:[#allocation75_spill] sm:$0xff] }
 0xfec   :  { %v2407_v50 = vsel %vm1029_vm15, %v2406_v40, %v2395_v57 }
 0xfed   :  { %v2203_v0 = vpop.permute.xlu1 %2202  ;;  %2152 = vrot.lane.b32.xlu0 %v5772_v61, %s6694_s1  ;;  %v2209_v55 = vpop.permute.xlu0 %2208  ;;  %v2408_v51 = vsel %vm1032_vm3, %v2407_v50, %v6700_v7 }
 0xfee   :  { %v2219_v10 = vsel %vm476_vm2, %v2218_v19, %v2203_v0  ;;  %v6711_v0 = vld [vmem:[#allocation97_spill] sm:$0xff] }
 0xfef   :  { %2155 = vrot.lane.b32.xlu1 %v5876_v16, %s6695_s5  ;;  %v2220_v37 = vsel %vm1026_vm14, %v2219_v10, %v6696_v25  ;;  %v2249_v16 = vsel %vm473_vm1, %v2248_v36, %v6697_v41  ;;  %v6714_v36 = vld [vmem:[#allocation102_spill] sm:$0xff] }
 0xff0   :  { %v2250_v33 = vsel %vm476_vm2, %v2249_v16, %v2234_v39  ;;  %v2221_v47 = vsel %vm1029_vm15, %v2220_v37, %v2209_v55  ;;  %v6707_v39 = vld [vmem:[#allocation82_spill] sm:$0xff]  ;;  %v6715_v37 = vld [vmem:[#allocation93_spill] sm:$0xff] }
 0xff1   :  { %v2290_v13 = vpop.permute.xlu1 %2289  ;;  %2628 = vrot.lane.b32.xlu0 %v2192_v62, %s6685_s0  ;;  %v2265_v53 = vpop.permute.xlu0 %2264  ;;  %v2251_v12 = vsel %vm1026_vm14, %v2250_v33, %v6698_v22  ;;  %v2222_v11 = vsel %vm1032_vm3, %v2221_v47, %v6699_v34  ;;  %v6716_v47 = vld [vmem:[#allocation81_spill] sm:$0xff] }
 0xff2   :  { %v2310_v29 = vsel %vm470_vm0, %v6701_v21, %v2290_v13  ;;  %v2281_v30 = vsel %vm476_vm2, %v2280_v42, %v2265_v53  ;;  %v6713_v13 = vld [vmem:[#allocation86_spill] sm:$0xff] }
 0xff3   :  { %v2311_v27 = vsel %vm473_vm1, %v2310_v29, %v6702_v60  ;;  %v2282_v17 = vsel %vm1026_vm14, %v2281_v30, %v6707_v39 }
 0xff5   :  { %v2321_v59 = vpop.permute.xlu1 %2320  ;;  %v2240_v9 = vpop.permute.xlu0 %2239 }
 0xff6   :  { %v2252_v15 = vsel %vm1029_vm15, %v2251_v12, %v2240_v9  ;;  %v2341_v57 = vsel %vm470_vm0, %v6709_v58, %v2321_v59 }
 0xff7   :  { %v2253_v23 = vsel %vm1032_vm3, %v2252_v15, %v6703_v28  ;;  %v2342_v55 = vsel %vm473_vm1, %v2341_v57, %v6711_v0 }
 0xff9   :  { %v2352_v18 = vpop.permute.xlu1 %2351  ;;  %v2296_v49 = vpop.permute.xlu0 %2295 }
 0xffa   :  { %v2312_v5 = vsel %vm476_vm2, %v2311_v27, %v2296_v49  ;;  %v2372_v56 = vsel %vm470_vm0, %v6710_v63, %v2352_v18 }
 0xffb   :  { %v2313_v6 = vsel %vm1026_vm14, %v2312_v5, %v6706_v4  ;;  %v2373_v14 = vsel %vm473_vm1, %v2372_v56, %v6712_v1 }
 0xffd   :  { %v2215_v46 = vpop.permute.xlu1 %2214  ;;  %v2401_v38 = vpop.permute.xlu0 %2400 }
 0xffe   :  { %v2223_v20 = vsel %vm1035_vm4, %v2222_v11, %v2215_v46  ;;  %v2409_v43 = vsel %vm1035_vm4, %v2408_v51, %v2401_v38  ;;  %v6717_v46 = vld [vmem:[#allocation96_spill] sm:$0xff] }
 0xfff   :  { %2632 = vrot.lane.b32.xlu1 %v2223_v20, %s6686_s23 }
0x1001   :  { %v2271_v35 = vpop.permute.xlu1 %2270  ;;  %v2246_v32 = vpop.permute.xlu0 %2245 }
0x1002   :  { %v2254_v44 = vsel %vm1035_vm4, %v2253_v23, %v2246_v32  ;;  %v2283_v40 = vsel %vm1029_vm15, %v2282_v17, %v2271_v35 }
0x1003   :  { %2636 = vrot.lane.b32.xlu0 %v2254_v44, %s6687_s26  ;;  %v2284_v53 = vsel %vm1032_vm3, %v2283_v40, %v6713_v13 }
0x1005   :  { %v2327_v2 = vpop.permute.xlu1 %2326  ;;  %v2302_v45 = vpop.permute.xlu0 %2301 }
0x1006   :  { %v2314_v24 = vsel %vm1029_vm15, %v2313_v6, %v2302_v45  ;;  %v2343_v10 = vsel %vm476_vm2, %v2342_v55, %v2327_v2 }
0x1007   :  { %v2315_v3 = vsel %vm1032_vm3, %v2314_v24, %v6708_v52  ;;  %v2344_v41 = vsel %vm1026_vm14, %v2343_v10, %v6715_v37 }
0x1009   :  { %v2308_v8 = vpop.permute.xlu1 %2307  ;;  %v2358_v48 = vpop.permute.xlu0 %2357 }
0x100a   :  { %v2316_v50 = vsel %vm1035_vm4, %v2315_v3, %v2308_v8  ;;  %v2374_v59 = vsel %vm476_vm2, %v2373_v14, %v2358_v48 }
0x100b   :  { %2644 = vrot.lane.b32.xlu0 %v2316_v50, %s6689_s11  ;;  %v2375_v25 = vsel %vm1026_vm14, %v2374_v59, %v6714_v36 }
0x100d   :  { %v2364_v62 = vpop.permute.xlu1 %2363  ;;  %v2277_v19 = vpop.permute.xlu0 %2276 }
0x100e   :  { %v2285_v9 = vsel %vm1035_vm4, %v2284_v53, %v2277_v19  ;;  %v2376_v18 = vsel %vm1029_vm15, %v2375_v25, %v2364_v62 }
0x100f   :  { %2640 = vrot.lane.b32.xlu1 %v2285_v9, %s6688_s4  ;;  %v2377_v34 = vsel %vm1032_vm3, %v2376_v18, %v6717_v46  ;;  %v2708_v18 = vld [vmem:[#allocation26] sm:$0xff] }
0x1011   :  { %v2333_v16 = vpop.permute.xlu0 %2332  ;;  %v2339_v33 = vpop.permute.xlu1 %2338 }
0x1012   :  { %v2345_v49 = vsel %vm1029_vm15, %v2344_v41, %v2333_v16  ;;  %v2706_v41 = vld [vmem:[#allocation23] sm:$0xff]  ;;  %v2704_v16 = vld [vmem:[#allocation20] sm:$0xff] }
0x1013   :  { %v2346_v22 = vsel %vm1032_vm3, %v2345_v49, %v6716_v47 }
0x1014   :  { %v2347_v12 = vsel %vm1035_vm4, %v2346_v22, %v2339_v33 }
0x1015   :  { %2648 = vrot.lane.b32.xlu1 %v2347_v12, %s6690_s25  ;;  %v2370_v11 = vpop.permute.xlu0 %2369 }
0x1016   :  { %v2378_v7 = vsel %vm1035_vm4, %v2377_v34, %v2370_v11 }
0x1017   :  { %2652 = vrot.lane.b32.xlu0 %v2378_v7, %s6691_s8 }
0x1037   :  { %v2664_v51 = vpop.permute.xlu1 %2663 }
0x1038   :  { %v2690_v29 = vsel %vm1488_vm5, %v2409_v43, %v2664_v51 }
0x103b   :  { %v2668_v38 = vpop.permute.xlu1 %2667 }
0x103c   :  { %v2691_v15 = vsel %vm1491_vm6, %v2690_v29, %v2668_v38  ;;  %v6725_v38 = vmov 0.0   ;;  %v2703_v29 = vld [vmem:[#allocation18] sm:$0xf] }
0x103d   :  { %v2672_v21 = vpop.permute.xlu0 %2671 }
0x103e   :  { %v2692_v27 = vsel %vm1494_vm7, %v2691_v15, %v2672_v21 }
0x1045   :  { %v2676_v20 = vpop.permute.xlu0 %2675 }
0x1046   :  { %v2693_v35 = vsel %vm6718_vm11, %v2692_v27, %v2676_v20  ;;  %vm6723_vm11 = vmmov %vm6719_vm13 }
0x104d   :  { %v2680_v60 = vpop.permute.xlu1 %2679 }
0x104e   :  { %v2694_v28 = vsel %vm6719_vm13, %v2693_v35, %v2680_v60  ;;  %vm6724_vm13 = vmmov %vm6720_vm8 }
0x1051   :  { %v2684_v23 = vpop.permute.xlu1 %2683 }
0x1052   :  { %v2695_v32 = vsel %vm1503_vm10, %v2694_v28, %v2684_v23 }
0x1053   :  { %v2688_v26 = vpop.permute.xlu0 %2687 }
0x1054   :  { %v2696_v31 = vsel %vm6720_vm8, %v2695_v32, %v2688_v26  ;;  %vm2750_vm8 = vcmask 1043456  }
0x1055   :  { %2698 = vrot.lane.b32.xlu1 %v2696_v31, %s6721_s30  ;;  %v2137_v5 = vpop.permute.xlu1 %2136 }
0x1056   :  { %v2158_v44 = vsel %vm470_vm0, %v5772_v61, %v2137_v5 }
0x1057   :  { %v2141_v43 = vpop.permute.xlu0 %2140 }
0x1058   :  { %v2159_v42 = vsel %vm473_vm1, %v2158_v44, %v2141_v43  ;;  %v2705_v43 = vld [vmem:[#allocation21] sm:$0xf] }
0x1059   :  { %v2144_v54 = vpop.permute.xlu1 %2143 }
0x105a   :  { %v2160_v4 = vsel %vm476_vm2, %v2159_v42, %v2144_v54  ;;  %v2707_v54 = vld [vmem:[#allocation24] sm:$0xf] }
0x105b   :  { %v2147_v2 = vpop.permute.xlu0 %2146 }
0x105c   :  { %v2161_v45 = vsel %vm1026_vm14, %v2160_v4, %v2147_v2 }
0x105d   :  { %v2150_v6 = vpop.permute.xlu1 %2149 }
0x105e   :  { %v2162_v24 = vsel %vm1029_vm15, %v2161_v45, %v2150_v6 }
0x105f   :  { %v2153_v30 = vpop.permute.xlu0 %2152 }
0x1060   :  { %v2163_v17 = vsel %vm1032_vm3, %v2162_v24, %v2153_v30  ;;  %vm2701_vm3 = vcmask 523264  }
0x1061   :  { %v2156_v39 = vpop.permute.xlu1 %2155 }
0x1062   :  { %v2164_v3 = vsel %vm1035_vm4, %v2163_v17, %v2156_v39 }
0x1063   :  { %v2629_v8 = vpop.permute.xlu0 %2628 }
0x1064   :  { %v2655_v48 = vsel %vm1488_vm5, %v2164_v3, %v2629_v8 }
0x1071   :  { %v2633_v52 = vpop.permute.xlu1 %2632 }
0x1072   :  { %v2656_v57 = vsel %vm1491_vm6, %v2655_v48, %v2633_v52  ;;  %vm2730_vm6 = vcmask 1039360  }
0x1075   :  { %v2637_v61 = vpop.permute.xlu0 %2636 }
0x1076   :  { %v2657_v63 = vsel %vm1494_vm7, %v2656_v57, %v2637_v61 }
0x107d   :  { %v2645_v56 = vpop.permute.xlu0 %2644 }
0x1081   :  { %v2641_v58 = vpop.permute.xlu1 %2640 }
0x1082   :  { %v2658_v40 = vsel %vm6722_vm9, %v2657_v63, %v2641_v58 }
0x1083   :  { %v2659_v0 = vsel %vm6723_vm11, %v2658_v40, %v2645_v56 }
0x1087   :  { %v2649_v50 = vpop.permute.xlu1 %2648 }
0x1088   :  { %v2660_v55 = vsel %vm1503_vm10, %v2659_v0, %v2649_v50  ;;  %vm2737_vm10 = vcmask 1031168  }
0x1089   :  { %v2653_v1 = vpop.permute.xlu0 %2652 }
0x108a   :  { %v2661_v14 = vsel %vm6724_vm13, %v2660_v55, %v2653_v1  ;;  %vm2952_vm13 = vcmask 998400  }
0x10c7   :  { %v2699_v62 = vpop.permute.xlu1 %2698 }
0x10c8   :  { %v2702_v13 = vsel %vm2701_vm3, %v2661_v14, %v2699_v62  ;;  %v2905_v62 = vld [vmem:[#allocation32] sm:$0xff]  ;;  %vm2945_vm3 = vcmask 1022976  }
0x10c9   :  { %v2710_v53 = vmul.f32 0.2, %v2702_v13  ;;  %vm2709_vm4 = vcmp.ge.f32.partialorder %v2702_v13, 0.0  ;;  %v2849_v5 = vpack.c.bf16 %v2702_v13, %v2702_v13 }
0x10cb   :  { %v2711_v19 = vsel %vm2709_vm4, %v2702_v13, %v2710_v53  ;;  %v2859_v44 = vsel %vm2750_vm8, %v2849_v5, 0  ;;  %v2903_v13 = vld [vmem:[#allocation29] sm:$0xff]  ;;  %v2907_v53 = vld [vmem:[#allocation35] sm:$0xff] }
0x10cc   :  { %2716 = vrot.lane.b32.xlu1 %v2711_v19, %s6692_s21  ;;  %2713 = vrot.lane.b32.xlu0 %v2711_v19, %s4581_s20 }
0x10d0   :  { %2719 = vrot.lane.b32.xlu0 %v2711_v19, %s6694_s1 }
0x113e   :  { %v2714_v10 = vpop.permute.xlu0 %2713  ;;  %v2717_v59 = vpop.permute.xlu1 %2716 }
0x113f   :  { %v2722_v36 = vsel %vm470_vm0, %v2714_v10, %v2717_v59 }
0x1142   :  { %v2720_v9 = vpop.permute.xlu0 %2719 }
0x1143   :  { %v2723_v25 = vsel %vm470_vm0, %v2717_v59, %v2720_v9 }
0x1144   :  { %v3924_v37 = vpack.i.bf16 %v2723_v25, %v2722_v36 }
0x1146   :  { %3925 = vrot.lane.b32.xlu0 %v3924_v37, %s6655_s28  ;;  %3920 = vrot.lane.b32.xlu1 %v3924_v37, %s4581_s20 }
0x114a   :  { %2800 = vperm.xlu0 %3803, %v2706_v41   ;;  %2744 = vperm.xlu1 %3802, %v2704_v16  }
0x114e   :  { %2852 = vperm.xlu1 %3802, %v2708_v18  }
0x11b8   :  { %v3926_v49 = vpop.permute.xlu0 %3925  ;;  %v3921_v33 = vpop.permute.xlu1 %3920 }
0x11b9   :  { %v3928_v47 = vunpack.i.h.bf16 %v3926_v49  ;;  %v3927_v22 = vunpack.i.l.bf16 %v3926_v49  ;;  %v3923_v12 = vunpack.i.h.bf16 %v3921_v33  ;;  %v3922_v46 = vunpack.i.l.bf16 %v3921_v33  ;;  %v2902_v33 = vld [vmem:[#allocation27] sm:$0xf] }
0x11bb   :  { %v2731_v34 = vsel %vm2730_vm6, %v3922_v46, %v3923_v12  ;;  %v2738_v11 = vsel %vm2737_vm10, %v3927_v22, %v3928_v47 }
0x11bc   :  { %v2740_v7 = vpack.c.bf16 %v2731_v34, %v2722_v36  ;;  %v2741_v51 = vpack.c.bf16 %v2738_v11, %v2738_v11 }
0x11be   :  { %3522 = vmatpush3.bf16.msra.mxu1 %v2740_v7  ;;  %v2752_v21 = vsel %vm2750_vm8, %v2741_v51, 0 }
0x11bf   :  { %3523 = vmatprep.subr.bf16.mxu1 %v6725_v38 }
0x11c2   :  { %3524 = vmatpush3.bf16.msra.mxu1 %v2752_v21 }
0x11c3   :  { %3541 = vmatprep.subr.bf16.mxu1 %v6725_v38 }
0x11c5   :  { %3526 = vmatmul.mubr.msk.bf16.vlgmr.msra.gmra.mrb[24].mxu1 %vm1494_vm7, %v2703_v29 }
0x11c6   :  { %3545 = vmatprep.mubr.msk.bf16.mxu1 %vm4601_vm12, %v6725_v38 }
0x11c9   :  { %v2745_v15 = vpop.permute.xlu1 %2744  ;;  %v2801_v2 = vpop.permute.xlu0 %2800 }
0x11cd   :  { %v2853_v42 = vpop.permute.xlu1 %2852 }
0x11ce   :  { %v3581_v4 = vadd.f32 %v2853_v42, %v2801_v2 }
0x1298   :  { %v2788_v20 = vpop.f32.mrb[24].mxu1 }
0x1299   :  { %v2789_v60 = vadd.f32 %v2788_v20, %v2745_v15  ;;  %v3527_v27 = vpop.f32.mrb[25].mxu1  ;;  %v2904_v20 = vld [vmem:[#allocation30] sm:$0xf] }
0x129a   :  { %v2791_v35 = vpop.f32.mrb[26].mxu1  ;;  %v2906_v27 = vld [vmem:[#allocation33] sm:$0xf] }
0x129b   :  { %vm2794_vm9 = vcmp.ge.f32.partialorder %v2789_v60, 0.0  ;;  %v2795_v28 = vmul.f32 0.2, %v2789_v60  ;;  %v3528_v23 = vpop.f32.mrb[27].mxu1 }
0x129d   :  { %v2796_v32 = vsel %vm2794_vm9, %v2789_v60, %v2795_v28 }
0x129e   :  { %v2797_v26 = vpack.c.bf16 %v2796_v32, %v2796_v32 }
0x12a0   :  { %v2807_v31 = vsel %vm2750_vm8, %v2797_v26, 0 }
0x12a1   :  { %3530 = vmatpush3.bf16.msra.mxu0 %v2807_v31 }
0x12a2   :  { %3535 = vmatprep.subr.bf16.mxu0 %v6725_v38 }
0x12a4   :  { %3532 = vmatmul.mubr.msk.bf16.vlgmr.msra.gmra.mrb[16].mxu0 %vm1488_vm5, %v2705_v43 }
0x12a5   :  { %3536 = vmatpush3.bf16.msra.mxu0 %v2859_v44  ;;  %3537 = vmatprep.mubr.msk.bf16.mxu0 %vm4601_vm12, %v6725_v38 }
0x12a6   :  { %3561 = vmatprep.subr.bf16.mxu0 %v6725_v38 }
0x12b0   :  { %3538 = vmatmul.mubr.msk.bf16.vlgmr.msra.gmra.mrb[16].mxu0 %vm1488_vm5, %v2707_v54 }
0x12b1   :  { %3569 = vmatprep.mubr.msk.bf16.mxu0 %vm4601_vm12, %v6725_v38 }
0x1383   :  { %v2895_v6 = vpop.f32.mrb[16].mxu0 }
0x1384   :  { %v6381_v45 = vadd.f32 %v3581_v4, %v2895_v6  ;;  %v3539_v30 = vpop.f32.mrb[17].mxu0 }
0x1385   :  { %v2898_v24 = vpop.f32.mrb[18].mxu0 }
0x1386   :  { %vm2908_vm11 = vcmp.ge.f32.partialorder %v6381_v45, 0.0  ;;  %v2909_v39 = vmul.f32 0.2, %v6381_v45  ;;  %v3540_v17 = vpop.f32.mrb[19].mxu0  ;;  %v3063_v15 = vpack.c.bf16 %v6381_v45, %v6381_v45 }
0x1388   :  { %v2910_v8 = vsel %vm2908_vm11, %v6381_v45, %v2909_v39  ;;  %v3073_v60 = vsel %vm2750_vm8, %v3063_v15, 0 }
0x1389   :  { %2915 = vrot.lane.b32.xlu1 %v2910_v8, %s4581_s20  ;;  %2912 = vrot.lane.b32.xlu0 %v2910_v8, %s6644_s12 }
0x138d   :  { %2924 = vrot.lane.b32.xlu1 %v2910_v8, %s6726_s13  ;;  %2921 = vrot.lane.b32.xlu0 %v2910_v8, %s6694_s1 }
0x1391   :  { %2927 = vrot.lane.b32.xlu1 %v2910_v8, %s6727_s2  ;;  %2918 = vrot.lane.b32.xlu0 %v2910_v8, %s6692_s21 }
0x1395   :  { %2930 = vrot.lane.b32.xlu0 %v2910_v8, %s6728_s15 }
0x13fb   :  { %v2916_v52 = vpop.permute.xlu1 %2915  ;;  %v2913_v3 = vpop.permute.xlu0 %2912 }
0x13fc   :  { %v2933_v57 = vsel %vm470_vm0, %v2913_v3, %v2916_v52 }
0x13ff   :  { %v2925_v61 = vpop.permute.xlu1 %2924  ;;  %v2922_v48 = vpop.permute.xlu0 %2921 }
0x1400   :  { %v2936_v40 = vsel %vm476_vm2, %v2922_v48, %v2925_v61 }
0x1403   :  { %v2919_v58 = vpop.permute.xlu0 %2918  ;;  %v2928_v63 = vpop.permute.xlu1 %2927 }
0x1404   :  { %v2934_v56 = vsel %vm473_vm1, %v2933_v57, %v2919_v58  ;;  %v2937_v50 = vsel %vm1026_vm14, %v2936_v40, %v2928_v63  ;;  %v3117_v58 = vld [vmem:[#allocation2] sm:$0x1] }
0x1405   :  { %v2935_v55 = vsel %vm476_vm2, %v2934_v56, %v2922_v48 }
0x1407   :  { %v2931_v0 = vpop.permute.xlu0 %2930 }
0x1408   :  { %v2938_v1 = vsel %vm1029_vm15, %v2937_v50, %v2931_v0 }
0x1409   :  { %v3934_v14 = vpack.i.bf16 %v2938_v1, %v2935_v55 }
0x140b   :  { %3935 = vrot.lane.b32.xlu0 %v3934_v14, %s4588_s18  ;;  %3930 = vrot.lane.b32.xlu1 %v3934_v14, %s6644_s12 }
0x140f   :  { %3014 = vperm.xlu0 %3803, %v2905_v62   ;;  %2959 = vperm.xlu1 %3802, %v2903_v13  }
0x1413   :  { %3066 = vperm.xlu1 %3802, %v2907_v53  }
0x147d   :  { %v3936_v19 = vpop.permute.xlu0 %3935  ;;  %v3931_v10 = vpop.permute.xlu1 %3930 }
0x147e   :  { %v3938_v59 = vunpack.i.h.bf16 %v3936_v19  ;;  %v3937_v9 = vunpack.i.l.bf16 %v3936_v19  ;;  %v3933_v36 = vunpack.i.h.bf16 %v3931_v10  ;;  %v3932_v25 = vunpack.i.l.bf16 %v3931_v10 }
0x1480   :  { %v2946_v37 = vsel %vm2945_vm3, %v3932_v25, %v3933_v36  ;;  %v2953_v41 = vsel %vm2952_vm13, %v3937_v9, %v3938_v59 }
0x1481   :  { %v2955_v16 = vpack.c.bf16 %v2946_v37, %v2935_v55  ;;  %v2956_v18 = vpack.c.bf16 %v2953_v41, %v2953_v41 }
0x1483   :  { %3542 = vmatpush3.bf16.msra.mxu1 %v2955_v16  ;;  %v2966_v49 = vsel %vm2750_vm8, %v2956_v18, 0 }
0x1484   :  { %3543 = vmatprep.subr.bf16.mxu1 %v6725_v38 }
0x1487   :  { %3544 = vmatpush3.bf16.msra.mxu1 %v2966_v49 }
0x1488   :  { %3549 = vmatprep.subr.bf16.mxu1 %v6725_v38 }
0x148a   :  { %3546 = vmatmul.mubr.msk.bf16.vlgmr.msra.gmra.mrb[28].mxu1 %vm1494_vm7, %v2902_v33 }
0x148b   :  { %3551 = vmatprep.mubr.msk.bf16.mxu1 %vm4601_vm12, %v6725_v38 }
0x148e   :  { %v2960_v47 = vpop.permute.xlu1 %2959  ;;  %v3015_v28 = vpop.permute.xlu0 %3014 }
0x1492   :  { %v3067_v35 = vpop.permute.xlu1 %3066 }
0x1493   :  { %v3583_v23 = vadd.f32 %v3067_v35, %v3015_v28 }
0x155d   :  { %v3002_v22 = vpop.f32.mrb[28].mxu1 }
0x155e   :  { %v3003_v12 = vadd.f32 %v3002_v22, %v2960_v47  ;;  %v3547_v46 = vpop.f32.mrb[29].mxu1 }
0x155f   :  { %v3005_v34 = vpop.f32.mrb[30].mxu1 }
0x1560   :  { %vm3008_vm4 = vcmp.ge.f32.partialorder %v3003_v12, 0.0  ;;  %v3009_v11 = vmul.f32 0.2, %v3003_v12  ;;  %v3548_v7 = vpop.f32.mrb[31].mxu1 }
0x1561   :  { %v3198_v7 = vlaneseq }
0x1562   :  { %v3010_v51 = vsel %vm3008_vm4, %v3003_v12, %v3009_v11  ;;  %v3116_v11 = vld [vmem:[#allocation36] sm:$0x1] }
0x1563   :  { %v3011_v21 = vpack.c.bf16 %v3010_v51, %v3010_v51  ;;  %v3199_v51 = vshrl.u32 %v3198_v7, 7 }
0x1565   :  { %v3021_v29 = vsel %vm2750_vm8, %v3011_v21, 0  ;;  %v3200_v21 = vsub.s32 0, %v3199_v51 }
0x1566   :  { %3550 = vmatpush3.bf16.msra.mxu1 %v3021_v29 }
0x1567   :  { %3555 = vmatprep.subr.bf16.mxu1 %v6725_v38 }
0x1569   :  { %3552 = vmatmul.mubr.msk.bf16.vlgmr.msra.gmra.mrb[32].mxu1 %vm1488_vm5, %v2904_v20 }
0x156a   :  { %3556 = vmatpush3.bf16.msra.mxu1 %v3073_v60  ;;  %3557 = vmatprep.mubr.msk.bf16.mxu1 %vm4601_vm12, %v6725_v38 }
0x1575   :  { %3558 = vmatmul.mubr.msk.bf16.vlgmr.msra.gmra.mrb[32].mxu1 %vm1488_vm5, %v2906_v27 }
0x1648   :  { %v3109_v32 = vpop.f32.mrb[32].mxu1 }
0x1649   :  { %v3584_v26 = vadd.f32 %v3583_v23, %v3109_v32  ;;  %v3559_v31 = vpop.f32.mrb[33].mxu1 }
0x164a   :  { %v3112_v5 = vpop.f32.mrb[34].mxu1 }
0x164b   :  { %vm3118_vm7 = vcmp.ge.f32.partialorder %v3584_v26, 0.0  ;;  %v3119_v43 = vmul.f32 0.2, %v3584_v26  ;;  %v3560_v44 = vpop.f32.mrb[35].mxu1 }
0x164d   :  { %v3120_v54 = vsel %vm3118_vm7, %v3584_v26, %v3119_v43 }
0x164e   :  { %3125 = vrot.lane.b32.xlu1 %v3120_v54, %s4581_s20  ;;  %3122 = vrot.lane.b32.xlu0 %v3120_v54, %s6644_s12 }
0x1652   :  { %3134 = vrot.lane.b32.xlu1 %v3120_v54, %s6726_s13  ;;  %3131 = vrot.lane.b32.xlu0 %v3120_v54, %s6694_s1 }
0x1656   :  { %3137 = vrot.lane.b32.xlu1 %v3120_v54, %s6727_s2  ;;  %3128 = vrot.lane.b32.xlu0 %v3120_v54, %s6692_s21 }
0x165a   :  { %3140 = vrot.lane.b32.xlu0 %v3120_v54, %s6728_s15 }
0x16c0   :  { %v3126_v42 = vpop.permute.xlu1 %3125  ;;  %v3123_v2 = vpop.permute.xlu0 %3122 }
0x16c1   :  { %v3143_v30 = vsel %vm470_vm0, %v3123_v2, %v3126_v42  ;;  %vm3173_vm0 = vcmask 1014784  }
0x16c4   :  { %v3135_v4 = vpop.permute.xlu1 %3134  ;;  %v3132_v6 = vpop.permute.xlu0 %3131 }
0x16c5   :  { %v3146_v17 = vsel %vm476_vm2, %v3132_v6, %v3135_v4 }
0x16c8   :  { %v3129_v45 = vpop.permute.xlu0 %3128  ;;  %v3138_v24 = vpop.permute.xlu1 %3137 }
0x16c9   :  { %v3144_v39 = vsel %vm473_vm1, %v3143_v30, %v3129_v45  ;;  %v3147_v8 = vsel %vm1026_vm14, %v3146_v17, %v3138_v24  ;;  %vm3180_vm1 = vcmask 1006592  }
0x16ca   :  { %v3145_v3 = vsel %vm476_vm2, %v3144_v39, %v3132_v6  ;;  %vm6729_vm2 = vcmask 457728  }
0x16cc   :  { %v3141_v52 = vpop.permute.xlu0 %3140 }
0x16cd   :  { %v3148_v61 = vsel %vm1029_vm15, %v3147_v8, %v3141_v52 }
0x16ce   :  { %v3944_v48 = vpack.i.bf16 %v3148_v61, %v3145_v3 }
0x16d0   :  { %3945 = vrot.lane.b32.xlu0 %v3944_v48, %s6655_s28  ;;  %3940 = vrot.lane.b32.xlu1 %v3944_v48, %s4581_s20  ;;  %s4655_s20 = smov [#allocation38]  }
0x16d4   :  { %3955 = vrot.lane.b32.xlu0 %v3944_v48, %s6667_s10  ;;  %3950 = vrot.lane.b32.xlu1 %v3944_v48, %s6644_s12 }
0x16d8   :  { %3965 = vrot.lane.b32.xlu0 %v3944_v48, %s4588_s18  ;;  %3960 = vrot.lane.b32.xlu1 %v3944_v48, %s4589_s3  ;;  %s3256_s18 = sshll.u32 %s4655_s20, 4  ;;  %s3257_s18 = int_to_ptr.vmem [resolvable:$true] %s3256_s18 }
0x16d9   :  { %s4472_s3 = scalar_lea.vmem %s3257_s18, 16  ;;  %s4476_s12 = scalar_lea.vmem %s3257_s18, 32 }
0x16da   :  { %p4473_p8 = scmp.ne.s32.totalorder %s3257_s18, %s4472_s3  ;;  %p4477_p9 = scmp.lt.s32.totalorder %s3257_s18, %s3257_s18 }
0x16db   :  { %p4478_p10 = scmp.lt.s32.totalorder %s4476_s12, %s4472_s3 }
0x16dc   :  { %3195 = vperm.xlu1 %3802, %v3117_v58  }
0x16dd   :  { %p4479_p11 = por %p4478_p10, %p4477_p9 }
0x16df   :  { %p4480_p12 = pnand %p4479_p11, %p4473_p8 }
0x1742   :  { %v3946_v57 = vpop.permute.xlu0 %3945  ;;  %v3941_v63 = vpop.permute.xlu1 %3940 }
0x1743   :  { %v3943_v56 = vunpack.i.h.bf16 %v3941_v63  ;;  %v3942_v40 = vunpack.i.l.bf16 %v3941_v63  ;;  %v3948_v50 = vunpack.i.h.bf16 %v3946_v57  ;;  %v3947_v0 = vunpack.i.l.bf16 %v3946_v57 }
0x1745   :  { %v3155_v55 = vsel %vm2730_vm6, %v3942_v40, %v3943_v56  ;;  %v3161_v19 = vsel %vm2737_vm10, %v3947_v0, %v3948_v50 }
0x1746   :  { %v3189_v1 = vpack.c.bf16 %v3155_v55, %v3145_v3  ;;  %v3956_v14 = vpop.permute.xlu0 %3955  ;;  %v3951_v62 = vpop.permute.xlu1 %3950 }
0x1747   :  { %v3953_v13 = vunpack.i.h.bf16 %v3951_v62  ;;  %v3952_v53 = vunpack.i.l.bf16 %v3951_v62  ;;  %v3958_v10 = vunpack.i.h.bf16 %v3956_v14  ;;  %v3957_v59 = vunpack.i.l.bf16 %v3956_v14 }
0x1748   :  { %3562 = vmatpush3.bf16.msra.mxu0 %v3189_v1 }
0x1749   :  { %v3167_v9 = vsel %vm2945_vm3, %v3952_v53, %v3953_v13  ;;  %3563 = vmatprep.subr.bf16.mxu0 %v6725_v38  ;;  %v3174_v33 = vsel %vm3173_vm0, %v3957_v59, %v3958_v10 }
0x174a   :  { %v3190_v36 = vpack.c.bf16 %v3167_v9, %v3161_v19  ;;  %v3966_v25 = vpop.permute.xlu0 %3965  ;;  %v3961_v37 = vpop.permute.xlu1 %3960 }
0x174b   :  { %v3968_v41 = vunpack.i.h.bf16 %v3966_v25  ;;  %v3967_v16 = vunpack.i.l.bf16 %v3966_v25  ;;  %v3963_v18 = vunpack.i.h.bf16 %v3961_v37  ;;  %v3962_v49 = vunpack.i.l.bf16 %v3961_v37 }
0x174c   :  { %3564 = vmatpush3.bf16.msra.mxu0 %v3190_v36 }
0x174d   :  { %v3187_v47 = vsel %vm2952_vm13, %v3967_v16, %v3968_v41  ;;  %v3181_v22 = vsel %vm3180_vm1, %v3962_v49, %v3963_v18  ;;  %3565 = vmatprep.subr.bf16.mxu0 %v6725_v38 }
0x174e   :  { %v3191_v12 = vpack.c.bf16 %v3181_v22, %v3174_v33  ;;  %v3192_v46 = vpack.c.bf16 %v3187_v47, %v3187_v47 }
0x1750   :  { %3566 = vmatpush3.bf16.msra.mxu0 %v3191_v12  ;;  %v3206_v34 = vsel %vm2750_vm8, %v3192_v46, 0 }
0x1751   :  { %3567 = vmatprep.subr.bf16.mxu0 %v6725_v38 }
0x1754   :  { %3568 = vmatpush3.bf16.msra.mxu0 %v3206_v34 }
0x1757   :  { %3570 = vmatmul.mubr.msk.bf16.vlgmr.msra.gmra.mrb[20].mxu0 %vm6729_vm2, %v3116_v11 }
0x175b   :  { %v3196_v29 = vpop.permute.xlu1 %3195 }
0x175c   :  { %v3201_v15 = vrot.slane %v3196_v29, %v3200_v21 }
0x182a   :  { %v3242_v20 = vpop.f32.mrb[20].mxu0 }
0x182b   :  { %v3243_v60 = vadd.f32 %v3242_v20, %v3201_v15  ;;  %v3571_v27 = vpop.f32.mrb[21].mxu0 }
0x182c   :  { %v3245_v35 = vpop.f32.mrb[22].mxu0 }
0x182d   :  { %3986 = vtanh.f32 %v3243_v60  ;;  %v3572_v28 = vpop.f32.mrb[23].mxu0 }
0x1837   :  { %v3987_v38 = vpop.eup %3986 }
0x1838   :  { %3249 = vst [vmem:[#allocation38] sm:$0x1] %v3987_v38 }
0x1839   :  { %4483 = shalt.err (!%p4480_p12)
}
0x183a   :  { %s4484_s28 = scalar_lea.hbm %s4827_s6, 16 }
0x183b   :  { %p4485_p13 = scmp.ne.s32.totalorder %s4827_s6, %s4484_s28  ;;  %p4488_p0 = scmp.lt.u32.totalorder %s4484_s28, %s4827_s6 }
0x183d   :  { %p4490_p1 = pnand %p4488_p0, %p4485_p13 }
0x183f   :  { %4493 = shalt.err (!%p4490_p1)
}
0x1840   :  { %3259 = dma.vmem_to_hbm [thread:$0]  %s3257_s18, 16, %s4827_s6, [#allocation5]  }
0x1841   :  { %4518 = dma.done.wait [#allocation5], 16  }
0x1842   :  { %4519 = vsyncadd [#allocation5], 4294967280 }
0x1843   :  { %3263 = vsyncpa [#allocation4], 1 }
0x1844   :  { %3264 = vsyncpa [#allocation7], 1 }
0x1845   :  { %3265 = vsyncpa [#allocation10], 1 }
0x1846   :  { %3266 = vsyncpa [#allocation13], 1 }
0x1847   :  { %3267 = vsyncpa [#allocation16], 1 }
0x1848   :  { %3268 = vsyncpa [#allocation19], 1 }
0x1849   :  { %3269 = vsyncpa [#allocation22], 1 }
0x184a   :  { %3270 = vsyncpa [#allocation25], 1 }
0x184b   :  { %3271 = vsyncpa [#allocation28], 1 }
0x184c   :  { %3272 = vsyncpa [#allocation31], 1 }
0x184d   :  { %3273 = vsyncpa [#allocation34], 1 }
0x184e   :  { %3274 = vsyncpa [#allocation37], 1 }
0x184f   :  { %3275 = vsyncpa [#allocation5], 1 }

</bundles_post_ra>
